<compile_context>
chip_gen: v7x
topology: tpu7x:2x2x1
jax: 0.10.0
libtpu: 0.0.40
codegen_flags: <defaults>
</compile_context>

<pallas_src>
import functools
import math

import jax
import jax.numpy as jnp
from jax.experimental import pallas as pl
from jax.experimental.pallas import tpu as pltpu


def _round_up(x, m):
    return ((x + m - 1) // m) * m


def _use_bf16_gates():
    """bf16 VPU/EUP exists on v6e/v7x; on v5e (no bf16 VPU/EUP) keep gate math in f32."""
    try:
        kind = jax.devices()[0].device_kind.lower()
    except Exception:  # pragma: no cover - defensive
        return False
    return ("v6" in kind) or ("v7" in kind)


def _critic_kernel(state_ref, action_ref,
                   w_fused_ref, b_fused_ref, w_hh_ref,
                   w13_h_ref, w13_a_ref, b13_ref, wq_ref, bq_ref,
                   q_ref, g_scratch, *, gates_bf16):
    T, TB, s_d = state_ref.shape          # time-major state tile: (cont, tile_b, state_dim)
    Hp = w_hh_ref.shape[0]                # padded hidden size (multiple of 128)
    G4 = 4 * Hp

    # ---- Fused encoder + LSTM input projection, hoisted out of the recurrence -------------
    # One MXU matmul over all T*TB rows; staged to VMEM scratch in bf16 (bias added in f32
    # per step so the bias+matmul rounding happens in f32).
    x2d = state_ref[...].reshape(T * TB, s_d)                                   # bf16
    g_all = jnp.dot(x2d, w_fused_ref[...], preferred_element_type=jnp.float32)  # f32
    g_scratch[...] = g_all.astype(jnp.bfloat16).reshape(T, TB, G4)

    w_hh = w_hh_ref[...]                                                        # (Hp, 4Hp) bf16
    # Hoist the bias broadcast out of the loop (JAX does not CSE broadcast_in_dim).
    b_fused = jnp.broadcast_to(b_fused_ref[...], (TB, G4)).astype(jnp.float32)  # (TB, 4Hp) f32
    gate_dtype = jnp.bfloat16 if gates_bf16 else jnp.float32

    # ---- Serial LSTM recurrence (h @ w_hh + gate nonlinearities per step) ------------------
    # Fused gate column order is [i, f, o, g] (regrouped in _prep_weights), so one sigmoid
    # covers a contiguous 3*Hp slab and one tanh covers the last Hp slab.
    def step(t, carry):
        h, c = carry
        gates = (g_scratch[t].astype(jnp.float32) + b_fused
                 + jnp.dot(h.astype(w_hh.dtype), w_hh,
                           preferred_element_type=jnp.float32))                 # (TB, 4Hp) f32
        gs = gates.astype(gate_dtype)
        sig = jax.nn.sigmoid(gs[:, :3 * Hp]).astype(jnp.float32)                # i | f | o
        g_g = jnp.tanh(gs[:, 3 * Hp:]).astype(jnp.float32)                      # g
        i_g = sig[:, 0 * Hp:1 * Hp]
        f_g = sig[:, 1 * Hp:2 * Hp]
        o_g = sig[:, 2 * Hp:3 * Hp]
        c = f_g * c + i_g * g_g                                                 # f32 cell update
        h = o_g * jnp.tanh(c)
        return (h, c)

    h0 = jnp.zeros((TB, Hp), jnp.float32)
    c0 = jnp.zeros((TB, Hp), jnp.float32)
    h, _ = jax.lax.fori_loop(0, T, step, (h0, c0), unroll=min(T, 8))

    # ---- Fused twin Q heads: no lane-offset concatenate, lane-dense (128-wide) output ------
    h13 = jnp.maximum(
        jnp.dot(h.astype(w13_h_ref.dtype), w13_h_ref[...],
                preferred_element_type=jnp.float32)
        + jnp.dot(action_ref[...], w13_a_ref[...],
                  preferred_element_type=jnp.float32)
        + b13_ref[...],
        0.0)                                                                    # (TB, 2*Hh)
    q_ref[...] = (jnp.dot(h13.astype(wq_ref.dtype), wq_ref[...],
                          preferred_element_type=jnp.float32)
                  + bq_ref[...])                                                # (TB, 128)


def _prep_weights(params, Hp):
    """Fuse/regroup/pad weights (f32 math), then cast matmul operands to bf16.

    Invariant relied on by the kernel: all padded hidden lanes/rows are EXACTLY zero, so the
    padded gate pre-activations are 0 every step -> c_pad = 0.5*c_pad stays 0 and
    h_pad = 0.5*tanh(0) = 0. Do not add biases or non-zero padding to those lanes.
    """
    H = params["w_enc"].shape[1]          # d_model (LSTM hidden)
    Hh = params["w1"].shape[1]            # head hidden (= d_model)
    NQ = 128                              # lane-dense Q output width (q1 = col 0, q2 = col 1)

    def regroup4(w):
        # (..., 4H) with PyTorch gate order [i, f, g, o] -> (..., 4Hp) in order [i, f, o, g],
        # each gate block zero-padded to Hp lanes.
        pads = [(0, 0)] * (w.ndim - 1) + [(0, Hp - H)]
        return jnp.concatenate(
            [jnp.pad(w[..., k * H:(k + 1) * H], pads) for k in (0, 1, 3, 2)], axis=-1)

    w_ih_p = regroup4(params["w_ih"])                                   # (H, 4Hp)
    b_ih_p = regroup4(params["b_ih"])                                   # (1, 4Hp)
    b_hh_p = regroup4(params["b_hh"])                                   # (1, 4Hp)
    w_hh_p = jnp.pad(regroup4(params["w_hh"]), ((0, Hp - H), (0, 0)))   # (Hp, 4Hp)

    # act_encoder is a pure nn.Linear (no activation) -> exact linear fusion into the LSTM
    # input projection.
    w_fused = params["w_enc"] @ w_ih_p                                  # (s_d, 4Hp)
    b_fused = params["b_enc"] @ w_ih_p + b_ih_p + b_hh_p                # (1, 4Hp)

    def split_head(w):
        # fc weight (H + a_d, Hh) -> h-part padded to Hp rows, action-part.
        wh = jnp.pad(w[:H], ((0, Hp - H), (0, 0)))
        wa = w[H:]
        return wh, wa

    w1h, w1a = split_head(params["w1"])
    w3h, w3a = split_head(params["w3"])
    w13_h = jnp.concatenate([w1h, w3h], axis=1)                         # (Hp, 2Hh)
    w13_a = jnp.concatenate([w1a, w3a], axis=1)                         # (a_d, 2Hh)
    b13 = jnp.concatenate([params["b1"], params["b3"]], axis=1)         # (1, 2Hh)

    # fc2 || fc4 as a block-diagonal matmul, zero-padded to 128 output lanes so the final
    # store is an unmasked, lane-dense vst. Wrapper slices columns [0:2].
    wq = jnp.zeros((2 * Hh, NQ), jnp.float32)
    wq = wq.at[:Hh, 0:1].set(params["w2"]).at[Hh:, 1:2].set(params["w4"])
    bq = jnp.zeros((1, NQ), jnp.float32)
    bq = bq.at[:, 0:1].set(params["b2"]).at[:, 1:2].set(params["b4"])

    bf16 = jnp.bfloat16
    return (w_fused.astype(bf16), b_fused.astype(jnp.float32), w_hh_p.astype(bf16),
            w13_h.astype(bf16), w13_a.astype(bf16), b13.astype(jnp.float32),
            wq.astype(bf16), bq.astype(jnp.float32))


@functools.partial(jax.jit, static_argnames=("tile_b",))
def lstm_critic_forward(state, action, params, *, tile_b=None):
    """state: (n_e, bs, cont, state_dim), action: (n_e, bs, action_dim) -> (q1, q2)."""
    n_e, bs, cont, s_d = state.shape
    B = n_e * bs
    a_d = action.shape[-1]
    H = params["w_enc"].shape[1]
    Hp = _round_up(H, 128)                     # lane-aligned hidden size (= H when H % 128 == 0)

    # ---- Batch tile selection -------------------------------------------------------------
    if tile_b is None:
        if B >= 512:
            tile_b = 256                       # fill the MXU M dimension on v6e/v7x
        elif B >= 256:
            tile_b = 128
        else:
            # Small batches: keep >= 2 grid steps so the "parallel" axis can shard across the
            # two v7x TensorCores (harmless single extra step on 1-TC chips).
            tile_b = _round_up(max(-(-B // 2), 8), 8)
    tile_b = _round_up(max(int(tile_b), 8), 8)
    # VMEM-aware cap: bf16 g_scratch + f32 projection intermediate stay under ~18 MiB.
    max_tile_b = max(8, ((18 << 20) // (cont * 4 * Hp * 6)) // 8 * 8)
    tile_b = min(tile_b, max_tile_b)
    B_pad = _round_up(B, tile_b)
    n_tiles = B_pad // tile_b

    # Time-major layout so the per-step gate slab is a contiguous leading-dim slice in VMEM.
    # TODO(synk): could fold this transpose+pad+cast into the BlockSpec to avoid one extra HBM
    # pass over the activations (negligible at these sizes).
    state_tm = jnp.transpose(state.reshape(B, cont, s_d), (1, 0, 2))
    state_tm = jnp.pad(state_tm, ((0, 0), (0, B_pad - B), (0, 0))).astype(jnp.bfloat16)
    action_f = jnp.pad(action.reshape(B, a_d),
                       ((0, B_pad - B), (0, 0))).astype(jnp.bfloat16)

    weights = _prep_weights(params, Hp)

    # ---- VMEM budget (lane-padded streaming tiles, double-buffered; bf16 scratch) ----------
    lane = 128
    weight_bytes = sum(math.prod(w.shape) * w.dtype.itemsize for w in weights)
    s_pad = _round_up(s_d, lane)
    a_pad = _round_up(a_d, lane)
    stream_bytes = 2 * (cont * tile_b * s_pad * 2 + tile_b * a_pad * 2 + tile_b * lane * 4)
    scratch_bytes = cont * tile_b * 4 * Hp * 2        # bf16 g_scratch
    proj_bytes = cont * tile_b * 4 * Hp * 4           # f32 projection intermediate
    work_bytes = 6 * tile_b * 4 * Hp * 4              # per-step gate temporaries / headroom
    need = 2 * weight_bytes + stream_bytes + scratch_bytes + proj_bytes + work_bytes
    # Cap well below v7x's 64 MiB physical VMEM to leave compiler-internal headroom.
    vmem_limit = int(min(48 * 2**20, max(32 * 2**20, need + (4 << 20))))

    in_specs = [
        pl.BlockSpec((cont, tile_b, s_d), lambda i: (0, i, 0)),
        pl.BlockSpec((tile_b, a_d), lambda i: (i, 0)),
    ] + [pl.BlockSpec(w.shape, lambda i: (0, 0)) for w in weights]

    kernel = functools.partial(_critic_kernel, gates_bf16=_use_bf16_gates())

    q_all = pl.pallas_call(
        kernel,
        out_shape=jax.ShapeDtypeStruct((B_pad, 128), jnp.float32),
        grid=(n_tiles,),
        in_specs=in_specs,
        out_specs=pl.BlockSpec((tile_b, 128), lambda i: (i, 0)),
        scratch_shapes=[pltpu.VMEM((cont, tile_b, 4 * Hp), jnp.bfloat16)],
        compiler_params=pltpu.CompilerParams(
            dimension_semantics=("parallel",),
            vmem_limit_bytes=vmem_limit),
    )(state_tm, action_f, *weights)

    q_all = q_all[:B]
    q1 = q_all[:, 0:1].reshape(n_e, bs, 1)
    q2 = q_all[:, 1:2].reshape(n_e, bs, 1)
    return q1, q2


def init_params(key, state_dim, action_dim, d_model):
    """Deterministic init mimicking PyTorch defaults (uniform(-1/sqrt(fan_in), +))."""
    ks = jax.random.split(key, 14)

    def lin(kw, kb, fan_in, fan_out):
        bound = 1.0 / math.sqrt(fan_in)
        w = jax.random.uniform(kw, (fan_in, fan_out), jnp.float32, -bound, bound)
        b = jax.random.uniform(kb, (1, fan_out), jnp.float32, -bound, bound)
        return w, b

    p = {}
    p["w_enc"], p["b_enc"] = lin(ks[0], ks[1], state_dim, d_model)

    bound = 1.0 / math.sqrt(d_model)
    p["w_ih"] = jax.random.uniform(ks[2], (d_model, 4 * d_model), jnp.float32, -bound, bound)
    p["b_ih"] = jax.random.uniform(ks[3], (1, 4 * d_model), jnp.float32, -bound, bound)
    p["w_hh"] = jax.random.uniform(ks[4], (d_model, 4 * d_model), jnp.float32, -bound, bound)
    p["b_hh"] = jax.random.uniform(ks[5], (1, 4 * d_model), jnp.float32, -bound, bound)

    p["w1"], p["b1"] = lin(ks[6], ks[7], d_model + action_dim, d_model)
    p["w2"], p["b2"] = lin(ks[8], ks[9], d_model, 1)
    p["w3"], p["b3"] = lin(ks[10], ks[11], d_model + action_dim, d_model)
    p["w4"], p["b4"] = lin(ks[12], ks[13], d_model, 1)
    return p


def reference_forward(state, action, params):
    """Pure-JAX f32 reference reproducing the PyTorch forward semantics."""
    n_e, bs, cont, s_d = state.shape
    B = n_e * bs
    H = params["w_enc"].shape[1]
    x = state.reshape(B, cont, s_d).astype(jnp.float32)
    enc = jnp.einsum("bts,sh->bth", x, params["w_enc"]) + params["b_enc"][None]

    def step(carry, x_t):
        h, c = carry
        gates = x_t @ params["w_ih"] + params["b_ih"] + h @ params["w_hh"] + params["b_hh"]
        i = jax.nn.sigmoid(gates[:, 0 * H:1 * H])
        f = jax.nn.sigmoid(gates[:, 1 * H:2 * H])
        g = jnp.tanh(gates[:, 2 * H:3 * H])
        o = jax.nn.sigmoid(gates[:, 3 * H:4 * H])
        c = f * c + i * g
        h = o * jnp.tanh(c)
        return (h, c), None

    h0 = jnp.zeros((B, H), jnp.float32)
    (h_last, _), _ = jax.lax.scan(step, (h0, h0), jnp.swapaxes(enc, 0, 1))
    sa = jnp.concatenate([h_last, action.reshape(B, -1).astype(jnp.float32)], axis=-1)
    q1 = jnp.maximum(sa @ params["w1"] + params["b1"], 0.0) @ params["w2"] + params["b2"]
    q2 = jnp.maximum(sa @ params["w3"] + params["b3"], 0.0) @ params["w4"] + params["b4"]
    return q1.reshape(n_e, bs, 1), q2.reshape(n_e, bs, 1)


if __name__ == "__main__":
    # Shapes consistent with the module's forward:
    #   state: (n_e, bs, cont, state_dim), action: (n_e, bs, action_dim)
    # d_model=256 is the module's default (hidden padding is then a no-op).
    n_e, bs, cont = 2, 8, 8
    state_dim, action_dim, d_model = 12, 4, 256

    key = jax.random.PRNGKey(0)
    k_state, k_action, k_params = jax.random.split(key, 3)

    state = jax.random.normal(k_state, (n_e, bs, cont, state_dim), jnp.float32)
    action = jax.random.normal(k_action, (n_e, bs, action_dim), jnp.float32)
    params = init_params(k_params, state_dim, action_dim, d_model)

    # Default tile selection: B=16 -> tile_b=8, 2 grid steps (exercises the parallel batch grid).
    q1, q2 = lstm_critic_forward(state, action, params)
    jax.block_until_ready((q1, q2))

    q1_ref, q2_ref = reference_forward(state, action, params)
    assert q1.shape == (n_e, bs, 1) and q2.shape == (n_e, bs, 1)
    # bf16 matmul operands / bf16 gate math (on v6e+) vs. the pure-f32 reference.
    err1 = float(jnp.max(jnp.abs(q1 - q1_ref)))
    err2 = float(jnp.max(jnp.abs(q2 - q2_ref)))
    assert jnp.allclose(q1, q1_ref, atol=3e-2, rtol=3e-2), err1
    assert jnp.allclose(q2, q2_ref, atol=3e-2, rtol=3e-2), err2

    print("KERNEL_OK")
</pallas_src>

<mosaic_0001>
module attributes {stable_mosaic.version = 11 : i64} {
  func.func @_critic_kernel(%arg0: i32, %arg1: memref<8x8x12xbf16, #tpu.memory_space<vmem>>, %arg2: memref<8x4xbf16, #tpu.memory_space<vmem>>, %arg3: memref<12x1024xbf16, #tpu.memory_space<vmem>>, %arg4: memref<1x1024xf32, #tpu.memory_space<vmem>>, %arg5: memref<256x1024xbf16, #tpu.memory_space<vmem>>, %arg6: memref<256x512xbf16, #tpu.memory_space<vmem>>, %arg7: memref<4x512xbf16, #tpu.memory_space<vmem>>, %arg8: memref<1x512xf32, #tpu.memory_space<vmem>>, %arg9: memref<512x128xbf16, #tpu.memory_space<vmem>>, %arg10: memref<1x128xf32, #tpu.memory_space<vmem>>, %arg11: memref<8x128xf32, #tpu.memory_space<vmem>>, %arg12: memref<8x8x1024xbf16, #tpu.memory_space<vmem>>) attributes {dimension_semantics = [#tpu.dimension_semantics<parallel>], iteration_bounds = array<i64: 2>, scalar_prefetch = 0 : i64, scratch_operands = 1 : i64, tpu.core_type = #tpu.core_type<tc>, window_params = [{transform_indices = @transform_0, window_bounds = array<i64: 8, 8, 12>}, {transform_indices = @transform_1, window_bounds = array<i64: 8, 4>}, {pipeline_mode = #tpu.pipeline_mode<synchronous>, transform_indices = @transform_2, window_bounds = array<i64: 12, 1024>}, {pipeline_mode = #tpu.pipeline_mode<synchronous>, transform_indices = @transform_3, window_bounds = array<i64: 1, 1024>}, {pipeline_mode = #tpu.pipeline_mode<synchronous>, transform_indices = @transform_4, window_bounds = array<i64: 256, 1024>}, {pipeline_mode = #tpu.pipeline_mode<synchronous>, transform_indices = @transform_5, window_bounds = array<i64: 256, 512>}, {pipeline_mode = #tpu.pipeline_mode<synchronous>, transform_indices = @transform_6, window_bounds = array<i64: 4, 512>}, {pipeline_mode = #tpu.pipeline_mode<synchronous>, transform_indices = @transform_7, window_bounds = array<i64: 1, 512>}, {pipeline_mode = #tpu.pipeline_mode<synchronous>, transform_indices = @transform_8, window_bounds = array<i64: 512, 128>}, {pipeline_mode = #tpu.pipeline_mode<synchronous>, transform_indices = @transform_9, window_bounds = array<i64: 1, 128>}, {transform_indices = @transform_10, window_bounds = array<i64: 8, 128>}]} {
    %c0 = arith.constant 0 : index
    %c0_0 = arith.constant 0 : index
    %c0_1 = arith.constant 0 : index
    %0 = vector.load %arg1[%c0, %c0_0, %c0_1] : memref<8x8x12xbf16, #tpu.memory_space<vmem>>, vector<8x8x12xbf16>
    %1 = vector.shape_cast %0 : vector<8x8x12xbf16> to vector<64x12xbf16>
    %c0_2 = arith.constant 0 : index
    %c0_3 = arith.constant 0 : index
    %2 = vector.load %arg3[%c0_2, %c0_3] : memref<12x1024xbf16, #tpu.memory_space<vmem>>, vector<12x1024xbf16>
    %cst = arith.constant dense<0.000000e+00> : vector<64x1024xf32>
    %3 = tpu.matmul %1, %2, %cst {dimension_numbers = #tpu.dot_dimension_numbers<[1], [0], [0], [1], [0, 0, 1, 1], [], []>} : vector<64x12xbf16>, vector<12x1024xbf16>, vector<64x1024xf32> -> vector<64x1024xf32>
    %4 = arith.truncf %3 : vector<64x1024xf32> to vector<64x1024xbf16>
    %5 = vector.shape_cast %4 : vector<64x1024xbf16> to vector<8x8x1024xbf16>
    %c0_4 = arith.constant 0 : index
    %c0_5 = arith.constant 0 : index
    %c0_6 = arith.constant 0 : index
    %6 = vector.load %arg12[%c0_4, %c0_5, %c0_6] : memref<8x8x1024xbf16, #tpu.memory_space<vmem>>, vector<8x8x1024xbf16>
    tpu.vector_store %arg12[%c0_4, %c0_5, %c0_6], %5 {strides = array<i32>} : memref<8x8x1024xbf16, #tpu.memory_space<vmem>>, vector<8x8x1024xbf16>,
    %c0_7 = arith.constant 0 : index
    %c0_8 = arith.constant 0 : index
    %7 = vector.load %arg5[%c0_7, %c0_8] : memref<256x1024xbf16, #tpu.memory_space<vmem>>, vector<256x1024xbf16>
    %c0_9 = arith.constant 0 : index
    %c0_10 = arith.constant 0 : index
    %8 = vector.load %arg4[%c0_9, %c0_10] : memref<1x1024xf32, #tpu.memory_space<vmem>>, vector<1x1024xf32>
    %9 = vector.shape_cast %8 : vector<1x1024xf32> to vector<1x1024xf32>
    %10 = vector.broadcast %9 : vector<1x1024xf32> to vector<8x1024xf32>
    %cst_11 = arith.constant 0.000000e+00 : f32
    %11 = vector.broadcast %cst_11 : f32 to vector<8x256xf32>
    %cst_12 = arith.constant 0.000000e+00 : f32
    %12 = vector.broadcast %cst_12 : f32 to vector<8x256xf32>
    %c0_i32 = arith.constant 0 : i32
    %13 = arith.index_cast %c0_i32 : i32 to index
    %c0_13 = arith.constant 0 : index
    %c0_14 = arith.constant 0 : index
    %14 = vector.load %arg12[%13, %c0_13, %c0_14] : memref<8x8x1024xbf16, #tpu.memory_space<vmem>>, vector<1x8x1024xbf16>
    %15 = vector.shape_cast %14 : vector<1x8x1024xbf16> to vector<8x1024xbf16>
    %16 = arith.extf %15 : vector<8x1024xbf16> to vector<8x1024xf32>
    %17 = arith.addf %16, %10 : vector<8x1024xf32>
    %18 = arith.truncf %11 : vector<8x256xf32> to vector<8x256xbf16>
    %cst_15 = arith.constant dense<0.000000e+00> : vector<8x1024xf32>
    %19 = tpu.matmul %18, %7, %cst_15 {dimension_numbers = #tpu.dot_dimension_numbers<[1], [0], [0], [1], [0, 0, 1, 1], [], []>} : vector<8x256xbf16>, vector<256x1024xbf16>, vector<8x1024xf32> -> vector<8x1024xf32>
    %20 = arith.addf %17, %19 : vector<8x1024xf32>
    %21 = vector.extract_strided_slice %20 {offsets = [0, 0], sizes = [8, 768], strides = [1, 1]} : vector<8x1024xf32> to vector<8x768xf32>
    %22 = arith.negf %21 : vector<8x768xf32>
    %23 = math.exp %22 : vector<8x768xf32>
    %cst_16 = arith.constant 1.000000e+00 : f32
    %24 = vector.broadcast %cst_16 : f32 to vector<8x768xf32>
    %25 = arith.addf %24, %23 : vector<8x768xf32>
    %26 = arith.divf %24, %25 : vector<8x768xf32>
    %27 = vector.extract_strided_slice %20 {offsets = [0, 768], sizes = [8, 256], strides = [1, 1]} : vector<8x1024xf32> to vector<8x256xf32>
    %28 = math.tanh %27 : vector<8x256xf32>
    %29 = vector.extract_strided_slice %26 {offsets = [0, 0], sizes = [8, 256], strides = [1, 1]} : vector<8x768xf32> to vector<8x256xf32>
    %30 = vector.extract_strided_slice %26 {offsets = [0, 256], sizes = [8, 256], strides = [1, 1]} : vector<8x768xf32> to vector<8x256xf32>
    %31 = vector.extract_strided_slice %26 {offsets = [0, 512], sizes = [8, 256], strides = [1, 1]} : vector<8x768xf32> to vector<8x256xf32>
    %32 = arith.mulf %30, %12 : vector<8x256xf32>
    %33 = arith.mulf %29, %28 : vector<8x256xf32>
    %34 = arith.addf %32, %33 : vector<8x256xf32>
    %35 = math.tanh %34 : vector<8x256xf32>
    %36 = arith.mulf %31, %35 : vector<8x256xf32>
    %c1_i32 = arith.constant 1 : i32
    %37 = arith.index_cast %c1_i32 : i32 to index
    %c0_17 = arith.constant 0 : index
    %c0_18 = arith.constant 0 : index
    %38 = vector.load %arg12[%37, %c0_17, %c0_18] : memref<8x8x1024xbf16, #tpu.memory_space<vmem>>, vector<1x8x1024xbf16>
    %39 = vector.shape_cast %38 : vector<1x8x1024xbf16> to vector<8x1024xbf16>
    %40 = arith.extf %39 : vector<8x1024xbf16> to vector<8x1024xf32>
    %41 = arith.addf %40, %10 : vector<8x1024xf32>
    %42 = arith.truncf %36 : vector<8x256xf32> to vector<8x256xbf16>
    %cst_19 = arith.constant dense<0.000000e+00> : vector<8x1024xf32>
    %43 = tpu.matmul %42, %7, %cst_19 {dimension_numbers = #tpu.dot_dimension_numbers<[1], [0], [0], [1], [0, 0, 1, 1], [], []>} : vector<8x256xbf16>, vector<256x1024xbf16>, vector<8x1024xf32> -> vector<8x1024xf32>
    %44 = arith.addf %41, %43 : vector<8x1024xf32>
    %45 = vector.extract_strided_slice %44 {offsets = [0, 0], sizes = [8, 768], strides = [1, 1]} : vector<8x1024xf32> to vector<8x768xf32>
    %46 = arith.negf %45 : vector<8x768xf32>
    %47 = math.exp %46 : vector<8x768xf32>
    %cst_20 = arith.constant 1.000000e+00 : f32
    %48 = vector.broadcast %cst_20 : f32 to vector<8x768xf32>
    %49 = arith.addf %48, %47 : vector<8x768xf32>
    %50 = arith.divf %48, %49 : vector<8x768xf32>
    %51 = vector.extract_strided_slice %44 {offsets = [0, 768], sizes = [8, 256], strides = [1, 1]} : vector<8x1024xf32> to vector<8x256xf32>
    %52 = math.tanh %51 : vector<8x256xf32>
    %53 = vector.extract_strided_slice %50 {offsets = [0, 0], sizes = [8, 256], strides = [1, 1]} : vector<8x768xf32> to vector<8x256xf32>
    %54 = vector.extract_strided_slice %50 {offsets = [0, 256], sizes = [8, 256], strides = [1, 1]} : vector<8x768xf32> to vector<8x256xf32>
    %55 = vector.extract_strided_slice %50 {offsets = [0, 512], sizes = [8, 256], strides = [1, 1]} : vector<8x768xf32> to vector<8x256xf32>
    %56 = arith.mulf %54, %34 : vector<8x256xf32>
    %57 = arith.mulf %53, %52 : vector<8x256xf32>
    %58 = arith.addf %56, %57 : vector<8x256xf32>
    %59 = math.tanh %58 : vector<8x256xf32>
    %60 = arith.mulf %55, %59 : vector<8x256xf32>
    %c2_i32 = arith.constant 2 : i32
    %61 = arith.index_cast %c2_i32 : i32 to index
    %c0_21 = arith.constant 0 : index
    %c0_22 = arith.constant 0 : index
    %62 = vector.load %arg12[%61, %c0_21, %c0_22] : memref<8x8x1024xbf16, #tpu.memory_space<vmem>>, vector<1x8x1024xbf16>
    %63 = vector.shape_cast %62 : vector<1x8x1024xbf16> to vector<8x1024xbf16>
    %64 = arith.extf %63 : vector<8x1024xbf16> to vector<8x1024xf32>
    %65 = arith.addf %64, %10 : vector<8x1024xf32>
    %66 = arith.truncf %60 : vector<8x256xf32> to vector<8x256xbf16>
    %cst_23 = arith.constant dense<0.000000e+00> : vector<8x1024xf32>
    %67 = tpu.matmul %66, %7, %cst_23 {dimension_numbers = #tpu.dot_dimension_numbers<[1], [0], [0], [1], [0, 0, 1, 1], [], []>} : vector<8x256xbf16>, vector<256x1024xbf16>, vector<8x1024xf32> -> vector<8x1024xf32>
    %68 = arith.addf %65, %67 : vector<8x1024xf32>
    %69 = vector.extract_strided_slice %68 {offsets = [0, 0], sizes = [8, 768], strides = [1, 1]} : vector<8x1024xf32> to vector<8x768xf32>
    %70 = arith.negf %69 : vector<8x768xf32>
    %71 = math.exp %70 : vector<8x768xf32>
    %cst_24 = arith.constant 1.000000e+00 : f32
    %72 = vector.broadcast %cst_24 : f32 to vector<8x768xf32>
    %73 = arith.addf %72, %71 : vector<8x768xf32>
    %74 = arith.divf %72, %73 : vector<8x768xf32>
    %75 = vector.extract_strided_slice %68 {offsets = [0, 768], sizes = [8, 256], strides = [1, 1]} : vector<8x1024xf32> to vector<8x256xf32>
    %76 = math.tanh %75 : vector<8x256xf32>
    %77 = vector.extract_strided_slice %74 {offsets = [0, 0], sizes = [8, 256], strides = [1, 1]} : vector<8x768xf32> to vector<8x256xf32>
    %78 = vector.extract_strided_slice %74 {offsets = [0, 256], sizes = [8, 256], strides = [1, 1]} : vector<8x768xf32> to vector<8x256xf32>
    %79 = vector.extract_strided_slice %74 {offsets = [0, 512], sizes = [8, 256], strides = [1, 1]} : vector<8x768xf32> to vector<8x256xf32>
    %80 = arith.mulf %78, %58 : vector<8x256xf32>
    %81 = arith.mulf %77, %76 : vector<8x256xf32>
    %82 = arith.addf %80, %81 : vector<8x256xf32>
    %83 = math.tanh %82 : vector<8x256xf32>
    %84 = arith.mulf %79, %83 : vector<8x256xf32>
    %c3_i32 = arith.constant 3 : i32
    %85 = arith.index_cast %c3_i32 : i32 to index
    %c0_25 = arith.constant 0 : index
    %c0_26 = arith.constant 0 : index
    %86 = vector.load %arg12[%85, %c0_25, %c0_26] : memref<8x8x1024xbf16, #tpu.memory_space<vmem>>, vector<1x8x1024xbf16>
    %87 = vector.shape_cast %86 : vector<1x8x1024xbf16> to vector<8x1024xbf16>
    %88 = arith.extf %87 : vector<8x1024xbf16> to vector<8x1024xf32>
    %89 = arith.addf %88, %10 : vector<8x1024xf32>
    %90 = arith.truncf %84 : vector<8x256xf32> to vector<8x256xbf16>
    %cst_27 = arith.constant dense<0.000000e+00> : vector<8x1024xf32>
    %91 = tpu.matmul %90, %7, %cst_27 {dimension_numbers = #tpu.dot_dimension_numbers<[1], [0], [0], [1], [0, 0, 1, 1], [], []>} : vector<8x256xbf16>, vector<256x1024xbf16>, vector<8x1024xf32> -> vector<8x1024xf32>
    %92 = arith.addf %89, %91 : vector<8x1024xf32>
    %93 = vector.extract_strided_slice %92 {offsets = [0, 0], sizes = [8, 768], strides = [1, 1]} : vector<8x1024xf32> to vector<8x768xf32>
    %94 = arith.negf %93 : vector<8x768xf32>
    %95 = math.exp %94 : vector<8x768xf32>
    %cst_28 = arith.constant 1.000000e+00 : f32
    %96 = vector.broadcast %cst_28 : f32 to vector<8x768xf32>
    %97 = arith.addf %96, %95 : vector<8x768xf32>
    %98 = arith.divf %96, %97 : vector<8x768xf32>
    %99 = vector.extract_strided_slice %92 {offsets = [0, 768], sizes = [8, 256], strides = [1, 1]} : vector<8x1024xf32> to vector<8x256xf32>
    %100 = math.tanh %99 : vector<8x256xf32>
    %101 = vector.extract_strided_slice %98 {offsets = [0, 0], sizes = [8, 256], strides = [1, 1]} : vector<8x768xf32> to vector<8x256xf32>
    %102 = vector.extract_strided_slice %98 {offsets = [0, 256], sizes = [8, 256], strides = [1, 1]} : vector<8x768xf32> to vector<8x256xf32>
    %103 = vector.extract_strided_slice %98 {offsets = [0, 512], sizes = [8, 256], strides = [1, 1]} : vector<8x768xf32> to vector<8x256xf32>
    %104 = arith.mulf %102, %82 : vector<8x256xf32>
    %105 = arith.mulf %101, %100 : vector<8x256xf32>
    %106 = arith.addf %104, %105 : vector<8x256xf32>
    %107 = math.tanh %106 : vector<8x256xf32>
    %108 = arith.mulf %103, %107 : vector<8x256xf32>
    %c4_i32 = arith.constant 4 : i32
    %109 = arith.index_cast %c4_i32 : i32 to index
    %c0_29 = arith.constant 0 : index
    %c0_30 = arith.constant 0 : index
    %110 = vector.load %arg12[%109, %c0_29, %c0_30] : memref<8x8x1024xbf16, #tpu.memory_space<vmem>>, vector<1x8x1024xbf16>
    %111 = vector.shape_cast %110 : vector<1x8x1024xbf16> to vector<8x1024xbf16>
    %112 = arith.extf %111 : vector<8x1024xbf16> to vector<8x1024xf32>
    %113 = arith.addf %112, %10 : vector<8x1024xf32>
    %114 = arith.truncf %108 : vector<8x256xf32> to vector<8x256xbf16>
    %cst_31 = arith.constant dense<0.000000e+00> : vector<8x1024xf32>
    %115 = tpu.matmul %114, %7, %cst_31 {dimension_numbers = #tpu.dot_dimension_numbers<[1], [0], [0], [1], [0, 0, 1, 1], [], []>} : vector<8x256xbf16>, vector<256x1024xbf16>, vector<8x1024xf32> -> vector<8x1024xf32>
    %116 = arith.addf %113, %115 : vector<8x1024xf32>
    %117 = vector.extract_strided_slice %116 {offsets = [0, 0], sizes = [8, 768], strides = [1, 1]} : vector<8x1024xf32> to vector<8x768xf32>
    %118 = arith.negf %117 : vector<8x768xf32>
    %119 = math.exp %118 : vector<8x768xf32>
    %cst_32 = arith.constant 1.000000e+00 : f32
    %120 = vector.broadcast %cst_32 : f32 to vector<8x768xf32>
    %121 = arith.addf %120, %119 : vector<8x768xf32>
    %122 = arith.divf %120, %121 : vector<8x768xf32>
    %123 = vector.extract_strided_slice %116 {offsets = [0, 768], sizes = [8, 256], strides = [1, 1]} : vector<8x1024xf32> to vector<8x256xf32>
    %124 = math.tanh %123 : vector<8x256xf32>
    %125 = vector.extract_strided_slice %122 {offsets = [0, 0], sizes = [8, 256], strides = [1, 1]} : vector<8x768xf32> to vector<8x256xf32>
    %126 = vector.extract_strided_slice %122 {offsets = [0, 256], sizes = [8, 256], strides = [1, 1]} : vector<8x768xf32> to vector<8x256xf32>
    %127 = vector.extract_strided_slice %122 {offsets = [0, 512], sizes = [8, 256], strides = [1, 1]} : vector<8x768xf32> to vector<8x256xf32>
    %128 = arith.mulf %126, %106 : vector<8x256xf32>
    %129 = arith.mulf %125, %124 : vector<8x256xf32>
    %130 = arith.addf %128, %129 : vector<8x256xf32>
    %131 = math.tanh %130 : vector<8x256xf32>
    %132 = arith.mulf %127, %131 : vector<8x256xf32>
    %c5_i32 = arith.constant 5 : i32
    %133 = arith.index_cast %c5_i32 : i32 to index
    %c0_33 = arith.constant 0 : index
    %c0_34 = arith.constant 0 : index
    %134 = vector.load %arg12[%133, %c0_33, %c0_34] : memref<8x8x1024xbf16, #tpu.memory_space<vmem>>, vector<1x8x1024xbf16>
    %135 = vector.shape_cast %134 : vector<1x8x1024xbf16> to vector<8x1024xbf16>
    %136 = arith.extf %135 : vector<8x1024xbf16> to vector<8x1024xf32>
    %137 = arith.addf %136, %10 : vector<8x1024xf32>
    %138 = arith.truncf %132 : vector<8x256xf32> to vector<8x256xbf16>
    %cst_35 = arith.constant dense<0.000000e+00> : vector<8x1024xf32>
    %139 = tpu.matmul %138, %7, %cst_35 {dimension_numbers = #tpu.dot_dimension_numbers<[1], [0], [0], [1], [0, 0, 1, 1], [], []>} : vector<8x256xbf16>, vector<256x1024xbf16>, vector<8x1024xf32> -> vector<8x1024xf32>
    %140 = arith.addf %137, %139 : vector<8x1024xf32>
    %141 = vector.extract_strided_slice %140 {offsets = [0, 0], sizes = [8, 768], strides = [1, 1]} : vector<8x1024xf32> to vector<8x768xf32>
    %142 = arith.negf %141 : vector<8x768xf32>
    %143 = math.exp %142 : vector<8x768xf32>
    %cst_36 = arith.constant 1.000000e+00 : f32
    %144 = vector.broadcast %cst_36 : f32 to vector<8x768xf32>
    %145 = arith.addf %144, %143 : vector<8x768xf32>
    %146 = arith.divf %144, %145 : vector<8x768xf32>
    %147 = vector.extract_strided_slice %140 {offsets = [0, 768], sizes = [8, 256], strides = [1, 1]} : vector<8x1024xf32> to vector<8x256xf32>
    %148 = math.tanh %147 : vector<8x256xf32>
    %149 = vector.extract_strided_slice %146 {offsets = [0, 0], sizes = [8, 256], strides = [1, 1]} : vector<8x768xf32> to vector<8x256xf32>
    %150 = vector.extract_strided_slice %146 {offsets = [0, 256], sizes = [8, 256], strides = [1, 1]} : vector<8x768xf32> to vector<8x256xf32>
    %151 = vector.extract_strided_slice %146 {offsets = [0, 512], sizes = [8, 256], strides = [1, 1]} : vector<8x768xf32> to vector<8x256xf32>
    %152 = arith.mulf %150, %130 : vector<8x256xf32>
    %153 = arith.mulf %149, %148 : vector<8x256xf32>
    %154 = arith.addf %152, %153 : vector<8x256xf32>
    %155 = math.tanh %154 : vector<8x256xf32>
    %156 = arith.mulf %151, %155 : vector<8x256xf32>
    %c6_i32 = arith.constant 6 : i32
    %157 = arith.index_cast %c6_i32 : i32 to index
    %c0_37 = arith.constant 0 : index
    %c0_38 = arith.constant 0 : index
    %158 = vector.load %arg12[%157, %c0_37, %c0_38] : memref<8x8x1024xbf16, #tpu.memory_space<vmem>>, vector<1x8x1024xbf16>
    %159 = vector.shape_cast %158 : vector<1x8x1024xbf16> to vector<8x1024xbf16>
    %160 = arith.extf %159 : vector<8x1024xbf16> to vector<8x1024xf32>
    %161 = arith.addf %160, %10 : vector<8x1024xf32>
    %162 = arith.truncf %156 : vector<8x256xf32> to vector<8x256xbf16>
    %cst_39 = arith.constant dense<0.000000e+00> : vector<8x1024xf32>
    %163 = tpu.matmul %162, %7, %cst_39 {dimension_numbers = #tpu.dot_dimension_numbers<[1], [0], [0], [1], [0, 0, 1, 1], [], []>} : vector<8x256xbf16>, vector<256x1024xbf16>, vector<8x1024xf32> -> vector<8x1024xf32>
    %164 = arith.addf %161, %163 : vector<8x1024xf32>
    %165 = vector.extract_strided_slice %164 {offsets = [0, 0], sizes = [8, 768], strides = [1, 1]} : vector<8x1024xf32> to vector<8x768xf32>
    %166 = arith.negf %165 : vector<8x768xf32>
    %167 = math.exp %166 : vector<8x768xf32>
    %cst_40 = arith.constant 1.000000e+00 : f32
    %168 = vector.broadcast %cst_40 : f32 to vector<8x768xf32>
    %169 = arith.addf %168, %167 : vector<8x768xf32>
    %170 = arith.divf %168, %169 : vector<8x768xf32>
    %171 = vector.extract_strided_slice %164 {offsets = [0, 768], sizes = [8, 256], strides = [1, 1]} : vector<8x1024xf32> to vector<8x256xf32>
    %172 = math.tanh %171 : vector<8x256xf32>
    %173 = vector.extract_strided_slice %170 {offsets = [0, 0], sizes = [8, 256], strides = [1, 1]} : vector<8x768xf32> to vector<8x256xf32>
    %174 = vector.extract_strided_slice %170 {offsets = [0, 256], sizes = [8, 256], strides = [1, 1]} : vector<8x768xf32> to vector<8x256xf32>
    %175 = vector.extract_strided_slice %170 {offsets = [0, 512], sizes = [8, 256], strides = [1, 1]} : vector<8x768xf32> to vector<8x256xf32>
    %176 = arith.mulf %174, %154 : vector<8x256xf32>
    %177 = arith.mulf %173, %172 : vector<8x256xf32>
    %178 = arith.addf %176, %177 : vector<8x256xf32>
    %179 = math.tanh %178 : vector<8x256xf32>
    %180 = arith.mulf %175, %179 : vector<8x256xf32>
    %c7_i32 = arith.constant 7 : i32
    %181 = arith.index_cast %c7_i32 : i32 to index
    %c0_41 = arith.constant 0 : index
    %c0_42 = arith.constant 0 : index
    %182 = vector.load %arg12[%181, %c0_41, %c0_42] : memref<8x8x1024xbf16, #tpu.memory_space<vmem>>, vector<1x8x1024xbf16>
    %183 = vector.shape_cast %182 : vector<1x8x1024xbf16> to vector<8x1024xbf16>
    %184 = arith.extf %183 : vector<8x1024xbf16> to vector<8x1024xf32>
    %185 = arith.addf %184, %10 : vector<8x1024xf32>
    %186 = arith.truncf %180 : vector<8x256xf32> to vector<8x256xbf16>
    %cst_43 = arith.constant dense<0.000000e+00> : vector<8x1024xf32>
    %187 = tpu.matmul %186, %7, %cst_43 {dimension_numbers = #tpu.dot_dimension_numbers<[1], [0], [0], [1], [0, 0, 1, 1], [], []>} : vector<8x256xbf16>, vector<256x1024xbf16>, vector<8x1024xf32> -> vector<8x1024xf32>
    %188 = arith.addf %185, %187 : vector<8x1024xf32>
    %189 = vector.extract_strided_slice %188 {offsets = [0, 0], sizes = [8, 768], strides = [1, 1]} : vector<8x1024xf32> to vector<8x768xf32>
    %190 = arith.negf %189 : vector<8x768xf32>
    %191 = math.exp %190 : vector<8x768xf32>
    %cst_44 = arith.constant 1.000000e+00 : f32
    %192 = vector.broadcast %cst_44 : f32 to vector<8x768xf32>
    %193 = arith.addf %192, %191 : vector<8x768xf32>
    %194 = arith.divf %192, %193 : vector<8x768xf32>
    %195 = vector.extract_strided_slice %188 {offsets = [0, 768], sizes = [8, 256], strides = [1, 1]} : vector<8x1024xf32> to vector<8x256xf32>
    %196 = math.tanh %195 : vector<8x256xf32>
    %197 = vector.extract_strided_slice %194 {offsets = [0, 0], sizes = [8, 256], strides = [1, 1]} : vector<8x768xf32> to vector<8x256xf32>
    %198 = vector.extract_strided_slice %194 {offsets = [0, 256], sizes = [8, 256], strides = [1, 1]} : vector<8x768xf32> to vector<8x256xf32>
    %199 = vector.extract_strided_slice %194 {offsets = [0, 512], sizes = [8, 256], strides = [1, 1]} : vector<8x768xf32> to vector<8x256xf32>
    %200 = arith.mulf %198, %178 : vector<8x256xf32>
    %201 = arith.mulf %197, %196 : vector<8x256xf32>
    %202 = arith.addf %200, %201 : vector<8x256xf32>
    %203 = math.tanh %202 : vector<8x256xf32>
    %204 = arith.mulf %199, %203 : vector<8x256xf32>
    %c8_i32 = arith.constant 8 : i32
    %205 = arith.truncf %204 : vector<8x256xf32> to vector<8x256xbf16>
    %c0_45 = arith.constant 0 : index
    %c0_46 = arith.constant 0 : index
    %206 = vector.load %arg6[%c0_45, %c0_46] : memref<256x512xbf16, #tpu.memory_space<vmem>>, vector<256x512xbf16>
    %cst_47 = arith.constant dense<0.000000e+00> : vector<8x512xf32>
    %207 = tpu.matmul %205, %206, %cst_47 {dimension_numbers = #tpu.dot_dimension_numbers<[1], [0], [0], [1], [0, 0, 1, 1], [], []>} : vector<8x256xbf16>, vector<256x512xbf16>, vector<8x512xf32> -> vector<8x512xf32>
    %c0_48 = arith.constant 0 : index
    %c0_49 = arith.constant 0 : index
    %208 = vector.load %arg2[%c0_48, %c0_49] : memref<8x4xbf16, #tpu.memory_space<vmem>>, vector<8x4xbf16>
    %c0_50 = arith.constant 0 : index
    %c0_51 = arith.constant 0 : index
    %209 = vector.load %arg7[%c0_50, %c0_51] : memref<4x512xbf16, #tpu.memory_space<vmem>>, vector<4x512xbf16>
    %cst_52 = arith.constant dense<0.000000e+00> : vector<8x512xf32>
    %210 = tpu.matmul %208, %209, %cst_52 {dimension_numbers = #tpu.dot_dimension_numbers<[1], [0], [0], [1], [0, 0, 1, 1], [], []>} : vector<8x4xbf16>, vector<4x512xbf16>, vector<8x512xf32> -> vector<8x512xf32>
    %211 = arith.addf %207, %210 : vector<8x512xf32>
    %c0_53 = arith.constant 0 : index
    %c0_54 = arith.constant 0 : index
    %212 = vector.load %arg8[%c0_53, %c0_54] : memref<1x512xf32, #tpu.memory_space<vmem>>, vector<1x512xf32>
    %213 = vector.broadcast %212 : vector<1x512xf32> to vector<8x512xf32>
    %214 = arith.addf %211, %213 : vector<8x512xf32>
    %cst_55 = arith.constant 0.000000e+00 : f32
    %215 = vector.broadcast %cst_55 : f32 to vector<8x512xf32>
    %216 = arith.maximumf %214, %215 : vector<8x512xf32>
    %217 = arith.truncf %216 : vector<8x512xf32> to vector<8x512xbf16>
    %c0_56 = arith.constant 0 : index
    %c0_57 = arith.constant 0 : index
    %218 = vector.load %arg9[%c0_56, %c0_57] : memref<512x128xbf16, #tpu.memory_space<vmem>>, vector<512x128xbf16>
    %cst_58 = arith.constant dense<0.000000e+00> : vector<8x128xf32>
    %219 = tpu.matmul %217, %218, %cst_58 {dimension_numbers = #tpu.dot_dimension_numbers<[1], [0], [0], [1], [0, 0, 1, 1], [], []>} : vector<8x512xbf16>, vector<512x128xbf16>, vector<8x128xf32> -> vector<8x128xf32>
    %c0_59 = arith.constant 0 : index
    %c0_60 = arith.constant 0 : index
    %220 = vector.load %arg10[%c0_59, %c0_60] : memref<1x128xf32, #tpu.memory_space<vmem>>, vector<1x128xf32>
    %221 = vector.broadcast %220 : vector<1x128xf32> to vector<8x128xf32>
    %222 = arith.addf %219, %221 : vector<8x128xf32>
    %c0_61 = arith.constant 0 : index
    %c0_62 = arith.constant 0 : index
    %223 = vector.load %arg11[%c0_61, %c0_62] : memref<8x128xf32, #tpu.memory_space<vmem>>, vector<8x128xf32>
    tpu.vector_store %arg11[%c0_61, %c0_62], %222 {strides = array<i32>} : memref<8x128xf32, #tpu.memory_space<vmem>>, vector<8x128xf32>,
    return
  }
  func.func @transform_0(%arg0: i32) -> (i32, i32, i32) {
    %c0_i32 = arith.constant 0 : i32
    %c0_i32_0 = arith.constant 0 : i32
    %c0_i32_1 = arith.constant 0 : i32
    return %c0_i32, %arg0, %c0_i32_0 : i32, i32, i32
  }
  func.func @transform_1(%arg0: i32) -> (i32, i32) {
    %c0_i32 = arith.constant 0 : i32
    %c0_i32_0 = arith.constant 0 : i32
    return %arg0, %c0_i32 : i32, i32
  }
  func.func @transform_2(%arg0: i32) -> (i32, i32) {
    %c0_i32 = arith.constant 0 : i32
    %c0_i32_0 = arith.constant 0 : i32
    %c0_i32_1 = arith.constant 0 : i32
    return %c0_i32, %c0_i32_0 : i32, i32
  }
  func.func @transform_3(%arg0: i32) -> (i32, i32) {
    %c0_i32 = arith.constant 0 : i32
    %c0_i32_0 = arith.constant 0 : i32
    %c0_i32_1 = arith.constant 0 : i32
    return %c0_i32, %c0_i32_0 : i32, i32
  }
  func.func @transform_4(%arg0: i32) -> (i32, i32) {
    %c0_i32 = arith.constant 0 : i32
    %c0_i32_0 = arith.constant 0 : i32
    %c0_i32_1 = arith.constant 0 : i32
    return %c0_i32, %c0_i32_0 : i32, i32
  }
  func.func @transform_5(%arg0: i32) -> (i32, i32) {
    %c0_i32 = arith.constant 0 : i32
    %c0_i32_0 = arith.constant 0 : i32
    %c0_i32_1 = arith.constant 0 : i32
    return %c0_i32, %c0_i32_0 : i32, i32
  }
  func.func @transform_6(%arg0: i32) -> (i32, i32) {
    %c0_i32 = arith.constant 0 : i32
    %c0_i32_0 = arith.constant 0 : i32
    %c0_i32_1 = arith.constant 0 : i32
    return %c0_i32, %c0_i32_0 : i32, i32
  }
  func.func @transform_7(%arg0: i32) -> (i32, i32) {
    %c0_i32 = arith.constant 0 : i32
    %c0_i32_0 = arith.constant 0 : i32
    %c0_i32_1 = arith.constant 0 : i32
    return %c0_i32, %c0_i32_0 : i32, i32
  }
  func.func @transform_8(%arg0: i32) -> (i32, i32) {
    %c0_i32 = arith.constant 0 : i32
    %c0_i32_0 = arith.constant 0 : i32
    %c0_i32_1 = arith.constant 0 : i32
    return %c0_i32, %c0_i32_0 : i32, i32
  }
  func.func @transform_9(%arg0: i32) -> (i32, i32) {
    %c0_i32 = arith.constant 0 : i32
    %c0_i32_0 = arith.constant 0 : i32
    %c0_i32_1 = arith.constant 0 : i32
    return %c0_i32, %c0_i32_0 : i32, i32
  }
  func.func @transform_10(%arg0: i32) -> (i32, i32) {
    %c0_i32 = arith.constant 0 : i32
    %c0_i32_0 = arith.constant 0 : i32
    return %arg0, %c0_i32 : i32, i32
  }
}

</mosaic_0001>

<bundles_post_ra>
// kernel: lstm_critic_forward.1
= control target key start
LH: loop header
LB: loop body
LE: loop exit
PB: predicated region body
PF: predicated region fallthrough
CT: control target
= control target key end

     0   :  { %s5779_s13 = smov 0   ;;  %s5781_s14 = smov 0   ;;  %s8289_s0 = inlined_call_operand.vmem [shape: bf16[8,16,12], index: 0, kind: input, shape index: {}]   ;;  %s8290_s1 = inlined_call_operand.vmem [shape: bf16[16,4], index: 1, kind: input, shape index: {}]   ;;  %s8291_s2 = inlined_call_operand.vmem [shape: bf16[12,1024], index: 2, kind: input, shape index: {}]   ;;  %s8292_s3 = inlined_call_operand.vmem [shape: f32[1,1024], index: 3, kind: input, shape index: {}]   ;;  %s8293_s4 = inlined_call_operand.vmem [shape: bf16[256,1024], index: 4, kind: input, shape index: {}]   ;;  %s8294_s5 = inlined_call_operand.vmem [shape: bf16[256,512], index: 5, kind: input, shape index: {}]   ;;  %s8295_s6 = inlined_call_operand.vmem [shape: bf16[4,512], index: 6, kind: input, shape index: {}]   ;;  %s8296_s7 = inlined_call_operand.vmem [shape: f32[1,512], index: 7, kind: input, shape index: {}]   ;;  %s8297_s8 = inlined_call_operand.vmem [shape: bf16[512,128], index: 8, kind: input, shape index: {}]   ;;  %s8298_s9 = inlined_call_operand.vmem [shape: f32[1,128], index: 9, kind: input, shape index: {}]   ;;  %s8299_s10 = inlined_call_operand.vmem [shape: f32[16,128], index: 10, kind: output, shape index: {}]  }
   0x1   :  { %s5783_s15 = smov 0  }
   0x2 LB: > { %s4854_s16 = sadd.s32 4294967295, %s5720_s15   ;;  %s5796_s17 = sadd.s32 1, %s5720_s15   ;;  %s5720_s15 = sphi %s5783_s15, %s9400_s15   ;;  %s5716_s14 = sphi %s5781_s14, %s9399_s14   ;;  %s5712_s13 = sphi %s5779_s13, %s9398_s13  }
   0x3   : > { %s24_s18 = ssub.s32 %s5720_s15, %s5796_s17  ;;  %s27_s19 = sadd.s32 1, %s5716_s14 }
   0x4   : > { %p25_p0 = scmp.eq.s32.totalorder %s24_s18, 0  ;;  %p34_p1 = scmp.ne.s32.totalorder %s5716_s14, %s5712_s13 }
   0x5   : > { %p35_p2 = scmp.eq.s32.totalorder %s5720_s15, 0  ;;  %p4857_p4 = scmp.ge.s32.totalorder %s5720_s15, 2 }
   0x6   : > { %s5805_s20 = scalar_select %p25_p0, %s5716_s14, %s27_s19  }
   0x7   : > { %p36_p3 = por %p35_p2, %p34_p1  ;;  %304 = sbr.rel (%p4857_p4) target bundleno = 23 (0x17), region = 48 }
   0xe   : > { %307 = sbr.rel (!%p36_p3) target bundleno = 23 (0x17), region = 52  ;;  %s309_s21 = sand.u32 (%p36_p3), 1, %s5716_s14  }
   0xf   : > { %s4859_s22 = sshll.u32 (%p36_p3), %s5720_s15, 2  ;;  %s4858_s23 = sshll.u32 (%p36_p3), %s309_s21, 5 }
  0x10   : > { %s313_s26 = scalar_lea.vmem (%p36_p3), %s8289_s0, %s4859_s22  ;;  %s311_s27 = scalar_lea.vmem (%p36_p3), [#allocation3], %s4858_s23 }
  0x11   : > { %v329_v0 = vld [vmem:[%s313_s26] sm:$0xf] (%p36_p3)  ;;  %v331_v1 = vld [vmem:[%s313_s26 + $0x8] sm:$0xf] (%p36_p3)  ;;  %v333_v2 = vld [vmem:[%s313_s26 + $0x10] sm:$0xf] (%p36_p3) }
  0x12   : > { %330 = vst [vmem:[%s311_s27] sm:$0xf] (%p36_p3), %v329_v0  ;;  %332 = vst [vmem:[%s311_s27 + $0x4] sm:$0xf] (%p36_p3), %v331_v1  ;;  %v335_v3 = vld [vmem:[%s313_s26 + $0x18] sm:$0xf] (%p36_p3) }
  0x13   : > { %v337_v4 = vld [vmem:[%s313_s26 + $0x20] sm:$0xf] (%p36_p3)  ;;  %334 = vst [vmem:[%s311_s27 + $0x8] sm:$0xf] (%p36_p3), %v333_v2  ;;  %336 = vst [vmem:[%s311_s27 + $0xc] sm:$0xf] (%p36_p3), %v335_v3 }
  0x14   : > { %338 = vst [vmem:[%s311_s27 + $0x10] sm:$0xf] (%p36_p3), %v337_v4  ;;  %v339_v5 = vld [vmem:[%s313_s26 + $0x28] sm:$0xf] (%p36_p3)  ;;  %v341_v6 = vld [vmem:[%s313_s26 + $0x30] sm:$0xf] (%p36_p3) }
  0x15   : > { %v343_v7 = vld [vmem:[%s313_s26 + $0x38] sm:$0xf]  ;;  %340 = vst [vmem:[%s311_s27 + $0x14] sm:$0xf] %v339_v5  ;;  %342 = vst [vmem:[%s311_s27 + $0x18] sm:$0xf] %v341_v6 }
  0x16   : > { %344 = vst [vmem:[%s311_s27 + $0x1c] sm:$0xf] %v343_v7 }
  0x17 PF: > { %p4860_p5 = scmp.ge.s32.totalorder %s5720_s15, 1  ;;  %p389_p6 = scmp.lt.s32.totalorder %s5720_s15, 3 }
  0x19   : > { %p390_p7 = pnand %p4860_p5, %p389_p6 }
  0x1b   : > { %393 = sbr.rel (%p390_p7) target bundleno = 3077 (0xc05), region = 97 }
  0x22   : > { %v453_v8 = vld [vmem:[%s8291_s2] sm:$0xff]  ;;  %vm526_vm0 = vcmask 1045504   ;;  %v454_v10 = vld [vmem:[%s8291_s2 + $0x8] sm:$0xff]  ;;  %v8300_v14 = vmov 0   ;;  %s396_s22 = sand.u32 1, %s5712_s13   ;;  %vm513_vm1 = vcmask 97280  }
  0x23   : > { %v457_v9 = vld [vmem:[%s8291_s2 + $0x20] sm:$0x33]  ;;  %v458_v12 = vld [vmem:[%s8291_s2 + $0x28] sm:$0x33]  ;;  %583 = vmatprep.mubr.bf16.mxu0 %v8300_v14  ;;  %656 = vmatprep.mubr.bf16.mxu1 %v8300_v14  ;;  %v455_v15 = vld [vmem:[%s8291_s2 + $0x10] sm:$0xff]  ;;  %s4861_s27 = sshll.u32 %s396_s22, 5 }
  0x24   : > { %v4869_v11 = vcombine.high %v453_v8, %v457_v9  ;;  %v4868_v13 = vcombine.low %v453_v8, %v457_v9  ;;  %v456_v16 = vld [vmem:[%s8291_s2 + $0x18] sm:$0xff]  ;;  %v4871_v17 = vcombine.high %v454_v10, %v458_v12  ;;  %v4870_v18 = vcombine.low %v454_v10, %v458_v12  ;;  %v459_v19 = vld [vmem:[%s8291_s2 + $0x30] sm:$0x33]  ;;  %v1067_v21 = vld [vmem:[%s8293_s4] sm:$0xff]  ;;  %s398_s25 = scalar_lea.vmem [#allocation3], %s4861_s27  ;;  %p436_p8 = scmp.lt.s32.totalorder %s4854_s16, 1 }
  0x25   : > { %v460_v20 = vld [vmem:[%s8291_s2 + $0x38] sm:$0x33]  ;;  %v4873_v23 = vcombine.high %v455_v15, %v459_v19  ;;  %v4872_v25 = vcombine.low %v455_v15, %v459_v19  ;;  %v1071_v26 = vld [vmem:[%s8293_s4 + $0x20] sm:$0xff]  ;;  %v1068_v27 = vld [vmem:[%s8293_s4 + $0x8] sm:$0xff]  ;;  %vm3908_vm2 = vcmask 1041408   ;;  %vm3904_vm3 = vcmask 31744  }
  0x26   : > { %4876 = vmatprep.subr.msk.bf16.mxu0 %vm526_vm0, %v4869_v11  ;;  %v528_v22 = vsel %vm526_vm0, %v4868_v13, 0  ;;  %v4875_v24 = vcombine.high %v456_v16, %v460_v20  ;;  %v1072_v28 = vld [vmem:[%s8293_s4 + $0x28] sm:$0xff]  ;;  %4881 = vmatprep.subr.msk.bf16.mxu1 %vm526_vm0, %v4871_v17  ;;  %v534_v29 = vsel %vm526_vm0, %v4870_v18, 0  ;;  %v5309_v30 = vld [vmem:[%s398_s25] sm:$0xff]   ;;  %v4874_v31 = vcombine.low %v456_v16, %v460_v20  ;;  %v5876_v37 = vld [vmem:[%s398_s25 + $0x10] sm:$0xff]   ;;  %s9402_s16 = smov (!%p436_p8, %s4854_s16), 1 }
  0x27   : > { %552 = vmatpush1.bf16.msra.mxu0 %v528_v22  ;;  %625 = vmatpush1.bf16.msra.mxu1 %v534_v29  ;;  %v540_v32 = vsel %vm526_vm0, %v4872_v25, 0  ;;  %v5862_v34 = vcombine.high %v1067_v21, %v1071_v26  ;;  %v5865_v35 = vcombine.high %v1068_v27, %v1072_v28  ;;  %v5310_v36 = vld [vmem:[%s398_s25 + $0x8] sm:$0xff]   ;;  %v5884_v38 = vld [vmem:[%s398_s25 + $0x18] sm:$0xff]   ;;  %v1075_v39 = vld [vmem:[%s8293_s4 + $0x40] sm:$0xff]  ;;  %v5904_v43 = vcombine.low %v1067_v21, %v1071_v26  ;;  %s4862_s23 = sshll.u32 %s9402_s16, 2  ;;  %s4863_s30 = sshll.u32 %s9402_s16, 3 }
  0x28   : > { %4886 = vmatprep.subr.msk.bf16.mxu0 %vm526_vm0, %v4873_v23  ;;  %4891 = vmatprep.subr.msk.bf16.mxu1 %vm526_vm0, %v4875_v24  ;;  %v546_v33 = vsel %vm526_vm0, %v4874_v31, 0  ;;  %v1079_v40 = vld [vmem:[%s8293_s4 + $0x60] sm:$0xff]  ;;  %v1076_v41 = vld [vmem:[%s8293_s4 + $0x48] sm:$0xff]  ;;  %v5906_v44 = vcombine.low %v1068_v27, %v1072_v28  ;;  %s439_s26 = scalar_lea.vmem %s8290_s1, %s4862_s23  ;;  %s443_s12 = scalar_lea.vmem %s8299_s10, %s4863_s30 }
  0x29   : > { %8572 = vst [vmem:[#allocation4_spill] sm:$0xff] %v5862_v34  ;;  %8573 = vst [vmem:[#allocation5_spill] sm:$0xff] %v5865_v35  ;;  %v1080_v42 = vld [vmem:[%s8293_s4 + $0x68] sm:$0xff]  ;;  %v5908_v45 = vcombine.high %v1075_v39, %v1079_v40  ;;  %v1083_v47 = vld [vmem:[%s8293_s4 + $0x80] sm:$0xff]  ;;  %v5927_v51 = vcombine.low %v1075_v39, %v1079_v40 }
  0x2a   : > { %4877 = vmatmul.mubr.msk.bf16.vlgmr.msra.gmra.mrb[0].mxu0 %vm513_vm1, %v5309_v30  ;;  %4882 = vmatmul.mubr.msk.bf16.vlgmr.msra.gmra.mrb[0].mxu1 %vm513_vm1, %v5309_v30  ;;  %8574 = vst [vmem:[#allocation6_spill] sm:$0xff] %v5904_v43  ;;  %8575 = vst [vmem:[#allocation7_spill] sm:$0xff] %v5906_v44  ;;  %v5910_v46 = vcombine.high %v1076_v41, %v1080_v42  ;;  %v1087_v48 = vld [vmem:[%s8293_s4 + $0xa0] sm:$0xff]  ;;  %v1084_v49 = vld [vmem:[%s8293_s4 + $0x88] sm:$0xff]  ;;  %v5931_v52 = vcombine.low %v1076_v41, %v1080_v42 }
  0x2b   : > { %698 = vmatpush1.bf16.msra.mxu0 %v540_v32  ;;  %771 = vmatpush1.bf16.msra.mxu1 %v546_v33  ;;  %8576 = vst [vmem:[#allocation8_spill] sm:$0xff] %v5908_v45  ;;  %v1088_v50 = vld [vmem:[%s8293_s4 + $0xa8] sm:$0xff]  ;;  %8578 = vst [vmem:[#allocation10_spill] sm:$0xff] %v5927_v51  ;;  %v5933_v53 = vcombine.high %v1083_v47, %v1087_v48  ;;  %v1091_v55 = vld [vmem:[%s8293_s4 + $0xc0] sm:$0xff]  ;;  %v5953_v59 = vcombine.low %v1083_v47, %v1087_v48 }
  0x2c   : > { %593 = vmatprep.mubr.bf16.mxu0 %v8300_v14  ;;  %666 = vmatprep.mubr.bf16.mxu1 %v8300_v14  ;;  %8577 = vst [vmem:[#allocation9_spill] sm:$0xff] %v5910_v46  ;;  %8579 = vst [vmem:[#allocation11_spill] sm:$0xff] %v5931_v52  ;;  %v5936_v54 = vcombine.high %v1084_v49, %v1088_v50  ;;  %v1095_v56 = vld [vmem:[%s8293_s4 + $0xe0] sm:$0xff]  ;;  %v1092_v57 = vld [vmem:[%s8293_s4 + $0xc8] sm:$0xff]  ;;  %v5957_v60 = vcombine.low %v1084_v49, %v1088_v50 }
  0x2d   : > { %1897 = vmatprep.subr.bf16.mxu0 %v5862_v34  ;;  %1938 = vmatprep.subr.bf16.mxu1 %v5865_v35  ;;  %8580 = vst [vmem:[#allocation12_spill] sm:$0xff] %v5933_v53  ;;  %v1096_v58 = vld [vmem:[%s8293_s4 + $0xe8] sm:$0xff]  ;;  %8582 = vst [vmem:[#allocation14_spill] sm:$0xff] %v5953_v59  ;;  %v5959_v61 = vcombine.high %v1091_v55, %v1095_v56  ;;  %v1099_v63 = vld [vmem:[%s8293_s4 + $0x100] sm:$0xff]  ;;  %v5978_v3 = vcombine.low %v1091_v55, %v1095_v56 }
  0x2e   : > { %8581 = vst [vmem:[#allocation13_spill] sm:$0xff] %v5936_v54  ;;  %8583 = vst [vmem:[#allocation15_spill] sm:$0xff] %v5957_v60  ;;  %v5962_v62 = vcombine.high %v1092_v57, %v1096_v58  ;;  %v1103_v0 = vld [vmem:[%s8293_s4 + $0x120] sm:$0xff]  ;;  %v1100_v1 = vld [vmem:[%s8293_s4 + $0x108] sm:$0xff]  ;;  %v5989_v6 = vcombine.low %v1092_v57, %v1096_v58 }
  0x2f   : > { %8584 = vst [vmem:[#allocation16_spill] sm:$0xff] %v5959_v61  ;;  %v1104_v2 = vld [vmem:[%s8293_s4 + $0x128] sm:$0xff]  ;;  %8586 = vst [vmem:[#allocation18_spill] sm:$0xff] %v5978_v3  ;;  %v1107_v4 = vld [vmem:[%s8293_s4 + $0x140] sm:$0xff]  ;;  %v5991_v7 = vcombine.high %v1099_v63, %v1103_v0  ;;  %v6005_v11 = vcombine.low %v1099_v63, %v1103_v0 }
  0x30   : > { %8585 = vst [vmem:[#allocation17_spill] sm:$0xff] %v5962_v62  ;;  %v1111_v5 = vld [vmem:[%s8293_s4 + $0x160] sm:$0xff]  ;;  %8587 = vst [vmem:[#allocation19_spill] sm:$0xff] %v5989_v6  ;;  %v1108_v8 = vld [vmem:[%s8293_s4 + $0x148] sm:$0xff]  ;;  %v6000_v10 = vcombine.high %v1100_v1, %v1104_v2  ;;  %v6015_v15 = vcombine.low %v1100_v1, %v1104_v2 }
  0x31   : > { %8588 = vst [vmem:[#allocation20_spill] sm:$0xff] %v5991_v7  ;;  %v1112_v9 = vld [vmem:[%s8293_s4 + $0x168] sm:$0xff]  ;;  %8590 = vst [vmem:[#allocation22_spill] sm:$0xff] %v6005_v11  ;;  %v1115_v12 = vld [vmem:[%s8293_s4 + $0x180] sm:$0xff]  ;;  %v6017_v16 = vcombine.high %v1107_v4, %v1111_v5  ;;  %v6031_v20 = vcombine.low %v1107_v4, %v1111_v5 }
  0x32   : > { %4878 = vmatmul.mubr.msk.bf16.gmra.mrb[4].mxu0 %vm513_vm1, %v5310_v36  ;;  %4883 = vmatmul.mubr.msk.bf16.gmra.mrb[4].mxu1 %vm513_vm1, %v5310_v36  ;;  %8589 = vst [vmem:[#allocation21_spill] sm:$0xff] %v6000_v10  ;;  %v1119_v13 = vld [vmem:[%s8293_s4 + $0x1a0] sm:$0xff]  ;;  %8591 = vst [vmem:[#allocation23_spill] sm:$0xff] %v6015_v15  ;;  %v1116_v17 = vld [vmem:[%s8293_s4 + $0x188] sm:$0xff]  ;;  %v6026_v19 = vcombine.high %v1108_v8, %v1112_v9  ;;  %v6043_v23 = vcombine.low %v1108_v8, %v1112_v9 }
  0x33   : > { %603 = vmatprep.mubr.bf16.mxu0 %v8300_v14  ;;  %676 = vmatprep.mubr.bf16.mxu1 %v8300_v14  ;;  %8592 = vst [vmem:[#allocation24_spill] sm:$0xff] %v6017_v16  ;;  %v1120_v18 = vld [vmem:[%s8293_s4 + $0x1a8] sm:$0xff]  ;;  %8594 = vst [vmem:[#allocation26_spill] sm:$0xff] %v6031_v20  ;;  %v1123_v21 = vld [vmem:[%s8293_s4 + $0x1c0] sm:$0xff]  ;;  %v6045_v24 = vcombine.high %v1115_v12, %v1119_v13  ;;  %v6059_v28 = vcombine.low %v1115_v12, %v1119_v13 }
  0x34   : > { %8593 = vst [vmem:[#allocation25_spill] sm:$0xff] %v6026_v19  ;;  %v1127_v22 = vld [vmem:[%s8293_s4 + $0x1e0] sm:$0xff]  ;;  %8595 = vst [vmem:[#allocation27_spill] sm:$0xff] %v6043_v23  ;;  %v1124_v25 = vld [vmem:[%s8293_s4 + $0x1c8] sm:$0xff]  ;;  %v6054_v27 = vcombine.high %v1116_v17, %v1120_v18  ;;  %v6069_v31 = vcombine.low %v1116_v17, %v1120_v18 }
  0x35   : > { %8596 = vst [vmem:[#allocation28_spill] sm:$0xff] %v6045_v24  ;;  %v1128_v26 = vld [vmem:[%s8293_s4 + $0x1e8] sm:$0xff]  ;;  %8598 = vst [vmem:[#allocation30_spill] sm:$0xff] %v6059_v28  ;;  %v1131_v29 = vld [vmem:[%s8293_s4 + $0x200] sm:$0xff]  ;;  %v6071_v32 = vcombine.high %v1123_v21, %v1127_v22  ;;  %v6085_v39 = vcombine.low %v1123_v21, %v1127_v22 }
  0x36   : > { %8597 = vst [vmem:[#allocation29_spill] sm:$0xff] %v6054_v27  ;;  %8599 = vst [vmem:[#allocation31_spill] sm:$0xff] %v6069_v31  ;;  %v1132_v33 = vld [vmem:[%s8293_s4 + $0x208] sm:$0xff]  ;;  %v1139_v40 = vld [vmem:[%s8293_s4 + $0x240] sm:$0xff]  ;;  %v6097_v42 = vcombine.low %v1124_v25, %v1128_v26 }
  0x37   : > { %8600 = vst [vmem:[#allocation32_spill] sm:$0xff] %v6071_v32  ;;  %8602 = vst [vmem:[#allocation34_spill] sm:$0xff] %v6085_v39  ;;  %v1143_v41 = vld [vmem:[%s8293_s4 + $0x260] sm:$0xff]  ;;  %v1140_v48 = vld [vmem:[%s8293_s4 + $0x248] sm:$0xff] }
  0x38   : > { %8603 = vst [vmem:[#allocation35_spill] sm:$0xff] %v6097_v42  ;;  %v1144_v49 = vld [vmem:[%s8293_s4 + $0x268] sm:$0xff]  ;;  %v1147_v55 = vld [vmem:[%s8293_s4 + $0x280] sm:$0xff]  ;;  %v6125_v58 = vcombine.high %v1139_v40, %v1143_v41  ;;  %v6137_v2 = vcombine.low %v1139_v40, %v1143_v41 }
  0x39   : > { %v1151_v56 = vld [vmem:[%s8293_s4 + $0x2a0] sm:$0xff]  ;;  %v1148_v63 = vld [vmem:[%s8293_s4 + $0x288] sm:$0xff]  ;;  %v6134_v1 = vcombine.high %v1140_v48, %v1144_v49  ;;  %v6147_v8 = vcombine.low %v1140_v48, %v1144_v49 }
  0x3a   : > { %4879 = vmatmul.mubr.msk.bf16.gmra.mrb[8].mxu0 %vm513_vm1, %v5876_v37  ;;  %4884 = vmatmul.mubr.msk.bf16.gmra.mrb[8].mxu1 %vm513_vm1, %v5876_v37  ;;  %8608 = vst [vmem:[#allocation40_spill] sm:$0xff] %v6125_v58  ;;  %v1152_v0 = vld [vmem:[%s8293_s4 + $0x2a8] sm:$0xff]  ;;  %8610 = vst [vmem:[#allocation42_spill] sm:$0xff] %v6137_v2  ;;  %v1155_v4 = vld [vmem:[%s8293_s4 + $0x2c0] sm:$0xff]  ;;  %v6149_v9 = vcombine.high %v1147_v55, %v1151_v56  ;;  %v6161_v18 = vcombine.low %v1147_v55, %v1151_v56 }
  0x3b   : > { %613 = vmatprep.mubr.bf16.mxu0 %v8300_v14  ;;  %686 = vmatprep.mubr.bf16.mxu1 %v8300_v14  ;;  %8609 = vst [vmem:[#allocation41_spill] sm:$0xff] %v6134_v1  ;;  %v1159_v5 = vld [vmem:[%s8293_s4 + $0x2e0] sm:$0xff]  ;;  %8611 = vst [vmem:[#allocation43_spill] sm:$0xff] %v6147_v8  ;;  %v1156_v12 = vld [vmem:[%s8293_s4 + $0x2c8] sm:$0xff]  ;;  %v6158_v17 = vcombine.high %v1148_v63, %v1152_v0 }
  0x3c   : > { %8612 = vst [vmem:[#allocation44_spill] sm:$0xff] %v6149_v9  ;;  %v1160_v13 = vld [vmem:[%s8293_s4 + $0x2e8] sm:$0xff]  ;;  %8614 = vst [vmem:[#allocation46_spill] sm:$0xff] %v6161_v18  ;;  %v1163_v21 = vld [vmem:[%s8293_s4 + $0x300] sm:$0xff] }
  0x3d   : > { %8613 = vst [vmem:[#allocation45_spill] sm:$0xff] %v6158_v17  ;;  %v1167_v22 = vld [vmem:[%s8293_s4 + $0x320] sm:$0xff]  ;;  %v6195_v48 = vcombine.low %v1156_v12, %v1160_v13  ;;  %v1172_v55 = vld [vmem:[%s8293_s4 + $0x348] sm:$0xff] }
  0x3e   : > { %v1171_v40 = vld [vmem:[%s8293_s4 + $0x340] sm:$0xff]  ;;  %v6197_v49 = vcombine.high %v1163_v21, %v1167_v22  ;;  %v1176_v56 = vld [vmem:[%s8293_s4 + $0x368] sm:$0xff] }
  0x3f   : > { %v1175_v41 = vld [vmem:[%s8293_s4 + $0x360] sm:$0xff]  ;;  %8619 = vst [vmem:[#allocation51_spill] sm:$0xff] %v6195_v48 }
  0x40   : > { %8620 = vst [vmem:[#allocation52_spill] sm:$0xff] %v6197_v49 }
  0x42   : > { %4880 = vmatmul.mubr.msk.bf16.gmra.mrb[12].mxu0 %vm513_vm1, %v5884_v38  ;;  %4885 = vmatmul.mubr.msk.bf16.gmra.mrb[12].mxu1 %vm513_vm1, %v5884_v38 }
  0x43   : > { %729 = vmatprep.mubr.bf16.mxu0 %v8300_v14  ;;  %802 = vmatprep.mubr.bf16.mxu1 %v8300_v14 }
  0x4a   : > { %4887 = vmatmul.mubr.msk.bf16.vlgmr.msra.gmra.mrb[16].mxu0 %vm513_vm1, %v5309_v30  ;;  %4892 = vmatmul.mubr.msk.bf16.vlgmr.msra.gmra.mrb[16].mxu1 %vm513_vm1, %v5309_v30  ;;  %v1135_v30 = vld [vmem:[%s8293_s4 + $0x220] sm:$0xff] }
  0x4b   : > { %1898 = vmatpush1.bf16.msra.mxu0 %v5904_v43  ;;  %1939 = vmatpush1.bf16.msra.mxu1 %v5906_v44  ;;  %v6099_v47 = vcombine.high %v1131_v29, %v1135_v30 }
  0x4c   : > { %1899 = vmatprep.subr.bf16.mxu0 %v5908_v45  ;;  %1940 = vmatprep.subr.bf16.mxu1 %v5910_v46 }
  0x4d   : > { %739 = vmatprep.mubr.bf16.mxu0 %v8300_v14  ;;  %812 = vmatprep.mubr.bf16.mxu1 %v8300_v14  ;;  %8604 = vst [vmem:[#allocation36_spill] sm:$0xff] %v6099_v47 }
  0x4f   : > { %1900 = vmatpush1.bf16.msra.mxu0 %v5927_v51  ;;  %1941 = vmatpush1.bf16.msra.mxu1 %v5931_v52 }
  0x50   : > { %1901 = vmatprep.subr.bf16.mxu0 %v5933_v53  ;;  %1942 = vmatprep.subr.bf16.mxu1 %v5936_v54 }
  0x52   : > { %4888 = vmatmul.mubr.msk.bf16.gmra.mrb[20].mxu0 %vm513_vm1, %v5310_v36  ;;  %4893 = vmatmul.mubr.msk.bf16.gmra.mrb[20].mxu1 %vm513_vm1, %v5310_v36  ;;  %v1136_v36 = vld [vmem:[%s8293_s4 + $0x228] sm:$0xff] }
  0x53   : > { %1902 = vmatpush1.bf16.msra.mxu0 %v5953_v59  ;;  %1943 = vmatpush1.bf16.msra.mxu1 %v5957_v60  ;;  %v6108_v50 = vcombine.high %v1132_v33, %v1136_v36  ;;  %v6123_v57 = vcombine.low %v1132_v33, %v1136_v36  ;;  %v6182_v33 = vcombine.high %v1156_v12, %v1160_v13 }
  0x54   : > { %1903 = vmatprep.subr.bf16.mxu0 %v5959_v61  ;;  %1944 = vmatprep.subr.bf16.mxu1 %v5962_v62  ;;  %v6185_v36 = vcombine.low %v1155_v4, %v1159_v5  ;;  %v6221_v13 = vcombine.high %v1171_v40, %v1175_v41 }
  0x55   : > { %749 = vmatprep.mubr.bf16.mxu0 %v8300_v14  ;;  %822 = vmatprep.mubr.bf16.mxu1 %v8300_v14  ;;  %8605 = vst [vmem:[#allocation37_spill] sm:$0xff] %v6108_v50  ;;  %8607 = vst [vmem:[#allocation39_spill] sm:$0xff] %v6123_v57 }
  0x56   : > { %8617 = vst [vmem:[#allocation49_spill] sm:$0xff] %v6182_v33  ;;  %8618 = vst [vmem:[#allocation50_spill] sm:$0xff] %v6185_v36 }
  0x57   : > { %1904 = vmatpush1.bf16.msra.mxu0 %v5978_v3  ;;  %1945 = vmatpush1.bf16.msra.mxu1 %v5989_v6  ;;  %8624 = vst [vmem:[#allocation56_spill] sm:$0xff] %v6221_v13 }
  0x58   : > { %1905 = vmatprep.subr.bf16.mxu0 %v5991_v7  ;;  %1946 = vmatprep.subr.bf16.mxu1 %v6000_v10 }
  0x5a   : > { %4889 = vmatmul.mubr.msk.bf16.gmra.mrb[24].mxu0 %vm513_vm1, %v5876_v37  ;;  %4894 = vmatmul.mubr.msk.bf16.gmra.mrb[24].mxu1 %vm513_vm1, %v5876_v37  ;;  %v6080_v37 = vcombine.high %v1124_v25, %v1128_v26  ;;  %v6171_v25 = vcombine.low %v1148_v63, %v1152_v0  ;;  %v6173_v26 = vcombine.high %v1155_v4, %v1159_v5  ;;  %v1179_v4 = vld [vmem:[%s8293_s4 + $0x380] sm:$0xff] }
  0x5b   : > { %1906 = vmatpush1.bf16.msra.mxu0 %v6005_v11  ;;  %1947 = vmatpush1.bf16.msra.mxu1 %v6015_v15  ;;  %v6209_v0 = vcombine.low %v1163_v21, %v1167_v22  ;;  %v1183_v5 = vld [vmem:[%s8293_s4 + $0x3a0] sm:$0xff]  ;;  %v1180_v21 = vld [vmem:[%s8293_s4 + $0x388] sm:$0xff] }
  0x5c   : > { %1907 = vmatprep.subr.bf16.mxu0 %v6017_v16  ;;  %1948 = vmatprep.subr.bf16.mxu1 %v6026_v19  ;;  %8601 = vst [vmem:[#allocation33_spill] sm:$0xff] %v6080_v37  ;;  %8615 = vst [vmem:[#allocation47_spill] sm:$0xff] %v6171_v25  ;;  %v1184_v22 = vld [vmem:[%s8293_s4 + $0x3a8] sm:$0xff] }
  0x5d   : > { %759 = vmatprep.mubr.bf16.mxu0 %v8300_v14  ;;  %832 = vmatprep.mubr.bf16.mxu1 %v8300_v14  ;;  %8616 = vst [vmem:[#allocation48_spill] sm:$0xff] %v6173_v26  ;;  %8622 = vst [vmem:[#allocation54_spill] sm:$0xff] %v6209_v0 }
  0x5f   : > { %1908 = vmatpush1.bf16.msra.mxu0 %v6031_v20  ;;  %1949 = vmatpush1.bf16.msra.mxu1 %v6043_v23 }
  0x60   : > { %1909 = vmatprep.subr.bf16.mxu0 %v6045_v24  ;;  %1950 = vmatprep.subr.bf16.mxu1 %v6054_v27 }
  0x62   : > { %4890 = vmatmul.mubr.msk.bf16.gmra.mrb[28].mxu0 %vm513_vm1, %v5884_v38  ;;  %4895 = vmatmul.mubr.msk.bf16.gmra.mrb[28].mxu1 %vm513_vm1, %v5884_v38  ;;  %v6113_v38 = vcombine.low %v1131_v29, %v1135_v30  ;;  %v1164_v29 = vld [vmem:[%s8293_s4 + $0x308] sm:$0xff] }
  0x63   : > { %1910 = vmatpush1.bf16.msra.mxu0 %v6059_v28  ;;  %1951 = vmatpush1.bf16.msra.mxu1 %v6069_v31  ;;  %v1168_v30 = vld [vmem:[%s8293_s4 + $0x328] sm:$0xff] }
  0x64   : > { %1911 = vmatprep.subr.bf16.mxu0 %v6071_v32  ;;  %1952 = vmatprep.subr.bf16.mxu1 %v6080_v37  ;;  %8606 = vst [vmem:[#allocation38_spill] sm:$0xff] %v6113_v38  ;;  %v6206_v63 = vcombine.high %v1164_v29, %v1168_v30  ;;  %v6219_v12 = vcombine.low %v1164_v29, %v1168_v30  ;;  %v1187_v29 = vld [vmem:[%s8293_s4 + $0x3c0] sm:$0xff] }
  0x65   : > { %1929 = vmatprep.mubr.bf16.mxu0 %v8300_v14  ;;  %1970 = vmatprep.mubr.bf16.mxu1 %v8300_v14  ;;  %v6230_v14 = vcombine.high %v1172_v55, %v1176_v56  ;;  %v1191_v30 = vld [vmem:[%s8293_s4 + $0x3e0] sm:$0xff] }
  0x66   : > { %8621 = vst [vmem:[#allocation53_spill] sm:$0xff] %v6206_v63  ;;  %8623 = vst [vmem:[#allocation55_spill] sm:$0xff] %v6219_v12 }
  0x67   : > { %1912 = vmatpush1.bf16.msra.mxu0 %v6085_v39  ;;  %1953 = vmatpush1.bf16.msra.mxu1 %v6097_v42  ;;  %8625 = vst [vmem:[#allocation57_spill] sm:$0xff] %v6230_v14 }
  0x68   : > { %1913 = vmatprep.subr.bf16.mxu0 %v6099_v47  ;;  %1954 = vmatprep.subr.bf16.mxu1 %v6108_v50 }
  0x6b   : > { %1914 = vmatpush1.bf16.msra.mxu0 %v6113_v38  ;;  %1955 = vmatpush1.bf16.msra.mxu1 %v6123_v57 }
  0x6c   : > { %1915 = vmatprep.subr.bf16.mxu0 %v6125_v58  ;;  %1956 = vmatprep.subr.bf16.mxu1 %v6134_v1 }
  0x6f   : > { %1916 = vmatpush1.bf16.msra.mxu0 %v6137_v2  ;;  %1957 = vmatpush1.bf16.msra.mxu1 %v6147_v8 }
  0x70   : > { %1917 = vmatprep.subr.bf16.mxu0 %v6149_v9  ;;  %1958 = vmatprep.subr.bf16.mxu1 %v6158_v17 }
  0x73   : > { %1918 = vmatpush1.bf16.msra.mxu0 %v6161_v18  ;;  %1959 = vmatpush1.bf16.msra.mxu1 %v6171_v25 }
  0x74   : > { %1919 = vmatprep.subr.bf16.mxu0 %v6173_v26  ;;  %1960 = vmatprep.subr.bf16.mxu1 %v6182_v33 }
  0x77   : > { %1920 = vmatpush1.bf16.msra.mxu0 %v6185_v36  ;;  %1961 = vmatpush1.bf16.msra.mxu1 %v6195_v48  ;;  %v6233_v48 = vcombine.low %v1171_v40, %v1175_v41  ;;  %v1188_v40 = vld [vmem:[%s8293_s4 + $0x3c8] sm:$0xff]  ;;  %v1093_v36 = vld [vmem:[%s8293_s4 + $0xd0] sm:$0xff] }
  0x78   : > { %1921 = vmatprep.subr.bf16.mxu0 %v6197_v49  ;;  %1962 = vmatprep.subr.bf16.mxu1 %v6206_v63  ;;  %v6243_v49 = vcombine.low %v1172_v55, %v1176_v56  ;;  %v6245_v63 = vcombine.high %v1179_v4, %v1183_v5  ;;  %v1192_v41 = vld [vmem:[%s8293_s4 + $0x3e8] sm:$0xff]  ;;  %v6261_v55 = vcombine.low %v1180_v21, %v1184_v22 }
  0x79   : > { %8626 = vst [vmem:[#allocation58_spill] sm:$0xff] %v6233_v48  ;;  %v6263_v56 = vcombine.high %v1187_v29, %v1191_v30 }
  0x7a   : > { %8627 = vst [vmem:[#allocation59_spill] sm:$0xff] %v6243_v49  ;;  %8628 = vst [vmem:[#allocation60_spill] sm:$0xff] %v6245_v63 }
  0x7b   : > { %1922 = vmatpush1.bf16.msra.mxu0 %v6209_v0  ;;  %1963 = vmatpush1.bf16.msra.mxu1 %v6219_v12  ;;  %v6254_v0 = vcombine.high %v1180_v21, %v1184_v22  ;;  %v6257_v12 = vcombine.low %v1179_v4, %v1183_v5  ;;  %8631 = vst [vmem:[#allocation63_spill] sm:$0xff] %v6261_v55  ;;  %8632 = vst [vmem:[#allocation64_spill] sm:$0xff] %v6263_v56  ;;  %v1073_v4 = vld [vmem:[%s8293_s4 + $0x30] sm:$0xff]  ;;  %v1070_v5 = vld [vmem:[%s8293_s4 + $0x18] sm:$0xff] }
  0x7c   : > { %1923 = vmatprep.subr.bf16.mxu0 %v6221_v13  ;;  %1964 = vmatprep.subr.bf16.mxu1 %v6230_v14  ;;  %v6266_v13 = vcombine.high %v1188_v40, %v1192_v41  ;;  %v1069_v14 = vld [vmem:[%s8293_s4 + $0x10] sm:$0xff]  ;;  %v1074_v21 = vld [vmem:[%s8293_s4 + $0x38] sm:$0xff]  ;;  %v6281_v22 = vcombine.low %v1187_v29, %v1191_v30 }
  0x7d   : > { %8629 = vst [vmem:[#allocation61_spill] sm:$0xff] %v6254_v0  ;;  %8630 = vst [vmem:[#allocation62_spill] sm:$0xff] %v6257_v12  ;;  %v1081_v29 = vld [vmem:[%s8293_s4 + $0x70] sm:$0xff]  ;;  %v1078_v30 = vld [vmem:[%s8293_s4 + $0x58] sm:$0xff] }
  0x7e   : > { %8633 = vst [vmem:[#allocation65_spill] sm:$0xff] %v6266_v13  ;;  %8634 = vst [vmem:[#allocation66_spill] sm:$0xff] %v6281_v22 }
  0x7f   : > { %1924 = vmatpush1.bf16.msra.mxu0 %v6233_v48  ;;  %1965 = vmatpush1.bf16.msra.mxu1 %v6243_v49  ;;  %v6290_v49 = vcombine.high %v1070_v5, %v1074_v21  ;;  %v1077_v48 = vld [vmem:[%s8293_s4 + $0x50] sm:$0xff] }
  0x80   : > { %1925 = vmatprep.subr.bf16.mxu0 %v6245_v63  ;;  %1966 = vmatprep.subr.bf16.mxu1 %v6254_v0  ;;  %v6285_v0 = vcombine.low %v1188_v40, %v1192_v41  ;;  %v6287_v63 = vcombine.high %v1069_v14, %v1073_v4  ;;  %v1082_v40 = vld [vmem:[%s8293_s4 + $0x78] sm:$0xff]  ;;  %v6305_v41 = vcombine.low %v1069_v14, %v1073_v4  ;;  %v1089_v14 = vld [vmem:[%s8293_s4 + $0xb0] sm:$0xff]  ;;  %v8642_v4 = vmov 0  }
  0x81   : > { %8637 = vst [vmem:[#allocation69_spill] sm:$0xff] %v6290_v49 }
  0x82   : > { %8635 = vst [vmem:[#allocation67_spill] sm:$0xff] %v6285_v0  ;;  %8636 = vst [vmem:[#allocation68_spill] sm:$0xff] %v6287_v63 }
  0x83   : > { %1926 = vmatpush1.bf16.msra.mxu0 %v6257_v12  ;;  %1967 = vmatpush1.bf16.msra.mxu1 %v6261_v55  ;;  %8638 = vst [vmem:[#allocation70_spill] sm:$0xff] %v6305_v41  ;;  %v6314_v55 = vcombine.high %v1078_v30, %v1082_v40  ;;  %v1085_v12 = vld [vmem:[%s8293_s4 + $0x90] sm:$0xff] }
  0x84   : > { %1927 = vmatprep.subr.bf16.mxu0 %v6263_v56  ;;  %1968 = vmatprep.subr.bf16.mxu1 %v6266_v13  ;;  %v6309_v13 = vcombine.low %v1070_v5, %v1074_v21  ;;  %v6311_v56 = vcombine.high %v1077_v48, %v1081_v29  ;;  %v1086_v5 = vld [vmem:[%s8293_s4 + $0x98] sm:$0xff] }
  0x85   : > { %8641 = vst [vmem:[#allocation73_spill] sm:$0xff] %v6314_v55  ;;  %v1090_v21 = vld [vmem:[%s8293_s4 + $0xb8] sm:$0xff] }
  0x86   : > { %8639 = vst [vmem:[#allocation71_spill] sm:$0xff] %v6309_v13  ;;  %8640 = vst [vmem:[#allocation72_spill] sm:$0xff] %v6311_v56 }
  0x87   : > { %1928 = vmatpush1.bf16.msra.mxu0 %v6281_v22  ;;  %1969 = vmatpush1.bf16.msra.mxu1 %v6285_v0  ;;  %v6337_v0 = vcombine.high %v1085_v12, %v1089_v14  ;;  %v6340_v22 = vcombine.high %v1086_v5, %v1090_v21 }
  0x88   : > { %1979 = vmatprep.subr.bf16.mxu0 %v6287_v63  ;;  %2020 = vmatprep.subr.bf16.mxu1 %v6290_v49  ;;  %v6331_v49 = vcombine.low %v1077_v48, %v1081_v29  ;;  %v6335_v63 = vcombine.low %v1078_v30, %v1082_v40  ;;  %v1097_v48 = vld [vmem:[%s8293_s4 + $0xf0] sm:$0xff]  ;;  %v1094_v29 = vld [vmem:[%s8293_s4 + $0xd8] sm:$0xff]  ;;  %v6357_v40 = vcombine.low %v1085_v12, %v1089_v14 }
  0x89   : > { %8645 = vst [vmem:[#allocation76_spill] sm:$0xff] %v6337_v0  ;;  %8646 = vst [vmem:[#allocation77_spill] sm:$0xff] %v6340_v22  ;;  %v1098_v30 = vld [vmem:[%s8293_s4 + $0xf8] sm:$0xff]  ;;  %v1105_v12 = vld [vmem:[%s8293_s4 + $0x130] sm:$0xff] }
  0x8a   : > { %1930 = vmatmul.mubr.bf16.vlgmr.msra.gmra.mrb[32].mxu0 %v8642_v4  ;;  %1971 = vmatmul.mubr.bf16.vlgmr.msra.gmra.mrb[32].mxu1 %v8642_v4  ;;  %8643 = vst [vmem:[#allocation74_spill] sm:$0xff] %v6331_v49  ;;  %8644 = vst [vmem:[#allocation75_spill] sm:$0xff] %v6335_v63  ;;  %v1102_v14 = vld [vmem:[%s8293_s4 + $0x118] sm:$0xff] }
  0x8b   : > { %1980 = vmatpush1.bf16.msra.mxu0 %v6305_v41  ;;  %2021 = vmatpush1.bf16.msra.mxu1 %v6309_v13  ;;  %8647 = vst [vmem:[#allocation78_spill] sm:$0xff] %v6357_v40  ;;  %v6366_v13 = vcombine.high %v1094_v29, %v1098_v30  ;;  %v1101_v41 = vld [vmem:[%s8293_s4 + $0x110] sm:$0xff] }
  0x8c   : > { %1981 = vmatprep.subr.bf16.mxu0 %v6311_v56  ;;  %2022 = vmatprep.subr.bf16.mxu1 %v6314_v55  ;;  %v6361_v55 = vcombine.low %v1086_v5, %v1090_v21  ;;  %v6363_v56 = vcombine.high %v1093_v36, %v1097_v48  ;;  %v1106_v5 = vld [vmem:[%s8293_s4 + $0x138] sm:$0xff]  ;;  %v6381_v21 = vcombine.low %v1093_v36, %v1097_v48  ;;  %v1113_v36 = vld [vmem:[%s8293_s4 + $0x170] sm:$0xff] }
  0x8d   : > { %2011 = vmatprep.mubr.bf16.mxu0 %v8642_v4  ;;  %2052 = vmatprep.mubr.bf16.mxu1 %v8642_v4  ;;  %8650 = vst [vmem:[#allocation81_spill] sm:$0xff] %v6366_v13  ;;  %v1110_v48 = vld [vmem:[%s8293_s4 + $0x158] sm:$0xff] }
  0x8e   : > { %8648 = vst [vmem:[#allocation79_spill] sm:$0xff] %v6361_v55  ;;  %8649 = vst [vmem:[#allocation80_spill] sm:$0xff] %v6363_v56 }
  0x8f   : > { %1982 = vmatpush1.bf16.msra.mxu0 %v6331_v49  ;;  %2023 = vmatpush1.bf16.msra.mxu1 %v6335_v63  ;;  %8651 = vst [vmem:[#allocation82_spill] sm:$0xff] %v6381_v21  ;;  %v6390_v63 = vcombine.high %v1102_v14, %v1106_v5  ;;  %v1109_v49 = vld [vmem:[%s8293_s4 + $0x150] sm:$0xff] }
  0x90   : > { %1983 = vmatprep.subr.bf16.mxu0 %v6337_v0  ;;  %2024 = vmatprep.subr.bf16.mxu1 %v6340_v22  ;;  %v6385_v22 = vcombine.low %v1094_v29, %v1098_v30  ;;  %v6387_v0 = vcombine.high %v1101_v41, %v1105_v12  ;;  %v1114_v29 = vld [vmem:[%s8293_s4 + $0x178] sm:$0xff]  ;;  %v6405_v30 = vcombine.low %v1101_v41, %v1105_v12  ;;  %v1121_v41 = vld [vmem:[%s8293_s4 + $0x1b0] sm:$0xff] }
  0x91   : > { %8654 = vst [vmem:[#allocation85_spill] sm:$0xff] %v6390_v63  ;;  %v1118_v12 = vld [vmem:[%s8293_s4 + $0x198] sm:$0xff] }
  0x92   : > { %8652 = vst [vmem:[#allocation83_spill] sm:$0xff] %v6385_v22  ;;  %8653 = vst [vmem:[#allocation84_spill] sm:$0xff] %v6387_v0 }
  0x93   : > { %1984 = vmatpush1.bf16.msra.mxu0 %v6357_v40  ;;  %2025 = vmatpush1.bf16.msra.mxu1 %v6361_v55  ;;  %8655 = vst [vmem:[#allocation86_spill] sm:$0xff] %v6405_v30  ;;  %v6414_v55 = vcombine.high %v1110_v48, %v1114_v29  ;;  %v1117_v40 = vld [vmem:[%s8293_s4 + $0x190] sm:$0xff] }
  0x94   : > { %1985 = vmatprep.subr.bf16.mxu0 %v6363_v56  ;;  %2026 = vmatprep.subr.bf16.mxu1 %v6366_v13  ;;  %v6409_v13 = vcombine.low %v1102_v14, %v1106_v5  ;;  %v6411_v56 = vcombine.high %v1109_v49, %v1113_v36  ;;  %v1122_v14 = vld [vmem:[%s8293_s4 + $0x1b8] sm:$0xff]  ;;  %v6429_v5 = vcombine.low %v1109_v49, %v1113_v36  ;;  %v1129_v49 = vld [vmem:[%s8293_s4 + $0x1f0] sm:$0xff] }
  0x95   : > { %8658 = vst [vmem:[#allocation89_spill] sm:$0xff] %v6414_v55  ;;  %v1126_v36 = vld [vmem:[%s8293_s4 + $0x1d8] sm:$0xff] }
  0x96   : > { %8656 = vst [vmem:[#allocation87_spill] sm:$0xff] %v6409_v13  ;;  %8657 = vst [vmem:[#allocation88_spill] sm:$0xff] %v6411_v56 }
  0x97   : > { %1986 = vmatpush1.bf16.msra.mxu0 %v6381_v21  ;;  %2027 = vmatpush1.bf16.msra.mxu1 %v6385_v22  ;;  %8659 = vst [vmem:[#allocation90_spill] sm:$0xff] %v6429_v5  ;;  %v6438_v22 = vcombine.high %v1118_v12, %v1122_v14  ;;  %v1125_v21 = vld [vmem:[%s8293_s4 + $0x1d0] sm:$0xff] }
  0x98   : > { %1987 = vmatprep.subr.bf16.mxu0 %v6387_v0  ;;  %2028 = vmatprep.subr.bf16.mxu1 %v6390_v63  ;;  %v6433_v63 = vcombine.low %v1110_v48, %v1114_v29  ;;  %v6435_v0 = vcombine.high %v1117_v40, %v1121_v41  ;;  %v1130_v48 = vld [vmem:[%s8293_s4 + $0x1f8] sm:$0xff]  ;;  %v6453_v29 = vcombine.low %v1117_v40, %v1121_v41  ;;  %v1137_v40 = vld [vmem:[%s8293_s4 + $0x230] sm:$0xff] }
  0x99   : > { %8662 = vst [vmem:[#allocation93_spill] sm:$0xff] %v6438_v22  ;;  %v1134_v41 = vld [vmem:[%s8293_s4 + $0x218] sm:$0xff] }
  0x9a   : > { %8660 = vst [vmem:[#allocation91_spill] sm:$0xff] %v6433_v63  ;;  %8661 = vst [vmem:[#allocation92_spill] sm:$0xff] %v6435_v0 }
  0x9b   : > { %1988 = vmatpush1.bf16.msra.mxu0 %v6405_v30  ;;  %2029 = vmatpush1.bf16.msra.mxu1 %v6409_v13  ;;  %8663 = vst [vmem:[#allocation94_spill] sm:$0xff] %v6453_v29  ;;  %v6462_v13 = vcombine.high %v1126_v36, %v1130_v48  ;;  %v1133_v30 = vld [vmem:[%s8293_s4 + $0x210] sm:$0xff] }
  0x9c   : > { %1989 = vmatprep.subr.bf16.mxu0 %v6411_v56  ;;  %2030 = vmatprep.subr.bf16.mxu1 %v6414_v55  ;;  %v6457_v55 = vcombine.low %v1118_v12, %v1122_v14  ;;  %v6459_v56 = vcombine.high %v1125_v21, %v1129_v49  ;;  %v1138_v12 = vld [vmem:[%s8293_s4 + $0x238] sm:$0xff]  ;;  %v6477_v14 = vcombine.low %v1125_v21, %v1129_v49  ;;  %v1145_v21 = vld [vmem:[%s8293_s4 + $0x270] sm:$0xff] }
  0x9d   : > { %8666 = vst [vmem:[#allocation97_spill] sm:$0xff] %v6462_v13  ;;  %v1142_v49 = vld [vmem:[%s8293_s4 + $0x258] sm:$0xff] }
  0x9e   : > { %8664 = vst [vmem:[#allocation95_spill] sm:$0xff] %v6457_v55  ;;  %8665 = vst [vmem:[#allocation96_spill] sm:$0xff] %v6459_v56 }
  0x9f   : > { %1990 = vmatpush1.bf16.msra.mxu0 %v6429_v5  ;;  %2031 = vmatpush1.bf16.msra.mxu1 %v6433_v63  ;;  %8667 = vst [vmem:[#allocation98_spill] sm:$0xff] %v6477_v14  ;;  %v6486_v63 = vcombine.high %v1134_v41, %v1138_v12  ;;  %v1141_v5 = vld [vmem:[%s8293_s4 + $0x250] sm:$0xff] }
  0xa0   : > { %1991 = vmatprep.subr.bf16.mxu0 %v6435_v0  ;;  %2032 = vmatprep.subr.bf16.mxu1 %v6438_v22  ;;  %v6481_v22 = vcombine.low %v1126_v36, %v1130_v48  ;;  %v6483_v0 = vcombine.high %v1133_v30, %v1137_v40  ;;  %v1146_v36 = vld [vmem:[%s8293_s4 + $0x278] sm:$0xff]  ;;  %v6501_v48 = vcombine.low %v1133_v30, %v1137_v40  ;;  %v1153_v30 = vld [vmem:[%s8293_s4 + $0x2b0] sm:$0xff] }
  0xa1   : > { %8670 = vst [vmem:[#allocation101_spill] sm:$0xff] %v6486_v63  ;;  %v1150_v40 = vld [vmem:[%s8293_s4 + $0x298] sm:$0xff] }
  0xa2   : > { %8668 = vst [vmem:[#allocation99_spill] sm:$0xff] %v6481_v22  ;;  %8669 = vst [vmem:[#allocation100_spill] sm:$0xff] %v6483_v0 }
  0xa3   : > { %1992 = vmatpush1.bf16.msra.mxu0 %v6453_v29  ;;  %2033 = vmatpush1.bf16.msra.mxu1 %v6457_v55  ;;  %8671 = vst [vmem:[#allocation102_spill] sm:$0xff] %v6501_v48  ;;  %v6510_v55 = vcombine.high %v1142_v49, %v1146_v36  ;;  %v1149_v29 = vld [vmem:[%s8293_s4 + $0x290] sm:$0xff] }
  0xa4   : > { %1993 = vmatprep.subr.bf16.mxu0 %v6459_v56  ;;  %2034 = vmatprep.subr.bf16.mxu1 %v6462_v13  ;;  %v6505_v13 = vcombine.low %v1134_v41, %v1138_v12  ;;  %v6507_v56 = vcombine.high %v1141_v5, %v1145_v21  ;;  %v1154_v41 = vld [vmem:[%s8293_s4 + $0x2b8] sm:$0xff]  ;;  %v6525_v12 = vcombine.low %v1141_v5, %v1145_v21  ;;  %v1161_v5 = vld [vmem:[%s8293_s4 + $0x2f0] sm:$0xff] }
  0xa5   : > { %8674 = vst [vmem:[#allocation105_spill] sm:$0xff] %v6510_v55  ;;  %v1158_v21 = vld [vmem:[%s8293_s4 + $0x2d8] sm:$0xff] }
  0xa6   : > { %8672 = vst [vmem:[#allocation103_spill] sm:$0xff] %v6505_v13  ;;  %8673 = vst [vmem:[#allocation104_spill] sm:$0xff] %v6507_v56 }
  0xa7   : > { %1994 = vmatpush1.bf16.msra.mxu0 %v6477_v14  ;;  %2035 = vmatpush1.bf16.msra.mxu1 %v6481_v22  ;;  %8675 = vst [vmem:[#allocation106_spill] sm:$0xff] %v6525_v12  ;;  %v6534_v22 = vcombine.high %v1150_v40, %v1154_v41  ;;  %v1157_v14 = vld [vmem:[%s8293_s4 + $0x2d0] sm:$0xff] }
  0xa8   : > { %1995 = vmatprep.subr.bf16.mxu0 %v6483_v0  ;;  %2036 = vmatprep.subr.bf16.mxu1 %v6486_v63  ;;  %v6529_v63 = vcombine.low %v1142_v49, %v1146_v36  ;;  %v6531_v0 = vcombine.high %v1149_v29, %v1153_v30  ;;  %v1162_v49 = vld [vmem:[%s8293_s4 + $0x2f8] sm:$0xff]  ;;  %v6549_v36 = vcombine.low %v1149_v29, %v1153_v30  ;;  %v1169_v29 = vld [vmem:[%s8293_s4 + $0x330] sm:$0xff] }
  0xa9   : > { %8678 = vst [vmem:[#allocation109_spill] sm:$0xff] %v6534_v22  ;;  %v1166_v30 = vld [vmem:[%s8293_s4 + $0x318] sm:$0xff] }
  0xaa   : > { %8676 = vst [vmem:[#allocation107_spill] sm:$0xff] %v6529_v63  ;;  %8677 = vst [vmem:[#allocation108_spill] sm:$0xff] %v6531_v0 }
  0xab   : > { %1996 = vmatpush1.bf16.msra.mxu0 %v6501_v48  ;;  %2037 = vmatpush1.bf16.msra.mxu1 %v6505_v13  ;;  %8679 = vst [vmem:[#allocation110_spill] sm:$0xff] %v6549_v36  ;;  %v6558_v13 = vcombine.high %v1158_v21, %v1162_v49  ;;  %v1165_v48 = vld [vmem:[%s8293_s4 + $0x310] sm:$0xff] }
  0xac   : > { %1997 = vmatprep.subr.bf16.mxu0 %v6507_v56  ;;  %2038 = vmatprep.subr.bf16.mxu1 %v6510_v55  ;;  %v6553_v55 = vcombine.low %v1150_v40, %v1154_v41  ;;  %v6555_v56 = vcombine.high %v1157_v14, %v1161_v5  ;;  %v1170_v40 = vld [vmem:[%s8293_s4 + $0x338] sm:$0xff]  ;;  %v6573_v41 = vcombine.low %v1157_v14, %v1161_v5  ;;  %v1177_v14 = vld [vmem:[%s8293_s4 + $0x370] sm:$0xff] }
  0xad   : > { %8682 = vst [vmem:[#allocation113_spill] sm:$0xff] %v6558_v13  ;;  %v1174_v5 = vld [vmem:[%s8293_s4 + $0x358] sm:$0xff] }
  0xae   : > { %8680 = vst [vmem:[#allocation111_spill] sm:$0xff] %v6553_v55  ;;  %8681 = vst [vmem:[#allocation112_spill] sm:$0xff] %v6555_v56 }
  0xaf   : > { %1998 = vmatpush1.bf16.msra.mxu0 %v6525_v12  ;;  %2039 = vmatpush1.bf16.msra.mxu1 %v6529_v63  ;;  %8683 = vst [vmem:[#allocation114_spill] sm:$0xff] %v6573_v41  ;;  %v6582_v63 = vcombine.high %v1166_v30, %v1170_v40  ;;  %v1173_v12 = vld [vmem:[%s8293_s4 + $0x350] sm:$0xff] }
  0xb0   : > { %1999 = vmatprep.subr.bf16.mxu0 %v6531_v0  ;;  %2040 = vmatprep.subr.bf16.mxu1 %v6534_v22  ;;  %v6577_v22 = vcombine.low %v1158_v21, %v1162_v49  ;;  %v6579_v0 = vcombine.high %v1165_v48, %v1169_v29  ;;  %v1178_v21 = vld [vmem:[%s8293_s4 + $0x378] sm:$0xff]  ;;  %v6597_v49 = vcombine.low %v1165_v48, %v1169_v29  ;;  %v1185_v48 = vld [vmem:[%s8293_s4 + $0x3b0] sm:$0xff] }
  0xb1   : > { %8686 = vst [vmem:[#allocation117_spill] sm:$0xff] %v6582_v63  ;;  %v1182_v29 = vld [vmem:[%s8293_s4 + $0x398] sm:$0xff] }
  0xb2   : > { %8684 = vst [vmem:[#allocation115_spill] sm:$0xff] %v6577_v22  ;;  %8685 = vst [vmem:[#allocation116_spill] sm:$0xff] %v6579_v0 }
  0xb3   : > { %2000 = vmatpush1.bf16.msra.mxu0 %v6549_v36  ;;  %2041 = vmatpush1.bf16.msra.mxu1 %v6553_v55  ;;  %8687 = vst [vmem:[#allocation118_spill] sm:$0xff] %v6597_v49  ;;  %v6606_v55 = vcombine.high %v1174_v5, %v1178_v21  ;;  %v1181_v36 = vld [vmem:[%s8293_s4 + $0x390] sm:$0xff] }
  0xb4   : > { %2001 = vmatprep.subr.bf16.mxu0 %v6555_v56  ;;  %2042 = vmatprep.subr.bf16.mxu1 %v6558_v13  ;;  %v6601_v13 = vcombine.low %v1166_v30, %v1170_v40  ;;  %v6603_v56 = vcombine.high %v1173_v12, %v1177_v14  ;;  %v1186_v30 = vld [vmem:[%s8293_s4 + $0x3b8] sm:$0xff]  ;;  %v6621_v40 = vcombine.low %v1173_v12, %v1177_v14  ;;  %v1193_v12 = vld [vmem:[%s8293_s4 + $0x3f0] sm:$0xff] }
  0xb5   : > { %8690 = vst [vmem:[#allocation121_spill] sm:$0xff] %v6606_v55  ;;  %v1190_v14 = vld [vmem:[%s8293_s4 + $0x3d8] sm:$0xff] }
  0xb6   : > { %8688 = vst [vmem:[#allocation119_spill] sm:$0xff] %v6601_v13  ;;  %8689 = vst [vmem:[#allocation120_spill] sm:$0xff] %v6603_v56 }
  0xb7   : > { %2002 = vmatpush1.bf16.msra.mxu0 %v6573_v41  ;;  %2043 = vmatpush1.bf16.msra.mxu1 %v6577_v22  ;;  %8691 = vst [vmem:[#allocation122_spill] sm:$0xff] %v6621_v40  ;;  %v6630_v22 = vcombine.high %v1182_v29, %v1186_v30  ;;  %v1189_v41 = vld [vmem:[%s8293_s4 + $0x3d0] sm:$0xff] }
  0xb8   : > { %2003 = vmatprep.subr.bf16.mxu0 %v6579_v0  ;;  %2044 = vmatprep.subr.bf16.mxu1 %v6582_v63  ;;  %v6625_v63 = vcombine.low %v1174_v5, %v1178_v21  ;;  %v6627_v0 = vcombine.high %v1181_v36, %v1185_v48  ;;  %v1194_v5 = vld [vmem:[%s8293_s4 + $0x3f8] sm:$0xff]  ;;  %v6645_v21 = vcombine.low %v1181_v36, %v1185_v48  ;;  %v8701_v48 = vld [vmem:[#allocation50_spill] sm:$0xff] }
  0xb9   : > { %8694 = vst [vmem:[#allocation125_spill] sm:$0xff] %v6630_v22  ;;  %v6661_v36 = vcombine.low %v1190_v14, %v1194_v5 }
  0xba   : > { %8692 = vst [vmem:[#allocation123_spill] sm:$0xff] %v6625_v63  ;;  %8693 = vst [vmem:[#allocation124_spill] sm:$0xff] %v6627_v0 }
  0xbb   : > { %2004 = vmatpush1.bf16.msra.mxu0 %v6597_v49  ;;  %2045 = vmatpush1.bf16.msra.mxu1 %v6601_v13  ;;  %8695 = vst [vmem:[#allocation126_spill] sm:$0xff] %v6645_v21  ;;  %v6654_v13 = vcombine.high %v1190_v14, %v1194_v5  ;;  %v6657_v49 = vcombine.low %v1189_v41, %v1193_v12  ;;  %8700 = vst [vmem:[#allocation131_spill] sm:$0xff] %v6661_v36  ;;  %v8706_v5 = vld [vmem:[#allocation54_spill] sm:$0xff] }
  0xbc   : > { %2005 = vmatprep.subr.bf16.mxu0 %v6603_v56  ;;  %2046 = vmatprep.subr.bf16.mxu1 %v6606_v55  ;;  %v6649_v55 = vcombine.low %v1182_v29, %v1186_v30  ;;  %v6651_v56 = vcombine.high %v1189_v41, %v1193_v12  ;;  %v1197_v41 = vlaneseq  ;;  %v8702_v29 = vld [vmem:[#allocation51_spill] sm:$0xff]  ;;  %v8703_v30 = vld [vmem:[#allocation52_spill] sm:$0xff]  ;;  %v8704_v12 = vld [vmem:[#allocation53_spill] sm:$0xff] }
  0xbd   : > { %8698 = vst [vmem:[#allocation129_spill] sm:$0xff] %v6654_v13  ;;  %8699 = vst [vmem:[#allocation130_spill] sm:$0xff] %v6657_v49 }
  0xbe   : > { %8696 = vst [vmem:[#allocation127_spill] sm:$0xff] %v6649_v55  ;;  %8697 = vst [vmem:[#allocation128_spill] sm:$0xff] %v6651_v56  ;;  %v6718_v14 = vshrl.u32 %v1197_v41, 7 }
  0xbf   : > { %2006 = vmatpush1.bf16.msra.mxu0 %v6621_v40  ;;  %2047 = vmatpush1.bf16.msra.mxu1 %v6625_v63 }
  0xc0   : > { %2007 = vmatprep.subr.bf16.mxu0 %v6627_v0  ;;  %2048 = vmatprep.subr.bf16.mxu1 %v6630_v22  ;;  %8705 = vst [vmem:[#allocation132_spill] sm:$0xff] %v6718_v14 }
  0xc3   : > { %2008 = vmatpush1.bf16.msra.mxu0 %v6645_v21  ;;  %2049 = vmatpush1.bf16.msra.mxu1 %v6649_v55 }
  0xc4   : > { %2009 = vmatprep.subr.bf16.mxu0 %v6651_v56  ;;  %2050 = vmatprep.subr.bf16.mxu1 %v6654_v13 }
  0xc7   : > { %2010 = vmatpush1.bf16.msra.mxu0 %v6657_v49  ;;  %2051 = vmatpush1.bf16.msra.mxu1 %v6661_v36 }
  0xc8   : > { %2140 = vmatprep.subr.bf16.mxu0 %v5862_v34  ;;  %2181 = vmatprep.subr.bf16.mxu1 %v5865_v35 }
  0xca   : > { %2012 = vmatmul.mubr.bf16.vlgmr.msra.gmra.mrb[36].mxu0 %v8642_v4  ;;  %2053 = vmatmul.mubr.bf16.vlgmr.msra.gmra.mrb[36].mxu1 %v8642_v4  ;;  %v8707_v4 = vld [vmem:[#allocation55_spill] sm:$0xff] }
  0xcb   : > { %2141 = vmatpush1.bf16.msra.mxu0 %v5904_v43  ;;  %2182 = vmatpush1.bf16.msra.mxu1 %v5906_v44 }
  0xcc   : > { %2142 = vmatprep.subr.bf16.mxu0 %v5908_v45  ;;  %2183 = vmatprep.subr.bf16.mxu1 %v5910_v46 }
  0xcf   : > { %2143 = vmatpush1.bf16.msra.mxu0 %v5927_v51  ;;  %2184 = vmatpush1.bf16.msra.mxu1 %v5931_v52 }
  0xd0   : > { %2144 = vmatprep.subr.bf16.mxu0 %v5933_v53  ;;  %2185 = vmatprep.subr.bf16.mxu1 %v5936_v54 }
  0xd3   : > { %2145 = vmatpush1.bf16.msra.mxu0 %v5953_v59  ;;  %2186 = vmatpush1.bf16.msra.mxu1 %v5957_v60 }
  0xd4   : > { %2146 = vmatprep.subr.bf16.mxu0 %v5959_v61  ;;  %2187 = vmatprep.subr.bf16.mxu1 %v5962_v62 }
  0xd7   : > { %2147 = vmatpush1.bf16.msra.mxu0 %v5978_v3  ;;  %2188 = vmatpush1.bf16.msra.mxu1 %v5989_v6 }
  0xd8   : > { %2148 = vmatprep.subr.bf16.mxu0 %v5991_v7  ;;  %2189 = vmatprep.subr.bf16.mxu1 %v6000_v10 }
  0xdb   : > { %2149 = vmatpush1.bf16.msra.mxu0 %v6005_v11  ;;  %2190 = vmatpush1.bf16.msra.mxu1 %v6015_v15 }
  0xdc   : > { %2150 = vmatprep.subr.bf16.mxu0 %v6017_v16  ;;  %2191 = vmatprep.subr.bf16.mxu1 %v6026_v19 }
  0xdf   : > { %2151 = vmatpush1.bf16.msra.mxu0 %v6031_v20  ;;  %2192 = vmatpush1.bf16.msra.mxu1 %v6043_v23 }
  0xe0   : > { %2152 = vmatprep.subr.bf16.mxu0 %v6045_v24  ;;  %2193 = vmatprep.subr.bf16.mxu1 %v6054_v27 }
  0xe3   : > { %2153 = vmatpush1.bf16.msra.mxu0 %v6059_v28  ;;  %2194 = vmatpush1.bf16.msra.mxu1 %v6069_v31 }
  0xe4   : > { %2154 = vmatprep.subr.bf16.mxu0 %v6071_v32  ;;  %2195 = vmatprep.subr.bf16.mxu1 %v6080_v37 }
  0xe7   : > { %2155 = vmatpush1.bf16.msra.mxu0 %v6085_v39  ;;  %2196 = vmatpush1.bf16.msra.mxu1 %v6097_v42  ;;  %v8726_v39 = vld [vmem:[#allocation66_spill] sm:$0xff] }
  0xe8   : > { %2156 = vmatprep.subr.bf16.mxu0 %v6099_v47  ;;  %2197 = vmatprep.subr.bf16.mxu1 %v6108_v50 }
  0xeb   : > { %2157 = vmatpush1.bf16.msra.mxu0 %v6113_v38  ;;  %2198 = vmatpush1.bf16.msra.mxu1 %v6123_v57  ;;  %v8721_v38 = vld [vmem:[#allocation65_spill] sm:$0xff] }
  0xec   : > { %2158 = vmatprep.subr.bf16.mxu0 %v6125_v58  ;;  %2199 = vmatprep.subr.bf16.mxu1 %v6134_v1  ;;  %v8714_v58 = vsub.s32 0, %v6718_v14 }
  0xef   : > { %2159 = vmatpush1.bf16.msra.mxu0 %v6137_v2  ;;  %2200 = vmatpush1.bf16.msra.mxu1 %v6147_v8 }
  0xf0   : > { %2160 = vmatprep.subr.bf16.mxu0 %v6149_v9  ;;  %2201 = vmatprep.subr.bf16.mxu1 %v6158_v17 }
  0xf3   : > { %2161 = vmatpush1.bf16.msra.mxu0 %v6161_v18  ;;  %2202 = vmatpush1.bf16.msra.mxu1 %v6171_v25  ;;  %v8708_v25 = vld [vmem:[#allocation56_spill] sm:$0xff]  ;;  %v8709_v18 = vld [vmem:[#allocation57_spill] sm:$0xff] }
  0xf4   : > { %2162 = vmatprep.subr.bf16.mxu0 %v6173_v26  ;;  %2203 = vmatprep.subr.bf16.mxu1 %v6182_v33 }
  0xf7   : > { %2163 = vmatpush1.bf16.msra.mxu0 %v8701_v48  ;;  %2204 = vmatpush1.bf16.msra.mxu1 %v8702_v29 }
  0xf8   : > { %2164 = vmatprep.subr.bf16.mxu0 %v8703_v30  ;;  %2205 = vmatprep.subr.bf16.mxu1 %v8704_v12  ;;  %v8710_v12 = vld [vmem:[#allocation58_spill] sm:$0xff]  ;;  %v8712_v30 = vld [vmem:[#allocation60_spill] sm:$0xff] }
  0xfb   : > { %2165 = vmatpush1.bf16.msra.mxu0 %v8706_v5  ;;  %2206 = vmatpush1.bf16.msra.mxu1 %v8707_v4 }
  0xfc   : > { %2166 = vmatprep.subr.bf16.mxu0 %v8708_v25  ;;  %2207 = vmatprep.subr.bf16.mxu1 %v8709_v18  ;;  %v6734_v18 = vld [vmem:[%s8292_s3] sm:$0xff]  ;;  %v8711_v25 = vld [vmem:[#allocation59_spill] sm:$0xff] }
  0xfd   : > { %v585_v26 = vpop.f32.mrb[0].mxu0  ;;  %v658_v33 = vpop.f32.mrb[0].mxu1  ;;  %v6744_v57 = vrot.slane %v6734_v18, %v8714_v58  ;;  %v8719_v58 = vld [vmem:[#allocation63_spill] sm:$0xff] }
  0xfe   : > { %v587_v17 = vpop.f32.mrb[1].mxu0  ;;  %v660_v29 = vpop.f32.mrb[1].mxu1 }
  0xff   : > { %v6724_v48 = vpack.c.bf16 %v587_v17, %v585_v26  ;;  %v589_v9 = vpop.f32.mrb[2].mxu0  ;;  %2167 = vmatpush1.bf16.msra.mxu0 %v8710_v12  ;;  %v6729_v5 = vpack.c.bf16 %v660_v29, %v658_v33  ;;  %v662_v4 = vpop.f32.mrb[2].mxu1  ;;  %2208 = vmatpush1.bf16.msra.mxu1 %v8711_v25  ;;  %v8713_v12 = vld [vmem:[#allocation61_spill] sm:$0xff]  ;;  %v8715_v17 = vsub.s32 1, %v6718_v14  ;;  %v8716_v25 = vld [vmem:[#allocation62_spill] sm:$0xff] }
 0x100   : > { %v591_v8 = vpop.f32.mrb[3].mxu0  ;;  %2168 = vmatprep.subr.bf16.mxu0 %v8712_v30  ;;  %v664_v2 = vpop.f32.mrb[3].mxu1  ;;  %2209 = vmatprep.subr.bf16.mxu1 %v8713_v12  ;;  %v8720_v12 = vld [vmem:[#allocation64_spill] sm:$0xff] }
 0x101   : > { %v5211_v41 = vpack.c.bf16 %v591_v8, %v589_v9  ;;  %v5212_v33 = vpack.c.bf16 %v664_v2, %v662_v4  ;;  %v6749_v26 = vrot.slane %v6734_v18, %v8715_v17  ;;  %v8717_v9 = vsub.s32 2, %v6718_v14 }
 0x102   : > { %v8718_v4 = vsub.s32 3, %v6718_v14 }
 0x103   : > { %v2122_v29 = vunpack.c.l.bf16 %v5211_v41  ;;  %v2123_v1 = vunpack.c.h.bf16 %v5211_v41  ;;  %2169 = vmatpush1.bf16.msra.mxu0 %v8716_v25  ;;  %v2124_v30 = vunpack.c.l.bf16 %v5212_v33  ;;  %v2125_v8 = vunpack.c.h.bf16 %v5212_v33  ;;  %2210 = vmatpush1.bf16.msra.mxu1 %v8719_v58 }
 0x104   : > { %v6755_v2 = vrot.slane %v6734_v18, %v8717_v9  ;;  %v6760_v41 = vrot.slane %v6734_v18, %v8718_v4  ;;  %2170 = vmatprep.subr.bf16.mxu0 %v8720_v12  ;;  %2211 = vmatprep.subr.bf16.mxu1 %v8721_v38 }
 0x105   : > { %v595_v17 = vpop.f32.mrb[4].mxu0  ;;  %v6766_v25 = vadd.f32 %v2122_v29, %v6744_v57  ;;  %v6769_v33 = vadd.f32 %v2123_v1, %v6749_v26  ;;  %v668_v9 = vpop.f32.mrb[4].mxu1  ;;  %v8728_v1 = vld [vmem:[#allocation68_spill] sm:$0xff] }
 0x106   : > { %v597_v50 = vpop.f32.mrb[5].mxu0  ;;  %v6772_v47 = vadd.f32 %v2124_v30, %v6755_v2  ;;  %v6775_v4 = vadd.f32 %v2125_v8, %v6760_v41  ;;  %v670_v42 = vpop.f32.mrb[5].mxu1 }
 0x107   : > { %8722 = vst [vmem:[#allocation133_spill] sm:$0xff] %v6766_v25  ;;  %8723 = vst [vmem:[#allocation134_spill] sm:$0xff] %v6769_v33  ;;  %v5215_v58 = vpack.c.bf16 %v597_v50, %v595_v17  ;;  %v599_v12 = vpop.f32.mrb[6].mxu0  ;;  %2171 = vmatpush1.bf16.msra.mxu0 %v8726_v39  ;;  %v5216_v38 = vpack.c.bf16 %v670_v42, %v668_v9  ;;  %v672_v37 = vpop.f32.mrb[6].mxu1  ;;  %v8727_v25 = vld [vmem:[#allocation67_spill] sm:$0xff] }
 0x108   : > { %8724 = vst [vmem:[#allocation135_spill] sm:$0xff] %v6772_v47  ;;  %8725 = vst [vmem:[#allocation136_spill] sm:$0xff] %v6775_v4  ;;  %v601_v29 = vpop.f32.mrb[7].mxu0  ;;  %2212 = vmatpush1.bf16.msra.mxu1 %v8727_v25  ;;  %2222 = vmatprep.subr.bf16.mxu0 %v8728_v1  ;;  %v674_v30 = vpop.f32.mrb[7].mxu1  ;;  %v8729_v47 = vld [vmem:[#allocation69_spill] sm:$0xff] }
 0x109   : > { %v2365_v33 = vunpack.c.l.bf16 %v5215_v58  ;;  %v2366_v32 = vunpack.c.h.bf16 %v5215_v58  ;;  %v5219_v31 = vpack.c.bf16 %v601_v29, %v599_v12  ;;  %2263 = vmatprep.subr.bf16.mxu1 %v8729_v47  ;;  %v2367_v8 = vunpack.c.l.bf16 %v5216_v38 }
 0x10a   : > { %v2368_v4 = vunpack.c.h.bf16 %v5216_v38  ;;  %v5220_v50 = vpack.c.bf16 %v674_v30, %v672_v37 }
 0x10b   : > { %v2608_v17 = vunpack.c.l.bf16 %v5219_v31  ;;  %v2609_v28 = vunpack.c.h.bf16 %v5219_v31  ;;  %v6782_v39 = vadd.f32 %v2365_v33, %v6744_v57  ;;  %v6785_v42 = vadd.f32 %v2366_v32, %v6749_v26 }
 0x10c   : > { %v2610_v9 = vunpack.c.l.bf16 %v5220_v50  ;;  %v2611_v25 = vunpack.c.h.bf16 %v5220_v50  ;;  %v6788_v1 = vadd.f32 %v2367_v8, %v6755_v2  ;;  %v6791_v12 = vadd.f32 %v2368_v4, %v6760_v41 }
 0x10d   : > { %8730 = vst [vmem:[#allocation137_spill] sm:$0xff] %v6782_v39  ;;  %8731 = vst [vmem:[#allocation138_spill] sm:$0xff] %v6785_v42  ;;  %v605_v58 = vpop.f32.mrb[8].mxu0  ;;  %v6794_v38 = vadd.f32 %v2608_v17, %v6744_v57  ;;  %v6797_v31 = vadd.f32 %v2609_v28, %v6749_v26  ;;  %v678_v37 = vpop.f32.mrb[8].mxu1 }
 0x10e   : > { %8732 = vst [vmem:[#allocation139_spill] sm:$0xff] %v6788_v1  ;;  %8733 = vst [vmem:[#allocation140_spill] sm:$0xff] %v6791_v12  ;;  %v607_v33 = vpop.f32.mrb[9].mxu0  ;;  %v6800_v32 = vadd.f32 %v2610_v9, %v6755_v2  ;;  %v6803_v29 = vadd.f32 %v2611_v25, %v6760_v41  ;;  %v680_v8 = vpop.f32.mrb[9].mxu1 }
 0x10f   : > { %8734 = vst [vmem:[#allocation141_spill] sm:$0xff] %v6794_v38  ;;  %8735 = vst [vmem:[#allocation142_spill] sm:$0xff] %v6797_v31  ;;  %v5223_v30 = vpack.c.bf16 %v607_v33, %v605_v58  ;;  %v609_v50 = vpop.f32.mrb[10].mxu0  ;;  %v5224_v4 = vpack.c.bf16 %v680_v8, %v678_v37  ;;  %v682_v12 = vpop.f32.mrb[10].mxu1 }
 0x110   : > { %8736 = vst [vmem:[#allocation143_spill] sm:$0xff] %v6800_v32  ;;  %8737 = vst [vmem:[#allocation144_spill] sm:$0xff] %v6803_v29  ;;  %v611_v42 = vpop.f32.mrb[11].mxu0  ;;  %v684_v39 = vpop.f32.mrb[11].mxu1 }
 0x111   : > { %v2851_v1 = vunpack.c.l.bf16 %v5223_v30  ;;  %v2852_v17 = vunpack.c.h.bf16 %v5223_v30  ;;  %v5227_v38 = vpack.c.bf16 %v611_v42, %v609_v50  ;;  %v2853_v28 = vunpack.c.l.bf16 %v5224_v4 }
 0x112   : > { %v2854_v31 = vunpack.c.h.bf16 %v5224_v4  ;;  %v5228_v47 = vpack.c.bf16 %v684_v39, %v682_v12 }
 0x113   : > { %v3094_v27 = vunpack.c.l.bf16 %v5227_v38  ;;  %v3095_v24 = vunpack.c.h.bf16 %v5227_v38  ;;  %v6806_v9 = vadd.f32 %v2851_v1, %v6744_v57  ;;  %v6809_v25 = vadd.f32 %v2852_v17, %v6749_v26 }
 0x114   : > { %v3096_v58 = vunpack.c.l.bf16 %v5228_v47  ;;  %v3097_v33 = vunpack.c.h.bf16 %v5228_v47  ;;  %v6812_v37 = vadd.f32 %v2853_v28, %v6755_v2  ;;  %v6815_v30 = vadd.f32 %v2854_v31, %v6760_v41 }
 0x115   : > { %8738 = vst [vmem:[#allocation145_spill] sm:$0xff] %v6806_v9  ;;  %8739 = vst [vmem:[#allocation146_spill] sm:$0xff] %v6809_v25  ;;  %v615_v42 = vpop.f32.mrb[12].mxu0  ;;  %v6818_v8 = vadd.f32 %v3094_v27, %v6744_v57  ;;  %v6821_v39 = vadd.f32 %v3095_v24, %v6749_v26  ;;  %v688_v1 = vpop.f32.mrb[12].mxu1 }
 0x116   : > { %8740 = vst [vmem:[#allocation147_spill] sm:$0xff] %v6812_v37  ;;  %8741 = vst [vmem:[#allocation148_spill] sm:$0xff] %v6815_v30  ;;  %v617_v12 = vpop.f32.mrb[13].mxu0  ;;  %v6824_v38 = vadd.f32 %v3096_v58, %v6755_v2  ;;  %v6827_v47 = vadd.f32 %v3097_v33, %v6760_v41  ;;  %v690_v4 = vpop.f32.mrb[13].mxu1 }
 0x117   : > { %8742 = vst [vmem:[#allocation149_spill] sm:$0xff] %v6818_v8  ;;  %8743 = vst [vmem:[#allocation150_spill] sm:$0xff] %v6821_v39  ;;  %v5231_v50 = vpack.c.bf16 %v617_v12, %v615_v42  ;;  %v619_v17 = vpop.f32.mrb[14].mxu0  ;;  %v5232_v31 = vpack.c.bf16 %v690_v4, %v688_v1  ;;  %v692_v28 = vpop.f32.mrb[14].mxu1 }
 0x118   : > { %8744 = vst [vmem:[#allocation151_spill] sm:$0xff] %v6824_v38  ;;  %8745 = vst [vmem:[#allocation152_spill] sm:$0xff] %v6827_v47  ;;  %v621_v30 = vpop.f32.mrb[15].mxu0  ;;  %v694_v37 = vpop.f32.mrb[15].mxu1 }
 0x119   : > { %v3337_v25 = vunpack.c.l.bf16 %v5231_v50  ;;  %v3338_v27 = vunpack.c.h.bf16 %v5231_v50  ;;  %v5235_v8 = vpack.c.bf16 %v621_v30, %v619_v17  ;;  %v3339_v24 = vunpack.c.l.bf16 %v5232_v31 }
 0x11a   : > { %v3340_v39 = vunpack.c.h.bf16 %v5232_v31  ;;  %v5236_v9 = vpack.c.bf16 %v694_v37, %v692_v28 }
 0x11b   : > { %v3580_v29 = vunpack.c.l.bf16 %v5235_v8  ;;  %v3581_v32 = vunpack.c.h.bf16 %v5235_v8  ;;  %v6830_v58 = vadd.f32 %v3337_v25, %v6744_v57  ;;  %v6833_v33 = vadd.f32 %v3338_v27, %v6749_v26 }
 0x11c   : > { %v3582_v42 = vunpack.c.l.bf16 %v5236_v9  ;;  %v3583_v12 = vunpack.c.h.bf16 %v5236_v9  ;;  %v6836_v1 = vadd.f32 %v3339_v24, %v6755_v2  ;;  %v6839_v50 = vadd.f32 %v3340_v39, %v6760_v41 }
 0x11d   : > { %8746 = vst [vmem:[#allocation153_spill] sm:$0xff] %v6830_v58  ;;  %8747 = vst [vmem:[#allocation154_spill] sm:$0xff] %v6833_v33  ;;  %v731_v30 = vpop.f32.mrb[16].mxu0  ;;  %v6842_v4 = vadd.f32 %v3580_v29, %v6744_v57  ;;  %v6845_v37 = vadd.f32 %v3581_v32, %v6749_v26  ;;  %v804_v25 = vpop.f32.mrb[16].mxu1  ;;  %v1215_v27 = vsub.s32 4, %v6718_v14  ;;  %v1219_v29 = vsub.s32 5, %v6718_v14 }
 0x11e   : > { %8748 = vst [vmem:[#allocation155_spill] sm:$0xff] %v6836_v1  ;;  %8749 = vst [vmem:[#allocation156_spill] sm:$0xff] %v6839_v50  ;;  %v733_v8 = vpop.f32.mrb[17].mxu0  ;;  %v6848_v17 = vadd.f32 %v3582_v42, %v6755_v2  ;;  %v6851_v9 = vadd.f32 %v3583_v12, %v6760_v41  ;;  %v806_v28 = vpop.f32.mrb[17].mxu1  ;;  %v1227_v42 = vsub.s32 7, %v6718_v14 }
 0x11f   : > { %8750 = vst [vmem:[#allocation157_spill] sm:$0xff] %v6842_v4  ;;  %8751 = vst [vmem:[#allocation158_spill] sm:$0xff] %v6845_v37  ;;  %v6853_v31 = vpack.c.bf16 %v733_v8, %v731_v30  ;;  %v735_v39 = vpop.f32.mrb[18].mxu0  ;;  %v6857_v24 = vpack.c.bf16 %v806_v28, %v804_v25  ;;  %v808_v32 = vpop.f32.mrb[18].mxu1  ;;  %v1223_v4 = vsub.s32 6, %v6718_v14  ;;  %v6862_v8 = vrot.slane %v6734_v18, %v1215_v27 }
 0x120   : > { %8752 = vst [vmem:[#allocation159_spill] sm:$0xff] %v6848_v17  ;;  %8753 = vst [vmem:[#allocation160_spill] sm:$0xff] %v6851_v9  ;;  %v737_v37 = vpop.f32.mrb[19].mxu0  ;;  %v810_v50 = vpop.f32.mrb[19].mxu1  ;;  %v6865_v33 = vrot.slane %v6734_v18, %v1219_v29  ;;  %v6871_v58 = vrot.slane %v6734_v18, %v1227_v42 }
 0x121   : > { %v5213_v17 = vpack.c.bf16 %v737_v37, %v735_v39  ;;  %v5214_v12 = vpack.c.bf16 %v810_v50, %v808_v32  ;;  %v6868_v28 = vrot.slane %v6734_v18, %v1223_v4 }
 0x123   : > { %v2126_v9 = vunpack.c.l.bf16 %v5213_v17  ;;  %v2127_v30 = vunpack.c.h.bf16 %v5213_v17  ;;  %v2128_v1 = vunpack.c.l.bf16 %v5214_v12  ;;  %v2129_v25 = vunpack.c.h.bf16 %v5214_v12 }
 0x125   : > { %v741_v14 = vpop.f32.mrb[20].mxu0  ;;  %v6874_v37 = vadd.f32 %v2126_v9, %v6862_v8  ;;  %v6877_v50 = vadd.f32 %v2127_v30, %v6865_v33  ;;  %v814_v17 = vpop.f32.mrb[20].mxu1  ;;  %v6880_v27 = vadd.f32 %v2128_v1, %v6868_v28  ;;  %v6883_v29 = vadd.f32 %v2129_v25, %v6871_v58 }
 0x126   : > { %v743_v39 = vpop.f32.mrb[21].mxu0  ;;  %v816_v32 = vpop.f32.mrb[21].mxu1 }
 0x127   : > { %8754 = vst [vmem:[#allocation161_spill] sm:$0xff] %v6874_v37  ;;  %8755 = vst [vmem:[#allocation162_spill] sm:$0xff] %v6877_v50  ;;  %v5217_v4 = vpack.c.bf16 %v743_v39, %v741_v14  ;;  %v745_v12 = vpop.f32.mrb[22].mxu0  ;;  %v5218_v18 = vpack.c.bf16 %v816_v32, %v814_v17  ;;  %v818_v42 = vpop.f32.mrb[22].mxu1 }
 0x128   : > { %8756 = vst [vmem:[#allocation163_spill] sm:$0xff] %v6880_v27  ;;  %8757 = vst [vmem:[#allocation164_spill] sm:$0xff] %v6883_v29  ;;  %v747_v47 = vpop.f32.mrb[23].mxu0  ;;  %v820_v23 = vpop.f32.mrb[23].mxu1 }
 0x129   : > { %v2369_v38 = vunpack.c.l.bf16 %v5217_v4  ;;  %v2370_v9 = vunpack.c.h.bf16 %v5217_v4  ;;  %v5221_v37 = vpack.c.bf16 %v747_v47, %v745_v12  ;;  %v2371_v30 = vunpack.c.l.bf16 %v5218_v18 }
 0x12a   : > { %v2372_v50 = vunpack.c.h.bf16 %v5218_v18  ;;  %v5222_v20 = vpack.c.bf16 %v820_v23, %v818_v42 }
 0x12b   : > { %v2612_v19 = vunpack.c.l.bf16 %v5221_v37  ;;  %v2613_v16 = vunpack.c.h.bf16 %v5221_v37  ;;  %v6886_v1 = vadd.f32 %v2369_v38, %v6862_v8  ;;  %v6889_v25 = vadd.f32 %v2370_v9, %v6865_v33 }
 0x12c   : > { %v2614_v14 = vunpack.c.l.bf16 %v5222_v20  ;;  %v2615_v39 = vunpack.c.h.bf16 %v5222_v20  ;;  %v6892_v17 = vadd.f32 %v2371_v30, %v6868_v28  ;;  %v6895_v4 = vadd.f32 %v2372_v50, %v6871_v58 }
 0x12d   : > { %8758 = vst [vmem:[#allocation165_spill] sm:$0xff] %v6886_v1  ;;  %8759 = vst [vmem:[#allocation166_spill] sm:$0xff] %v6889_v25  ;;  %v751_v47 = vpop.f32.mrb[24].mxu0  ;;  %v6898_v32 = vadd.f32 %v2612_v19, %v6862_v8  ;;  %v6901_v23 = vadd.f32 %v2613_v16, %v6865_v33  ;;  %v824_v38 = vpop.f32.mrb[24].mxu1 }
 0x12e   : > { %8760 = vst [vmem:[#allocation167_spill] sm:$0xff] %v6892_v17  ;;  %8761 = vst [vmem:[#allocation168_spill] sm:$0xff] %v6895_v4  ;;  %v753_v37 = vpop.f32.mrb[25].mxu0  ;;  %v6904_v12 = vadd.f32 %v2614_v14, %v6868_v28  ;;  %v6907_v20 = vadd.f32 %v2615_v39, %v6871_v58  ;;  %v826_v42 = vpop.f32.mrb[25].mxu1 }
 0x12f   : > { %8762 = vst [vmem:[#allocation169_spill] sm:$0xff] %v6898_v32  ;;  %8763 = vst [vmem:[#allocation170_spill] sm:$0xff] %v6901_v23  ;;  %v5225_v18 = vpack.c.bf16 %v753_v37, %v751_v47  ;;  %v755_v9 = vpop.f32.mrb[26].mxu0  ;;  %v5226_v50 = vpack.c.bf16 %v826_v42, %v824_v38  ;;  %v828_v30 = vpop.f32.mrb[26].mxu1 }
 0x130   : > { %8764 = vst [vmem:[#allocation171_spill] sm:$0xff] %v6904_v12  ;;  %8765 = vst [vmem:[#allocation172_spill] sm:$0xff] %v6907_v20  ;;  %v757_v4 = vpop.f32.mrb[27].mxu0  ;;  %v830_v17 = vpop.f32.mrb[27].mxu1 }
 0x131   : > { %v2855_v25 = vunpack.c.l.bf16 %v5225_v18  ;;  %v2856_v19 = vunpack.c.h.bf16 %v5225_v18  ;;  %v5229_v32 = vpack.c.bf16 %v757_v4, %v755_v9  ;;  %v2857_v16 = vunpack.c.l.bf16 %v5226_v50 }
 0x132   : > { %v2858_v23 = vunpack.c.h.bf16 %v5226_v50  ;;  %v5230_v1 = vpack.c.bf16 %v830_v17, %v828_v30 }
 0x133   : > { %v3098_v29 = vunpack.c.l.bf16 %v5229_v32  ;;  %v3099_v27 = vunpack.c.h.bf16 %v5229_v32  ;;  %v6910_v14 = vadd.f32 %v2855_v25, %v6862_v8  ;;  %v6913_v39 = vadd.f32 %v2856_v19, %v6865_v33 }
 0x134   : > { %v3100_v47 = vunpack.c.l.bf16 %v5230_v1  ;;  %v3101_v37 = vunpack.c.h.bf16 %v5230_v1  ;;  %v6916_v38 = vadd.f32 %v2857_v16, %v6868_v28  ;;  %v6919_v18 = vadd.f32 %v2858_v23, %v6871_v58 }
 0x135   : > { %8766 = vst [vmem:[#allocation173_spill] sm:$0xff] %v6910_v14  ;;  %8767 = vst [vmem:[#allocation174_spill] sm:$0xff] %v6913_v39  ;;  %v761_v4 = vpop.f32.mrb[28].mxu0  ;;  %v6922_v42 = vadd.f32 %v3098_v29, %v6862_v8  ;;  %v6925_v17 = vadd.f32 %v3099_v27, %v6865_v33  ;;  %v834_v25 = vpop.f32.mrb[28].mxu1 }
 0x136   : > { %8768 = vst [vmem:[#allocation175_spill] sm:$0xff] %v6916_v38  ;;  %8769 = vst [vmem:[#allocation176_spill] sm:$0xff] %v6919_v18  ;;  %v763_v32 = vpop.f32.mrb[29].mxu0  ;;  %v6928_v9 = vadd.f32 %v3100_v47, %v6868_v28  ;;  %v6931_v1 = vadd.f32 %v3101_v37, %v6871_v58  ;;  %v836_v30 = vpop.f32.mrb[29].mxu1 }
 0x137   : > { %8770 = vst [vmem:[#allocation177_spill] sm:$0xff] %v6922_v42  ;;  %8771 = vst [vmem:[#allocation178_spill] sm:$0xff] %v6925_v17  ;;  %v5233_v50 = vpack.c.bf16 %v763_v32, %v761_v4  ;;  %v765_v19 = vpop.f32.mrb[30].mxu0  ;;  %v5234_v23 = vpack.c.bf16 %v836_v30, %v834_v25  ;;  %v838_v16 = vpop.f32.mrb[30].mxu1  ;;  %v1242_v30 = vunpack.c.h.bf16 %v6724_v48 }
 0x138   : > { %8772 = vst [vmem:[#allocation179_spill] sm:$0xff] %v6928_v9  ;;  %8773 = vst [vmem:[#allocation180_spill] sm:$0xff] %v6931_v1  ;;  %v767_v18 = vpop.f32.mrb[31].mxu0  ;;  %v840_v38 = vpop.f32.mrb[31].mxu1  ;;  %v8811_v1 = vld [vmem:[#allocation99_spill] sm:$0xff]  ;;  %v8812_v9 = vld [vmem:[#allocation100_spill] sm:$0xff] }
 0x139   : > { %v3341_v39 = vunpack.c.l.bf16 %v5233_v50  ;;  %v3342_v29 = vunpack.c.h.bf16 %v5233_v50  ;;  %v5237_v42 = vpack.c.bf16 %v767_v18, %v765_v19  ;;  %v3343_v27 = vunpack.c.l.bf16 %v5234_v23 }
 0x13a   : > { %v3344_v17 = vunpack.c.h.bf16 %v5234_v23  ;;  %v5238_v14 = vpack.c.bf16 %v840_v38, %v838_v16  ;;  %v1243_v19 = vunpack.c.l.bf16 %v6729_v5  ;;  %v1250_v16 = vadd.f32 %v1242_v30, %v6749_v26 }
 0x13b   : > { %v3584_v20 = vunpack.c.l.bf16 %v5237_v42  ;;  %v3585_v12 = vunpack.c.h.bf16 %v5237_v42  ;;  %v6934_v47 = vadd.f32 %v3341_v39, %v6862_v8  ;;  %v6937_v37 = vadd.f32 %v3342_v29, %v6865_v33 }
 0x13c   : > { %v3586_v4 = vunpack.c.l.bf16 %v5238_v14  ;;  %v3587_v32 = vunpack.c.h.bf16 %v5238_v14  ;;  %v6940_v25 = vadd.f32 %v3343_v27, %v6868_v28  ;;  %v6943_v50 = vadd.f32 %v3344_v17, %v6871_v58 }
 0x13d   : > { %8774 = vst [vmem:[#allocation181_spill] sm:$0xff] %v6934_v47  ;;  %8775 = vst [vmem:[#allocation182_spill] sm:$0xff] %v6937_v37  ;;  %v6946_v18 = vadd.f32 %v3584_v20, %v6862_v8  ;;  %v6949_v38 = vadd.f32 %v3585_v12, %v6865_v33  ;;  %v1241_v14 = vunpack.c.l.bf16 %v6724_v48  ;;  %v1244_v17 = vunpack.c.h.bf16 %v6729_v5 }
 0x13e   : > { %8776 = vst [vmem:[#allocation183_spill] sm:$0xff] %v6940_v25  ;;  %8777 = vst [vmem:[#allocation184_spill] sm:$0xff] %v6943_v50  ;;  %v6952_v39 = vadd.f32 %v3586_v4, %v6868_v28  ;;  %v6955_v42 = vadd.f32 %v3587_v32, %v6871_v58  ;;  %v1251_v12 = vadd.f32 %v1243_v19, %v6755_v2 }
 0x13f   : > { %8778 = vst [vmem:[#allocation185_spill] sm:$0xff] %v6946_v18  ;;  %8779 = vst [vmem:[#allocation186_spill] sm:$0xff] %v6949_v38  ;;  %v1249_v20 = vadd.f32 %v1241_v14, %v6744_v57  ;;  %v1252_v32 = vadd.f32 %v1244_v17, %v6760_v41  ;;  %v1245_v41 = vunpack.c.l.bf16 %v6853_v31  ;;  %v1246_v17 = vunpack.c.h.bf16 %v6853_v31 }
 0x140   : > { %8780 = vst [vmem:[#allocation187_spill] sm:$0xff] %v6952_v39  ;;  %8781 = vst [vmem:[#allocation188_spill] sm:$0xff] %v6955_v42 }
 0x15d   : > { %v1931_v23 = vpop.f32.mrb[32].mxu0  ;;  %v1972_v27 = vpop.f32.mrb[32].mxu1 }
 0x15e   : > { %v2061_v29 = vadd.f32 %v1931_v23, %v1249_v20  ;;  %v1933_v4 = vpop.f32.mrb[33].mxu0  ;;  %v2063_v42 = vadd.f32 %v1972_v27, %v1251_v12  ;;  %v1974_v39 = vpop.f32.mrb[33].mxu1  ;;  %v1254_v23 = vadd.f32 %v1246_v17, %v6865_v33 }
 0x15f   : > { %v2062_v38 = vadd.f32 %v1933_v4, %v1250_v16  ;;  %v1935_v48 = vpop.f32.mrb[34].mxu0  ;;  %v2064_v18 = vadd.f32 %v1974_v39, %v1252_v32  ;;  %v1976_v50 = vpop.f32.mrb[34].mxu1  ;;  %v1248_v39 = vunpack.c.h.bf16 %v6857_v24 }
 0x160   : > { %v1936_v37 = vpop.f32.mrb[35].mxu0  ;;  %v1977_v5 = vpop.f32.mrb[35].mxu1  ;;  %v5056_v25 = vmul.f32 -1.442695, %v2061_v29  ;;  %v5058_v57 = vmul.f32 -1.442695, %v2063_v42  ;;  %v1247_v50 = vunpack.c.l.bf16 %v6857_v24 }
 0x161   : > { %v5057_v14 = vmul.f32 -1.442695, %v2062_v38  ;;  %v5059_v47 = vmul.f32 -1.442695, %v2064_v18  ;;  %v1256_v29 = vadd.f32 %v1248_v39, %v6871_v58 }
 0x162   : > { %5442 = vpow2.f32 %v5056_v25  ;;  %v1253_v25 = vadd.f32 %v1245_v41, %v6862_v8  ;;  %v1255_v20 = vadd.f32 %v1247_v50, %v6868_v28 }
 0x163   : > { %5444 = vpow2.f32 %v5058_v57 }
 0x164   : > { %5446 = vpow2.f32 %v5057_v14 }
 0x165   : > { %5448 = vpow2.f32 %v5059_v47 }
 0x16c   : > { %v5443_v26 = vpop.eup %5442 }
 0x16d   : > { %v5445_v2 = vpop.eup %5444  ;;  %v2087_v37 = vadd.f32 1.0, %v5443_v26 }
 0x16e   : > { %v5447_v30 = vpop.eup %5446  ;;  %v2089_v42 = vadd.f32 1.0, %v5445_v2 }
 0x16f   : > { %v5449_v19 = vpop.eup %5448  ;;  %v2088_v38 = vadd.f32 1.0, %v5447_v30  ;;  %5450 = vrcp.f32 %v2087_v37 }
 0x170   : > { %v2090_v18 = vadd.f32 1.0, %v5449_v19  ;;  %5452 = vrcp.f32 %v2089_v42 }
 0x171   : > { %5454 = vrcp.f32 %v2088_v38 }
 0x172   : > { %5456 = vrcp.f32 %v2090_v18 }
 0x179   : > { %v5451_v33 = vpop.eup %5450 }
 0x17a   : > { %v5453_v26 = vpop.eup %5452 }
 0x17b   : > { %v5455_v2 = vpop.eup %5454  ;;  %v2107_v19 = vmul.f32 0.0, %v5453_v26  ;;  %v8791_v26 = vld [vmem:[#allocation79_spill] sm:$0xff] }
 0x17c   : > { %v5457_v58 = vpop.eup %5456 }
 0x17d   : > { %v2108_v18 = vmul.f32 0.0, %v5457_v58  ;;  %v8793_v58 = vld [vmem:[#allocation81_spill] sm:$0xff] }
 0x19d   : > { %v2013_v47 = vpop.f32.mrb[36].mxu0  ;;  %v2054_v16 = vpop.f32.mrb[36].mxu1 }
 0x19e   : > { %v2065_v12 = vadd.f32 %v2013_v47, %v1253_v25  ;;  %v2015_v31 = vpop.f32.mrb[37].mxu0  ;;  %v2067_v27 = vadd.f32 %v2054_v16, %v1255_v20  ;;  %v2056_v4 = vpop.f32.mrb[37].mxu1 }
 0x19f   : > { %v2066_v24 = vadd.f32 %v2015_v31, %v1254_v23  ;;  %v2017_v32 = vpop.f32.mrb[38].mxu0  ;;  %v2068_v8 = vadd.f32 %v2056_v4, %v1256_v29  ;;  %v2058_v5 = vpop.f32.mrb[38].mxu1  ;;  %v8782_v4 = vld [vmem:[#allocation70_spill] sm:$0xff] }
 0x1a0   : > { %v5060_v48 = vmul.f32 -1.442695, %v2065_v12  ;;  %v2018_v57 = vpop.f32.mrb[39].mxu0  ;;  %5458 = vtanh.f32 %v2067_v27  ;;  %v2059_v14 = vpop.f32.mrb[39].mxu1  ;;  %v8783_v32 = vld [vmem:[#allocation71_spill] sm:$0xff]  ;;  %v8786_v5 = vld [vmem:[#allocation74_spill] sm:$0xff] }
 0x1a1   : > { %v5061_v28 = vmul.f32 -1.442695, %v2066_v24  ;;  %v8787_v57 = vld [vmem:[#allocation75_spill] sm:$0xff]  ;;  %v8789_v14 = vld [vmem:[#allocation77_spill] sm:$0xff] }
 0x1a2   : > { %5460 = vpow2.f32 %v5060_v48  ;;  %v8784_v48 = vld [vmem:[#allocation72_spill] sm:$0xff] }
 0x1a3   : > { %5462 = vpow2.f32 %v5061_v28  ;;  %v8788_v28 = vld [vmem:[#allocation76_spill] sm:$0xff] }
 0x1a4   : > { %5464 = vtanh.f32 %v2068_v8  ;;  %v8785_v8 = vld [vmem:[#allocation73_spill] sm:$0xff] }
 0x1aa   : > { %v5459_v30 = vpop.eup %5458 }
 0x1ab   : > { %v2109_v17 = vmul.f32 %v5459_v30, %v5451_v33  ;;  %v8790_v33 = vld [vmem:[#allocation78_spill] sm:$0xff] }
 0x1ac   : > { %v5461_v41 = vpop.eup %5460  ;;  %v8794_v30 = vld [vmem:[#allocation82_spill] sm:$0xff] }
 0x1ad   : > { %v5463_v50 = vpop.eup %5462  ;;  %v2091_v37 = vadd.f32 1.0, %v5461_v41  ;;  %v6973_v42 = vadd.f32 %v2109_v17, %v2107_v19  ;;  %v8795_v41 = vld [vmem:[#allocation83_spill] sm:$0xff]  ;;  %v8796_v19 = vld [vmem:[#allocation84_spill] sm:$0xff]  ;;  %v8797_v17 = vld [vmem:[#allocation85_spill] sm:$0xff] }
 0x1ae   : > { %v5465_v39 = vpop.eup %5464  ;;  %v2092_v38 = vadd.f32 1.0, %v5463_v50  ;;  %v8798_v50 = vld [vmem:[#allocation86_spill] sm:$0xff] }
 0x1af   : > { %5466 = vrcp.f32 %v2091_v37  ;;  %v2110_v25 = vmul.f32 %v5465_v39, %v5455_v2  ;;  %v8792_v2 = vld [vmem:[#allocation80_spill] sm:$0xff]  ;;  %v8799_v37 = vld [vmem:[#allocation87_spill] sm:$0xff] }
 0x1b0   : > { %5468 = vtanh.f32 %v6973_v42  ;;  %v8800_v39 = vld [vmem:[#allocation88_spill] sm:$0xff] }
 0x1b1   : > { %5470 = vrcp.f32 %v2092_v38  ;;  %v6976_v47 = vadd.f32 %v2110_v25, %v2108_v18  ;;  %v8801_v38 = vld [vmem:[#allocation89_spill] sm:$0xff]  ;;  %v8802_v18 = vld [vmem:[#allocation90_spill] sm:$0xff]  ;;  %v8803_v25 = vld [vmem:[#allocation91_spill] sm:$0xff] }
 0x1b3   : > { %5472 = vtanh.f32 %v6976_v47 }
 0x1b9   : > { %v5467_v20 = vpop.eup %5466 }
 0x1ba   : > { %v5469_v23 = vpop.eup %5468 }
 0x1bb   : > { %v5471_v12 = vpop.eup %5470  ;;  %v2115_v31 = vmul.f32 %v5469_v23, %v5467_v20  ;;  %v8804_v20 = vld [vmem:[#allocation92_spill] sm:$0xff]  ;;  %v8805_v23 = vld [vmem:[#allocation93_spill] sm:$0xff] }
 0x1bd   : > { %v5473_v16 = vpop.eup %5472  ;;  %v6979_v24 = vpack.c.bf16 %v2115_v31, %v2115_v31  ;;  %v8808_v31 = vld [vmem:[#allocation96_spill] sm:$0xff] }
 0x1be   : > { %v2116_v29 = vmul.f32 %v5473_v16, %v5471_v12  ;;  %v8806_v12 = vld [vmem:[#allocation94_spill] sm:$0xff]  ;;  %v8807_v16 = vld [vmem:[#allocation95_spill] sm:$0xff] }
 0x1c0   : > { %v2139_v27 = vpack.c.bf16 %v2116_v29, %v2116_v29  ;;  %v8809_v29 = vld [vmem:[#allocation97_spill] sm:$0xff] }
 0x1c2   : > { %2172 = vmatprep.mubr.bf16.mxu0 %v2139_v27  ;;  %2213 = vmatprep.mubr.bf16.mxu1 %v2139_v27 }
 0x1c3   : > { %2173 = vmatmul.mubr.bf16.vlgmr.msra.gmra.mrb[40].mxu0 %v6979_v24  ;;  %2214 = vmatmul.mubr.bf16.vlgmr.msra.gmra.mrb[40].mxu1 %v6979_v24 }
 0x1c4   : > { %2223 = vmatpush1.bf16.msra.mxu0 %v8782_v4  ;;  %2264 = vmatpush1.bf16.msra.mxu1 %v8783_v32 }
 0x1c5   : > { %2254 = vmatprep.mubr.bf16.mxu0 %v2139_v27  ;;  %2295 = vmatprep.mubr.bf16.mxu1 %v2139_v27  ;;  %v8810_v27 = vld [vmem:[#allocation98_spill] sm:$0xff] }
 0x1c6   : > { %2224 = vmatprep.subr.bf16.mxu0 %v8784_v48  ;;  %2265 = vmatprep.subr.bf16.mxu1 %v8785_v8 }
 0x1c8   : > { %2225 = vmatpush1.bf16.msra.mxu0 %v8786_v5  ;;  %2266 = vmatpush1.bf16.msra.mxu1 %v8787_v57 }
 0x1c9   : > { %2226 = vmatprep.subr.bf16.mxu0 %v8788_v28  ;;  %2267 = vmatprep.subr.bf16.mxu1 %v8789_v14 }
 0x1cc   : > { %2227 = vmatpush1.bf16.msra.mxu0 %v8790_v33  ;;  %2268 = vmatpush1.bf16.msra.mxu1 %v8791_v26 }
 0x1cd   : > { %2228 = vmatprep.subr.bf16.mxu0 %v8792_v2  ;;  %2269 = vmatprep.subr.bf16.mxu1 %v8793_v58 }
 0x1d0   : > { %2229 = vmatpush1.bf16.msra.mxu0 %v8794_v30  ;;  %2270 = vmatpush1.bf16.msra.mxu1 %v8795_v41 }
 0x1d1   : > { %2230 = vmatprep.subr.bf16.mxu0 %v8796_v19  ;;  %2271 = vmatprep.subr.bf16.mxu1 %v8797_v17 }
 0x1d4   : > { %2231 = vmatpush1.bf16.msra.mxu0 %v8798_v50  ;;  %2272 = vmatpush1.bf16.msra.mxu1 %v8799_v37 }
 0x1d5   : > { %2232 = vmatprep.subr.bf16.mxu0 %v8800_v39  ;;  %2273 = vmatprep.subr.bf16.mxu1 %v8801_v38 }
 0x1d8   : > { %2233 = vmatpush1.bf16.msra.mxu0 %v8802_v18  ;;  %2274 = vmatpush1.bf16.msra.mxu1 %v8803_v25  ;;  %v8813_v18 = vld [vmem:[#allocation101_spill] sm:$0xff]  ;;  %v8814_v25 = vld [vmem:[#allocation102_spill] sm:$0xff] }
 0x1d9   : > { %2234 = vmatprep.subr.bf16.mxu0 %v8804_v20  ;;  %2275 = vmatprep.subr.bf16.mxu1 %v8805_v23  ;;  %v8815_v20 = vld [vmem:[#allocation103_spill] sm:$0xff]  ;;  %v8816_v23 = vld [vmem:[#allocation104_spill] sm:$0xff] }
 0x1dc   : > { %2235 = vmatpush1.bf16.msra.mxu0 %v8806_v12  ;;  %2276 = vmatpush1.bf16.msra.mxu1 %v8807_v16  ;;  %v8817_v12 = vld [vmem:[#allocation105_spill] sm:$0xff]  ;;  %v8818_v16 = vld [vmem:[#allocation106_spill] sm:$0xff] }
 0x1dd   : > { %2236 = vmatprep.subr.bf16.mxu0 %v8808_v31  ;;  %2277 = vmatprep.subr.bf16.mxu1 %v8809_v29  ;;  %v8819_v31 = vld [vmem:[#allocation107_spill] sm:$0xff]  ;;  %v8820_v29 = vld [vmem:[#allocation108_spill] sm:$0xff] }
 0x1e0   : > { %2237 = vmatpush1.bf16.msra.mxu0 %v8810_v27  ;;  %2278 = vmatpush1.bf16.msra.mxu1 %v8811_v1  ;;  %v8821_v27 = vld [vmem:[#allocation109_spill] sm:$0xff]  ;;  %v8822_v1 = vld [vmem:[#allocation110_spill] sm:$0xff] }
 0x1e1   : > { %2238 = vmatprep.subr.bf16.mxu0 %v8812_v9  ;;  %2279 = vmatprep.subr.bf16.mxu1 %v8813_v18  ;;  %v8823_v9 = vld [vmem:[#allocation111_spill] sm:$0xff]  ;;  %v8824_v18 = vld [vmem:[#allocation112_spill] sm:$0xff] }
 0x1e4   : > { %2239 = vmatpush1.bf16.msra.mxu0 %v8814_v25  ;;  %2280 = vmatpush1.bf16.msra.mxu1 %v8815_v20  ;;  %v8825_v25 = vld [vmem:[#allocation113_spill] sm:$0xff]  ;;  %v8826_v20 = vld [vmem:[#allocation114_spill] sm:$0xff] }
 0x1e5   : > { %2240 = vmatprep.subr.bf16.mxu0 %v8816_v23  ;;  %2281 = vmatprep.subr.bf16.mxu1 %v8817_v12  ;;  %v8827_v23 = vld [vmem:[#allocation115_spill] sm:$0xff]  ;;  %v8828_v12 = vld [vmem:[#allocation116_spill] sm:$0xff] }
 0x1e8   : > { %2241 = vmatpush1.bf16.msra.mxu0 %v8818_v16  ;;  %2282 = vmatpush1.bf16.msra.mxu1 %v8819_v31  ;;  %v8829_v16 = vld [vmem:[#allocation117_spill] sm:$0xff]  ;;  %v8830_v31 = vld [vmem:[#allocation118_spill] sm:$0xff] }
 0x1e9   : > { %2242 = vmatprep.subr.bf16.mxu0 %v8820_v29  ;;  %2283 = vmatprep.subr.bf16.mxu1 %v8821_v27  ;;  %v8831_v29 = vld [vmem:[#allocation119_spill] sm:$0xff]  ;;  %v8832_v27 = vld [vmem:[#allocation120_spill] sm:$0xff] }
 0x1ec   : > { %2243 = vmatpush1.bf16.msra.mxu0 %v8822_v1  ;;  %2284 = vmatpush1.bf16.msra.mxu1 %v8823_v9  ;;  %v8833_v1 = vld [vmem:[#allocation121_spill] sm:$0xff] }
 0x1ed   : > { %2244 = vmatprep.subr.bf16.mxu0 %v8824_v18  ;;  %2285 = vmatprep.subr.bf16.mxu1 %v8825_v25 }
 0x1f0   : > { %2245 = vmatpush1.bf16.msra.mxu0 %v8826_v20  ;;  %2286 = vmatpush1.bf16.msra.mxu1 %v8827_v23 }
 0x1f1   : > { %2246 = vmatprep.subr.bf16.mxu0 %v8828_v12  ;;  %2287 = vmatprep.subr.bf16.mxu1 %v8829_v16 }
 0x1f4   : > { %2247 = vmatpush1.bf16.msra.mxu0 %v8830_v31  ;;  %2288 = vmatpush1.bf16.msra.mxu1 %v8831_v29 }
 0x1f5   : > { %2248 = vmatprep.subr.bf16.mxu0 %v8832_v27  ;;  %2289 = vmatprep.subr.bf16.mxu1 %v8833_v1 }
 0x1f8   : > { %2249 = vmatpush1.bf16.msra.mxu0 %v6621_v40  ;;  %2290 = vmatpush1.bf16.msra.mxu1 %v6625_v63 }
 0x1f9   : > { %2250 = vmatprep.subr.bf16.mxu0 %v6627_v0  ;;  %2291 = vmatprep.subr.bf16.mxu1 %v6630_v22 }
 0x1fc   : > { %2251 = vmatpush1.bf16.msra.mxu0 %v6645_v21  ;;  %2292 = vmatpush1.bf16.msra.mxu1 %v6649_v55 }
 0x1fd   : > { %2252 = vmatprep.subr.bf16.mxu0 %v6651_v56  ;;  %2293 = vmatprep.subr.bf16.mxu1 %v6654_v13 }
 0x200   : > { %2253 = vmatpush1.bf16.msra.mxu0 %v6657_v49  ;;  %2294 = vmatpush1.bf16.msra.mxu1 %v6661_v36 }
 0x201   : > { %2383 = vmatprep.subr.bf16.mxu0 %v5862_v34  ;;  %2424 = vmatprep.subr.bf16.mxu1 %v5865_v35 }
 0x203   : > { %2255 = vmatmul.mubr.bf16.vlgmr.msra.gmra.mrb[44].mxu0 %v6979_v24  ;;  %2296 = vmatmul.mubr.bf16.vlgmr.msra.gmra.mrb[44].mxu1 %v6979_v24  ;;  %v8834_v24 = vld [vmem:[#allocation24_spill] sm:$0xff] }
 0x204   : > { %2384 = vmatpush1.bf16.msra.mxu0 %v5904_v43  ;;  %2425 = vmatpush1.bf16.msra.mxu1 %v5906_v44 }
 0x205   : > { %2385 = vmatprep.subr.bf16.mxu0 %v5908_v45  ;;  %2426 = vmatprep.subr.bf16.mxu1 %v5910_v46  ;;  %v8883_v46 = vld [vmem:[#allocation136_spill] sm:$0xff] }
 0x208   : > { %2386 = vmatpush1.bf16.msra.mxu0 %v5927_v51  ;;  %2427 = vmatpush1.bf16.msra.mxu1 %v5931_v52  ;;  %v8882_v51 = vld [vmem:[#allocation134_spill] sm:$0xff] }
 0x209   : > { %2387 = vmatprep.subr.bf16.mxu0 %v5933_v53  ;;  %2428 = vmatprep.subr.bf16.mxu1 %v5936_v54  ;;  %v8880_v54 = vld [vmem:[#allocation133_spill] sm:$0xff]  ;;  %v8881_v53 = vld [vmem:[#allocation135_spill] sm:$0xff] }
 0x20c   : > { %2388 = vmatpush1.bf16.msra.mxu0 %v5953_v59  ;;  %2429 = vmatpush1.bf16.msra.mxu1 %v5957_v60  ;;  %v8835_v59 = vld [vmem:[#allocation25_spill] sm:$0xff]  ;;  %v8836_v60 = vld [vmem:[#allocation26_spill] sm:$0xff] }
 0x20d   : > { %2389 = vmatprep.subr.bf16.mxu0 %v5959_v61  ;;  %2430 = vmatprep.subr.bf16.mxu1 %v5962_v62  ;;  %v8837_v61 = vld [vmem:[#allocation27_spill] sm:$0xff]  ;;  %v8838_v62 = vld [vmem:[#allocation28_spill] sm:$0xff] }
 0x210   : > { %2390 = vmatpush1.bf16.msra.mxu0 %v5978_v3  ;;  %2431 = vmatpush1.bf16.msra.mxu1 %v5989_v6  ;;  %v8839_v3 = vld [vmem:[#allocation29_spill] sm:$0xff]  ;;  %v8840_v6 = vld [vmem:[#allocation30_spill] sm:$0xff] }
 0x211   : > { %2391 = vmatprep.subr.bf16.mxu0 %v5991_v7  ;;  %2432 = vmatprep.subr.bf16.mxu1 %v6000_v10  ;;  %v8841_v7 = vld [vmem:[#allocation31_spill] sm:$0xff]  ;;  %v8842_v10 = vld [vmem:[#allocation32_spill] sm:$0xff] }
 0x214   : > { %2392 = vmatpush1.bf16.msra.mxu0 %v6005_v11  ;;  %2433 = vmatpush1.bf16.msra.mxu1 %v6015_v15  ;;  %v8843_v11 = vld [vmem:[#allocation33_spill] sm:$0xff]  ;;  %v8844_v15 = vld [vmem:[#allocation34_spill] sm:$0xff] }
 0x215   : > { %2393 = vmatprep.subr.bf16.mxu0 %v8834_v24  ;;  %2434 = vmatprep.subr.bf16.mxu1 %v8835_v59  ;;  %v8845_v24 = vld [vmem:[#allocation35_spill] sm:$0xff]  ;;  %v8846_v59 = vld [vmem:[#allocation36_spill] sm:$0xff] }
 0x218   : > { %2394 = vmatpush1.bf16.msra.mxu0 %v8836_v60  ;;  %2435 = vmatpush1.bf16.msra.mxu1 %v8837_v61  ;;  %v8847_v60 = vld [vmem:[#allocation37_spill] sm:$0xff]  ;;  %v8848_v61 = vld [vmem:[#allocation38_spill] sm:$0xff] }
 0x219   : > { %2395 = vmatprep.subr.bf16.mxu0 %v8838_v62  ;;  %2436 = vmatprep.subr.bf16.mxu1 %v8839_v3  ;;  %v8849_v62 = vld [vmem:[#allocation39_spill] sm:$0xff]  ;;  %v8850_v3 = vld [vmem:[#allocation40_spill] sm:$0xff] }
 0x21c   : > { %2396 = vmatpush1.bf16.msra.mxu0 %v8840_v6  ;;  %2437 = vmatpush1.bf16.msra.mxu1 %v8841_v7  ;;  %v8851_v6 = vld [vmem:[#allocation41_spill] sm:$0xff]  ;;  %v8852_v7 = vld [vmem:[#allocation42_spill] sm:$0xff] }
 0x21d   : > { %2397 = vmatprep.subr.bf16.mxu0 %v8842_v10  ;;  %2438 = vmatprep.subr.bf16.mxu1 %v8843_v11  ;;  %v8853_v10 = vld [vmem:[#allocation43_spill] sm:$0xff]  ;;  %v8854_v11 = vld [vmem:[#allocation44_spill] sm:$0xff] }
 0x220   : > { %2398 = vmatpush1.bf16.msra.mxu0 %v8844_v15  ;;  %2439 = vmatpush1.bf16.msra.mxu1 %v8845_v24  ;;  %v8855_v15 = vld [vmem:[#allocation45_spill] sm:$0xff]  ;;  %v8856_v24 = vld [vmem:[#allocation46_spill] sm:$0xff] }
 0x221   : > { %2399 = vmatprep.subr.bf16.mxu0 %v8846_v59  ;;  %2440 = vmatprep.subr.bf16.mxu1 %v8847_v60  ;;  %v8857_v59 = vld [vmem:[#allocation47_spill] sm:$0xff]  ;;  %v8858_v60 = vld [vmem:[#allocation48_spill] sm:$0xff] }
 0x224   : > { %2400 = vmatpush1.bf16.msra.mxu0 %v8848_v61  ;;  %2441 = vmatpush1.bf16.msra.mxu1 %v8849_v62  ;;  %v8859_v61 = vld [vmem:[#allocation49_spill] sm:$0xff]  ;;  %v8860_v62 = vld [vmem:[#allocation50_spill] sm:$0xff] }
 0x225   : > { %2401 = vmatprep.subr.bf16.mxu0 %v8850_v3  ;;  %2442 = vmatprep.subr.bf16.mxu1 %v8851_v6  ;;  %v8861_v3 = vld [vmem:[#allocation51_spill] sm:$0xff]  ;;  %v8862_v6 = vld [vmem:[#allocation52_spill] sm:$0xff] }
 0x228   : > { %2402 = vmatpush1.bf16.msra.mxu0 %v8852_v7  ;;  %2443 = vmatpush1.bf16.msra.mxu1 %v8853_v10  ;;  %v8863_v7 = vld [vmem:[#allocation53_spill] sm:$0xff]  ;;  %v8864_v10 = vld [vmem:[#allocation54_spill] sm:$0xff] }
 0x229   : > { %2403 = vmatprep.subr.bf16.mxu0 %v8854_v11  ;;  %2444 = vmatprep.subr.bf16.mxu1 %v8855_v15  ;;  %v8865_v11 = vld [vmem:[#allocation55_spill] sm:$0xff]  ;;  %v8866_v15 = vld [vmem:[#allocation56_spill] sm:$0xff] }
 0x22c   : > { %2404 = vmatpush1.bf16.msra.mxu0 %v8856_v24  ;;  %2445 = vmatpush1.bf16.msra.mxu1 %v8857_v59  ;;  %v8867_v24 = vld [vmem:[#allocation57_spill] sm:$0xff]  ;;  %v8868_v59 = vld [vmem:[#allocation58_spill] sm:$0xff] }
 0x22d   : > { %2405 = vmatprep.subr.bf16.mxu0 %v8858_v60  ;;  %2446 = vmatprep.subr.bf16.mxu1 %v8859_v61  ;;  %v8869_v60 = vld [vmem:[#allocation59_spill] sm:$0xff]  ;;  %v8870_v61 = vld [vmem:[#allocation60_spill] sm:$0xff] }
 0x230   : > { %2406 = vmatpush1.bf16.msra.mxu0 %v8860_v62  ;;  %2447 = vmatpush1.bf16.msra.mxu1 %v8861_v3  ;;  %v8871_v62 = vld [vmem:[#allocation61_spill] sm:$0xff]  ;;  %v8872_v3 = vld [vmem:[#allocation62_spill] sm:$0xff] }
 0x231   : > { %2407 = vmatprep.subr.bf16.mxu0 %v8862_v6  ;;  %2448 = vmatprep.subr.bf16.mxu1 %v8863_v7  ;;  %v8873_v6 = vld [vmem:[#allocation63_spill] sm:$0xff]  ;;  %v8874_v7 = vld [vmem:[#allocation64_spill] sm:$0xff] }
 0x234   : > { %2408 = vmatpush1.bf16.msra.mxu0 %v8864_v10  ;;  %2449 = vmatpush1.bf16.msra.mxu1 %v8865_v11  ;;  %v8875_v10 = vld [vmem:[#allocation65_spill] sm:$0xff]  ;;  %v8876_v11 = vld [vmem:[#allocation66_spill] sm:$0xff] }
 0x235   : > { %2409 = vmatprep.subr.bf16.mxu0 %v8866_v15  ;;  %2450 = vmatprep.subr.bf16.mxu1 %v8867_v24  ;;  %v8877_v15 = vld [vmem:[#allocation67_spill] sm:$0xff]  ;;  %v8878_v24 = vld [vmem:[#allocation68_spill] sm:$0xff] }
 0x238   : > { %2410 = vmatpush1.bf16.msra.mxu0 %v8868_v59  ;;  %2451 = vmatpush1.bf16.msra.mxu1 %v8869_v60  ;;  %v8879_v59 = vld [vmem:[#allocation69_spill] sm:$0xff] }
 0x239   : > { %2411 = vmatprep.subr.bf16.mxu0 %v8870_v61  ;;  %2452 = vmatprep.subr.bf16.mxu1 %v8871_v62 }
 0x23c   : > { %2412 = vmatpush1.bf16.msra.mxu0 %v8872_v3  ;;  %2453 = vmatpush1.bf16.msra.mxu1 %v8873_v6 }
 0x23d   : > { %2413 = vmatprep.subr.bf16.mxu0 %v8874_v7  ;;  %2454 = vmatprep.subr.bf16.mxu1 %v8875_v10 }
 0x240   : > { %2414 = vmatpush1.bf16.msra.mxu0 %v8876_v11  ;;  %2455 = vmatpush1.bf16.msra.mxu1 %v8877_v15 }
 0x241   : > { %2465 = vmatprep.subr.bf16.mxu0 %v8878_v24  ;;  %2506 = vmatprep.subr.bf16.mxu1 %v8879_v59 }
 0x296   : > { %v2174_v60 = vpop.f32.mrb[40].mxu0  ;;  %v2215_v61 = vpop.f32.mrb[40].mxu1 }
 0x297   : > { %v2304_v62 = vadd.f32 %v2174_v60, %v8880_v54  ;;  %v2306_v3 = vadd.f32 %v2215_v61, %v8881_v53  ;;  %v2176_v52 = vpop.f32.mrb[41].mxu0  ;;  %v2217_v6 = vpop.f32.mrb[41].mxu1 }
 0x298   : > { %v2305_v7 = vadd.f32 %v2176_v52, %v8882_v51  ;;  %v2307_v10 = vadd.f32 %v2217_v6, %v8883_v46  ;;  %v2178_v45 = vpop.f32.mrb[42].mxu0  ;;  %v2219_v11 = vpop.f32.mrb[42].mxu1  ;;  %v8885_v6 = vld [vmem:[#allocation163_spill] sm:$0xff] }
 0x299   : > { %v2179_v44 = vpop.f32.mrb[43].mxu0  ;;  %v2220_v15 = vpop.f32.mrb[43].mxu1  ;;  %v5062_v43 = vmul.f32 -1.442695, %v2304_v62  ;;  %v5064_v24 = vmul.f32 -1.442695, %v2306_v3 }
 0x29a   : > { %v5063_v35 = vmul.f32 -1.442695, %v2305_v7  ;;  %v5065_v59 = vmul.f32 -1.442695, %v2307_v10  ;;  %v8884_v62 = vld [vmem:[#allocation161_spill] sm:$0xff]  ;;  %v8887_v11 = vld [vmem:[#allocation164_spill] sm:$0xff] }
 0x29b   : > { %5474 = vpow2.f32 %v5062_v43 }
 0x29c   : > { %5476 = vpow2.f32 %v5064_v24 }
 0x29d   : > { %5478 = vpow2.f32 %v5063_v35 }
 0x29e   : > { %5480 = vpow2.f32 %v5065_v59  ;;  %v8886_v59 = vld [vmem:[#allocation162_spill] sm:$0xff] }
 0x2a5   : > { %v5475_v54 = vpop.eup %5474 }
 0x2a6   : > { %v5477_v53 = vpop.eup %5476  ;;  %v2330_v34 = vadd.f32 1.0, %v5475_v54 }
 0x2a7   : > { %v5479_v60 = vpop.eup %5478  ;;  %v2332_v51 = vadd.f32 1.0, %v5477_v53 }
 0x2a8   : > { %v5481_v61 = vpop.eup %5480  ;;  %v2331_v52 = vadd.f32 1.0, %v5479_v60  ;;  %5482 = vrcp.f32 %v2330_v34 }
 0x2a9   : > { %v2333_v46 = vadd.f32 1.0, %v5481_v61  ;;  %5484 = vrcp.f32 %v2332_v51 }
 0x2aa   : > { %5486 = vrcp.f32 %v2331_v52 }
 0x2ab   : > { %5488 = vrcp.f32 %v2333_v46 }
 0x2b2   : > { %v5483_v51 = vpop.eup %5482 }
 0x2b3   : > { %v5485_v52 = vpop.eup %5484 }
 0x2d6   : > { %v2256_v44 = vpop.f32.mrb[44].mxu0  ;;  %v2297_v45 = vpop.f32.mrb[44].mxu1 }
 0x2d7   : > { %v2308_v3 = vadd.f32 %v2256_v44, %v8884_v62  ;;  %v2310_v43 = vadd.f32 %v2297_v45, %v8885_v6  ;;  %v2258_v7 = vpop.f32.mrb[45].mxu0  ;;  %v2299_v35 = vpop.f32.mrb[45].mxu1  ;;  %v2350_v6 = vmul.f32 %v5485_v52, %v6973_v42  ;;  %v8888_v52 = vld [vmem:[#allocation90_spill] sm:$0xff] }
 0x2d8   : > { %v2309_v10 = vadd.f32 %v2258_v7, %v8886_v59  ;;  %v2311_v15 = vadd.f32 %v2299_v35, %v8887_v11  ;;  %v2260_v24 = vpop.f32.mrb[46].mxu0  ;;  %v2301_v54 = vpop.f32.mrb[46].mxu1 }
 0x2d9   : > { %v5066_v53 = vmul.f32 -1.442695, %v2308_v3  ;;  %5490 = vtanh.f32 %v2310_v43  ;;  %v2261_v34 = vpop.f32.mrb[47].mxu0  ;;  %v2302_v60 = vpop.f32.mrb[47].mxu1 }
 0x2da   : > { %v5067_v61 = vmul.f32 -1.442695, %v2309_v10  ;;  %5492 = vtanh.f32 %v2311_v15  ;;  %v5487_v44 = vpop.eup %5486 }
 0x2db   : > { %5494 = vpow2.f32 %v5066_v53  ;;  %v5489_v45 = vpop.eup %5488 }
 0x2dc   : > { %5496 = vpow2.f32 %v5067_v61  ;;  %v2351_v59 = vmul.f32 %v5489_v45, %v6976_v47  ;;  %v8890_v45 = vld [vmem:[#allocation92_spill] sm:$0xff] }
 0x2e3   : > { %v5491_v62 = vpop.eup %5490 }
 0x2e4   : > { %v5493_v46 = vpop.eup %5492  ;;  %v2352_v7 = vmul.f32 %v5491_v62, %v5483_v51  ;;  %v8891_v62 = vld [vmem:[#allocation93_spill] sm:$0xff] }
 0x2e5   : > { %v5495_v35 = vpop.eup %5494  ;;  %v2353_v3 = vmul.f32 %v5493_v46, %v5487_v44  ;;  %v8889_v44 = vld [vmem:[#allocation91_spill] sm:$0xff]  ;;  %v8892_v46 = vld [vmem:[#allocation94_spill] sm:$0xff] }
 0x2e6   : > { %v5497_v43 = vpop.eup %5496  ;;  %v2334_v11 = vadd.f32 1.0, %v5495_v35  ;;  %v7123_v24 = vadd.f32 %v2352_v7, %v2350_v6  ;;  %v8893_v6 = vld [vmem:[#allocation95_spill] sm:$0xff]  ;;  %v8894_v7 = vld [vmem:[#allocation96_spill] sm:$0xff]  ;;  %v8895_v35 = vld [vmem:[#allocation97_spill] sm:$0xff] }
 0x2e7   : > { %v2335_v10 = vadd.f32 1.0, %v5497_v43  ;;  %v7125_v15 = vadd.f32 %v2353_v3, %v2351_v59  ;;  %v8896_v59 = vld [vmem:[#allocation98_spill] sm:$0xff]  ;;  %v8897_v3 = vld [vmem:[#allocation99_spill] sm:$0xff]  ;;  %v8898_v43 = vld [vmem:[#allocation100_spill] sm:$0xff] }
 0x2e8   : > { %5498 = vrcp.f32 %v2334_v11  ;;  %v8899_v11 = vld [vmem:[#allocation101_spill] sm:$0xff] }
 0x2e9   : > { %5500 = vtanh.f32 %v7123_v24 }
 0x2ea   : > { %5502 = vrcp.f32 %v2335_v10  ;;  %v8900_v10 = vld [vmem:[#allocation102_spill] sm:$0xff] }
 0x2eb   : > { %5504 = vtanh.f32 %v7125_v15 }
 0x2f2   : > { %v5499_v54 = vpop.eup %5498 }
 0x2f3   : > { %v5501_v42 = vpop.eup %5500 }
 0x2f4   : > { %v5503_v53 = vpop.eup %5502  ;;  %v2358_v60 = vmul.f32 %v5501_v42, %v5499_v54  ;;  %v8901_v54 = vld [vmem:[#allocation103_spill] sm:$0xff]  ;;  %v8902_v42 = vld [vmem:[#allocation104_spill] sm:$0xff] }
 0x2f5   : > { %v5505_v34 = vpop.eup %5504 }
 0x2f6   : > { %v2359_v47 = vmul.f32 %v5505_v34, %v5503_v53  ;;  %v7129_v51 = vpack.c.bf16 %v2358_v60, %v2358_v60  ;;  %v8903_v53 = vld [vmem:[#allocation105_spill] sm:$0xff]  ;;  %v8904_v34 = vld [vmem:[#allocation106_spill] sm:$0xff]  ;;  %v8905_v60 = vld [vmem:[#allocation107_spill] sm:$0xff] }
 0x2f8   : > { %v2382_v61 = vpack.c.bf16 %v2359_v47, %v2359_v47  ;;  %v8906_v47 = vld [vmem:[#allocation108_spill] sm:$0xff] }
 0x2fa   : > { %2415 = vmatprep.mubr.bf16.mxu0 %v2382_v61  ;;  %2456 = vmatprep.mubr.bf16.mxu1 %v2382_v61 }
 0x2fb   : > { %2416 = vmatmul.mubr.bf16.vlgmr.msra.gmra.mrb[48].mxu0 %v7129_v51  ;;  %2457 = vmatmul.mubr.bf16.vlgmr.msra.gmra.mrb[48].mxu1 %v7129_v51 }
 0x2fc   : > { %2466 = vmatpush1.bf16.msra.mxu0 %v8782_v4  ;;  %2507 = vmatpush1.bf16.msra.mxu1 %v8783_v32 }
 0x2fd   : > { %2497 = vmatprep.mubr.bf16.mxu0 %v2382_v61  ;;  %2538 = vmatprep.mubr.bf16.mxu1 %v2382_v61  ;;  %v8907_v61 = vld [vmem:[#allocation109_spill] sm:$0xff] }
 0x2fe   : > { %2467 = vmatprep.subr.bf16.mxu0 %v8784_v48  ;;  %2508 = vmatprep.subr.bf16.mxu1 %v8785_v8 }
 0x300   : > { %2468 = vmatpush1.bf16.msra.mxu0 %v8786_v5  ;;  %2509 = vmatpush1.bf16.msra.mxu1 %v8787_v57 }
 0x301   : > { %2469 = vmatprep.subr.bf16.mxu0 %v8788_v28  ;;  %2510 = vmatprep.subr.bf16.mxu1 %v8789_v14 }
 0x304   : > { %2470 = vmatpush1.bf16.msra.mxu0 %v8790_v33  ;;  %2511 = vmatpush1.bf16.msra.mxu1 %v8791_v26 }
 0x305   : > { %2471 = vmatprep.subr.bf16.mxu0 %v8792_v2  ;;  %2512 = vmatprep.subr.bf16.mxu1 %v8793_v58 }
 0x308   : > { %2472 = vmatpush1.bf16.msra.mxu0 %v8794_v30  ;;  %2513 = vmatpush1.bf16.msra.mxu1 %v8795_v41 }
 0x309   : > { %2473 = vmatprep.subr.bf16.mxu0 %v8796_v19  ;;  %2514 = vmatprep.subr.bf16.mxu1 %v8797_v17 }
 0x30c   : > { %2474 = vmatpush1.bf16.msra.mxu0 %v8798_v50  ;;  %2515 = vmatpush1.bf16.msra.mxu1 %v8799_v37 }
 0x30d   : > { %2475 = vmatprep.subr.bf16.mxu0 %v8800_v39  ;;  %2516 = vmatprep.subr.bf16.mxu1 %v8801_v38 }
 0x310   : > { %2476 = vmatpush1.bf16.msra.mxu0 %v8888_v52  ;;  %2517 = vmatpush1.bf16.msra.mxu1 %v8889_v44 }
 0x311   : > { %2477 = vmatprep.subr.bf16.mxu0 %v8890_v45  ;;  %2518 = vmatprep.subr.bf16.mxu1 %v8891_v62 }
 0x314   : > { %2478 = vmatpush1.bf16.msra.mxu0 %v8892_v46  ;;  %2519 = vmatpush1.bf16.msra.mxu1 %v8893_v6 }
 0x315   : > { %2479 = vmatprep.subr.bf16.mxu0 %v8894_v7  ;;  %2520 = vmatprep.subr.bf16.mxu1 %v8895_v35 }
 0x318   : > { %2480 = vmatpush1.bf16.msra.mxu0 %v8896_v59  ;;  %2521 = vmatpush1.bf16.msra.mxu1 %v8897_v3  ;;  %v8908_v3 = vld [vmem:[#allocation110_spill] sm:$0xff] }
 0x319   : > { %2481 = vmatprep.subr.bf16.mxu0 %v8898_v43  ;;  %2522 = vmatprep.subr.bf16.mxu1 %v8899_v11 }
 0x31c   : > { %2482 = vmatpush1.bf16.msra.mxu0 %v8900_v10  ;;  %2523 = vmatpush1.bf16.msra.mxu1 %v8901_v54 }
 0x31d   : > { %2483 = vmatprep.subr.bf16.mxu0 %v8902_v42  ;;  %2524 = vmatprep.subr.bf16.mxu1 %v8903_v53 }
 0x320   : > { %2484 = vmatpush1.bf16.msra.mxu0 %v8904_v34  ;;  %2525 = vmatpush1.bf16.msra.mxu1 %v8905_v60 }
 0x321   : > { %2485 = vmatprep.subr.bf16.mxu0 %v8906_v47  ;;  %2526 = vmatprep.subr.bf16.mxu1 %v8907_v61 }
 0x324   : > { %2486 = vmatpush1.bf16.msra.mxu0 %v8908_v3  ;;  %2527 = vmatpush1.bf16.msra.mxu1 %v8823_v9 }
 0x325   : > { %2487 = vmatprep.subr.bf16.mxu0 %v8824_v18  ;;  %2528 = vmatprep.subr.bf16.mxu1 %v8825_v25 }
 0x328   : > { %2488 = vmatpush1.bf16.msra.mxu0 %v8826_v20  ;;  %2529 = vmatpush1.bf16.msra.mxu1 %v8827_v23 }
 0x329   : > { %2489 = vmatprep.subr.bf16.mxu0 %v8828_v12  ;;  %2530 = vmatprep.subr.bf16.mxu1 %v8829_v16  ;;  %v8978_v16 = vld [vmem:[#allocation140_spill] sm:$0xff] }
 0x32c   : > { %2490 = vmatpush1.bf16.msra.mxu0 %v8830_v31  ;;  %2531 = vmatpush1.bf16.msra.mxu1 %v8831_v29  ;;  %v8977_v31 = vld [vmem:[#allocation138_spill] sm:$0xff] }
 0x32d   : > { %2491 = vmatprep.subr.bf16.mxu0 %v8832_v27  ;;  %2532 = vmatprep.subr.bf16.mxu1 %v8833_v1  ;;  %v8909_v1 = vld [vmem:[#allocation4_spill] sm:$0xff]  ;;  %v8976_v27 = vld [vmem:[#allocation139_spill] sm:$0xff] }
 0x330   : > { %2492 = vmatpush1.bf16.msra.mxu0 %v6621_v40  ;;  %2533 = vmatpush1.bf16.msra.mxu1 %v6625_v63  ;;  %v8910_v40 = vld [vmem:[#allocation5_spill] sm:$0xff] }
 0x331   : > { %2493 = vmatprep.subr.bf16.mxu0 %v6627_v0  ;;  %2534 = vmatprep.subr.bf16.mxu1 %v6630_v22  ;;  %v8911_v22 = vld [vmem:[#allocation6_spill] sm:$0xff]  ;;  %v8920_v0 = vld [vmem:[#allocation15_spill] sm:$0xff]  ;;  %v8975_v63 = vld [vmem:[#allocation137_spill] sm:$0xff] }
 0x334   : > { %2494 = vmatpush1.bf16.msra.mxu0 %v6645_v21  ;;  %2535 = vmatpush1.bf16.msra.mxu1 %v6649_v55  ;;  %v8912_v21 = vld [vmem:[#allocation7_spill] sm:$0xff]  ;;  %v8913_v55 = vld [vmem:[#allocation8_spill] sm:$0xff] }
 0x335   : > { %2495 = vmatprep.subr.bf16.mxu0 %v6651_v56  ;;  %2536 = vmatprep.subr.bf16.mxu1 %v6654_v13  ;;  %v8914_v56 = vld [vmem:[#allocation9_spill] sm:$0xff]  ;;  %v8915_v13 = vld [vmem:[#allocation10_spill] sm:$0xff] }
 0x338   : > { %2496 = vmatpush1.bf16.msra.mxu0 %v6657_v49  ;;  %2537 = vmatpush1.bf16.msra.mxu1 %v6661_v36  ;;  %v8916_v49 = vld [vmem:[#allocation11_spill] sm:$0xff]  ;;  %v8917_v36 = vld [vmem:[#allocation12_spill] sm:$0xff] }
 0x339   : > { %2626 = vmatprep.subr.bf16.mxu0 %v8909_v1  ;;  %2667 = vmatprep.subr.bf16.mxu1 %v8910_v40  ;;  %v8918_v1 = vld [vmem:[#allocation13_spill] sm:$0xff]  ;;  %v8919_v40 = vld [vmem:[#allocation14_spill] sm:$0xff] }
 0x33b   : > { %2498 = vmatmul.mubr.bf16.vlgmr.msra.gmra.mrb[52].mxu0 %v7129_v51  ;;  %2539 = vmatmul.mubr.bf16.vlgmr.msra.gmra.mrb[52].mxu1 %v7129_v51  ;;  %v8921_v51 = vld [vmem:[#allocation16_spill] sm:$0xff] }
 0x33c   : > { %2627 = vmatpush1.bf16.msra.mxu0 %v8911_v22  ;;  %2668 = vmatpush1.bf16.msra.mxu1 %v8912_v21  ;;  %v8922_v22 = vld [vmem:[#allocation17_spill] sm:$0xff]  ;;  %v8923_v21 = vld [vmem:[#allocation18_spill] sm:$0xff] }
 0x33d   : > { %2628 = vmatprep.subr.bf16.mxu0 %v8913_v55  ;;  %2669 = vmatprep.subr.bf16.mxu1 %v8914_v56  ;;  %v8924_v55 = vld [vmem:[#allocation19_spill] sm:$0xff]  ;;  %v8925_v56 = vld [vmem:[#allocation20_spill] sm:$0xff] }
 0x340   : > { %2629 = vmatpush1.bf16.msra.mxu0 %v8915_v13  ;;  %2670 = vmatpush1.bf16.msra.mxu1 %v8916_v49  ;;  %v8926_v13 = vld [vmem:[#allocation21_spill] sm:$0xff]  ;;  %v8927_v49 = vld [vmem:[#allocation22_spill] sm:$0xff] }
 0x341   : > { %2630 = vmatprep.subr.bf16.mxu0 %v8917_v36  ;;  %2671 = vmatprep.subr.bf16.mxu1 %v8918_v1  ;;  %v8928_v36 = vld [vmem:[#allocation23_spill] sm:$0xff]  ;;  %v8929_v1 = vld [vmem:[#allocation24_spill] sm:$0xff] }
 0x344   : > { %2631 = vmatpush1.bf16.msra.mxu0 %v8919_v40  ;;  %2672 = vmatpush1.bf16.msra.mxu1 %v8920_v0  ;;  %v8930_v40 = vld [vmem:[#allocation25_spill] sm:$0xff]  ;;  %v8931_v0 = vld [vmem:[#allocation26_spill] sm:$0xff] }
 0x345   : > { %2632 = vmatprep.subr.bf16.mxu0 %v8921_v51  ;;  %2673 = vmatprep.subr.bf16.mxu1 %v8922_v22  ;;  %v8932_v51 = vld [vmem:[#allocation27_spill] sm:$0xff]  ;;  %v8933_v22 = vld [vmem:[#allocation28_spill] sm:$0xff] }
 0x348   : > { %2633 = vmatpush1.bf16.msra.mxu0 %v8923_v21  ;;  %2674 = vmatpush1.bf16.msra.mxu1 %v8924_v55  ;;  %v8934_v21 = vld [vmem:[#allocation29_spill] sm:$0xff]  ;;  %v8935_v55 = vld [vmem:[#allocation30_spill] sm:$0xff] }
 0x349   : > { %2634 = vmatprep.subr.bf16.mxu0 %v8925_v56  ;;  %2675 = vmatprep.subr.bf16.mxu1 %v8926_v13  ;;  %v8936_v56 = vld [vmem:[#allocation31_spill] sm:$0xff]  ;;  %v8937_v13 = vld [vmem:[#allocation32_spill] sm:$0xff] }
 0x34c   : > { %2635 = vmatpush1.bf16.msra.mxu0 %v8927_v49  ;;  %2676 = vmatpush1.bf16.msra.mxu1 %v8928_v36  ;;  %v8938_v49 = vld [vmem:[#allocation33_spill] sm:$0xff]  ;;  %v8939_v36 = vld [vmem:[#allocation34_spill] sm:$0xff] }
 0x34d   : > { %2636 = vmatprep.subr.bf16.mxu0 %v8929_v1  ;;  %2677 = vmatprep.subr.bf16.mxu1 %v8930_v40  ;;  %v8940_v1 = vld [vmem:[#allocation35_spill] sm:$0xff]  ;;  %v8941_v40 = vld [vmem:[#allocation36_spill] sm:$0xff] }
 0x350   : > { %2637 = vmatpush1.bf16.msra.mxu0 %v8931_v0  ;;  %2678 = vmatpush1.bf16.msra.mxu1 %v8932_v51  ;;  %v8942_v0 = vld [vmem:[#allocation37_spill] sm:$0xff]  ;;  %v8943_v51 = vld [vmem:[#allocation38_spill] sm:$0xff] }
 0x351   : > { %2638 = vmatprep.subr.bf16.mxu0 %v8933_v22  ;;  %2679 = vmatprep.subr.bf16.mxu1 %v8934_v21  ;;  %v8944_v22 = vld [vmem:[#allocation39_spill] sm:$0xff]  ;;  %v8945_v21 = vld [vmem:[#allocation40_spill] sm:$0xff] }
 0x354   : > { %2639 = vmatpush1.bf16.msra.mxu0 %v8935_v55  ;;  %2680 = vmatpush1.bf16.msra.mxu1 %v8936_v56  ;;  %v8946_v55 = vld [vmem:[#allocation41_spill] sm:$0xff]  ;;  %v8947_v56 = vld [vmem:[#allocation42_spill] sm:$0xff] }
 0x355   : > { %2640 = vmatprep.subr.bf16.mxu0 %v8937_v13  ;;  %2681 = vmatprep.subr.bf16.mxu1 %v8938_v49  ;;  %v8948_v13 = vld [vmem:[#allocation43_spill] sm:$0xff]  ;;  %v8949_v49 = vld [vmem:[#allocation44_spill] sm:$0xff] }
 0x358   : > { %2641 = vmatpush1.bf16.msra.mxu0 %v8939_v36  ;;  %2682 = vmatpush1.bf16.msra.mxu1 %v8940_v1  ;;  %v8950_v36 = vld [vmem:[#allocation45_spill] sm:$0xff]  ;;  %v8951_v1 = vld [vmem:[#allocation46_spill] sm:$0xff] }
 0x359   : > { %2642 = vmatprep.subr.bf16.mxu0 %v8941_v40  ;;  %2683 = vmatprep.subr.bf16.mxu1 %v8942_v0  ;;  %v8952_v40 = vld [vmem:[#allocation47_spill] sm:$0xff]  ;;  %v8953_v0 = vld [vmem:[#allocation48_spill] sm:$0xff] }
 0x35c   : > { %2643 = vmatpush1.bf16.msra.mxu0 %v8943_v51  ;;  %2684 = vmatpush1.bf16.msra.mxu1 %v8944_v22  ;;  %v8954_v51 = vld [vmem:[#allocation49_spill] sm:$0xff]  ;;  %v8955_v22 = vld [vmem:[#allocation50_spill] sm:$0xff] }
 0x35d   : > { %2644 = vmatprep.subr.bf16.mxu0 %v8945_v21  ;;  %2685 = vmatprep.subr.bf16.mxu1 %v8946_v55  ;;  %v8956_v21 = vld [vmem:[#allocation51_spill] sm:$0xff]  ;;  %v8957_v55 = vld [vmem:[#allocation52_spill] sm:$0xff] }
 0x360   : > { %2645 = vmatpush1.bf16.msra.mxu0 %v8947_v56  ;;  %2686 = vmatpush1.bf16.msra.mxu1 %v8948_v13  ;;  %v8958_v56 = vld [vmem:[#allocation53_spill] sm:$0xff]  ;;  %v8959_v13 = vld [vmem:[#allocation54_spill] sm:$0xff] }
 0x361   : > { %2646 = vmatprep.subr.bf16.mxu0 %v8949_v49  ;;  %2687 = vmatprep.subr.bf16.mxu1 %v8950_v36  ;;  %v8960_v49 = vld [vmem:[#allocation55_spill] sm:$0xff]  ;;  %v8961_v36 = vld [vmem:[#allocation56_spill] sm:$0xff] }
 0x364   : > { %2647 = vmatpush1.bf16.msra.mxu0 %v8951_v1  ;;  %2688 = vmatpush1.bf16.msra.mxu1 %v8952_v40  ;;  %v8962_v1 = vld [vmem:[#allocation57_spill] sm:$0xff]  ;;  %v8963_v40 = vld [vmem:[#allocation58_spill] sm:$0xff] }
 0x365   : > { %2648 = vmatprep.subr.bf16.mxu0 %v8953_v0  ;;  %2689 = vmatprep.subr.bf16.mxu1 %v8954_v51  ;;  %v8964_v0 = vld [vmem:[#allocation59_spill] sm:$0xff]  ;;  %v8965_v51 = vld [vmem:[#allocation60_spill] sm:$0xff] }
 0x368   : > { %2649 = vmatpush1.bf16.msra.mxu0 %v8955_v22  ;;  %2690 = vmatpush1.bf16.msra.mxu1 %v8956_v21  ;;  %v8966_v22 = vld [vmem:[#allocation61_spill] sm:$0xff]  ;;  %v8967_v21 = vld [vmem:[#allocation62_spill] sm:$0xff] }
 0x369   : > { %2650 = vmatprep.subr.bf16.mxu0 %v8957_v55  ;;  %2691 = vmatprep.subr.bf16.mxu1 %v8958_v56  ;;  %v8968_v55 = vld [vmem:[#allocation63_spill] sm:$0xff]  ;;  %v8969_v56 = vld [vmem:[#allocation64_spill] sm:$0xff] }
 0x36c   : > { %2651 = vmatpush1.bf16.msra.mxu0 %v8959_v13  ;;  %2692 = vmatpush1.bf16.msra.mxu1 %v8960_v49  ;;  %v8970_v13 = vld [vmem:[#allocation65_spill] sm:$0xff]  ;;  %v8971_v49 = vld [vmem:[#allocation66_spill] sm:$0xff] }
 0x36d   : > { %2652 = vmatprep.subr.bf16.mxu0 %v8961_v36  ;;  %2693 = vmatprep.subr.bf16.mxu1 %v8962_v1  ;;  %v8972_v36 = vld [vmem:[#allocation67_spill] sm:$0xff]  ;;  %v8973_v1 = vld [vmem:[#allocation68_spill] sm:$0xff] }
 0x370   : > { %2653 = vmatpush1.bf16.msra.mxu0 %v8963_v40  ;;  %2694 = vmatpush1.bf16.msra.mxu1 %v8964_v0  ;;  %v8974_v40 = vld [vmem:[#allocation69_spill] sm:$0xff] }
 0x371   : > { %2654 = vmatprep.subr.bf16.mxu0 %v8965_v51  ;;  %2695 = vmatprep.subr.bf16.mxu1 %v8966_v22 }
 0x374   : > { %2655 = vmatpush1.bf16.msra.mxu0 %v8967_v21  ;;  %2696 = vmatpush1.bf16.msra.mxu1 %v8968_v55 }
 0x375   : > { %2656 = vmatprep.subr.bf16.mxu0 %v8969_v56  ;;  %2697 = vmatprep.subr.bf16.mxu1 %v8970_v13 }
 0x378   : > { %2657 = vmatpush1.bf16.msra.mxu0 %v8971_v49  ;;  %2698 = vmatpush1.bf16.msra.mxu1 %v8972_v36 }
 0x379   : > { %2708 = vmatprep.subr.bf16.mxu0 %v8973_v1  ;;  %2749 = vmatprep.subr.bf16.mxu1 %v8974_v40 }
 0x3ce   : > { %v2417_v0 = vpop.f32.mrb[48].mxu0  ;;  %v2458_v51 = vpop.f32.mrb[48].mxu1 }
 0x3cf   : > { %v2547_v22 = vadd.f32 %v2417_v0, %v8975_v63  ;;  %v2549_v21 = vadd.f32 %v2458_v51, %v8976_v27  ;;  %v2419_v29 = vpop.f32.mrb[49].mxu0  ;;  %v2460_v55 = vpop.f32.mrb[49].mxu1 }
 0x3d0   : > { %v2548_v56 = vadd.f32 %v2419_v29, %v8977_v31  ;;  %v2550_v13 = vadd.f32 %v2460_v55, %v8978_v16  ;;  %v2421_v12 = vpop.f32.mrb[50].mxu0  ;;  %v2462_v49 = vpop.f32.mrb[50].mxu1 }
 0x3d1   : > { %v2422_v23 = vpop.f32.mrb[51].mxu0  ;;  %v2463_v36 = vpop.f32.mrb[51].mxu1  ;;  %v5068_v20 = vmul.f32 -1.442695, %v2547_v22  ;;  %v5070_v1 = vmul.f32 -1.442695, %v2549_v21 }
 0x3d2   : > { %v5069_v25 = vmul.f32 -1.442695, %v2548_v56  ;;  %v5071_v40 = vmul.f32 -1.442695, %v2550_v13  ;;  %v8979_v22 = vld [vmem:[#allocation165_spill] sm:$0xff]  ;;  %v8980_v13 = vld [vmem:[#allocation167_spill] sm:$0xff] }
 0x3d3   : > { %5506 = vpow2.f32 %v5068_v20  ;;  %v8982_v23 = vld [vmem:[#allocation168_spill] sm:$0xff] }
 0x3d4   : > { %5508 = vpow2.f32 %v5070_v1 }
 0x3d5   : > { %5510 = vpow2.f32 %v5069_v25 }
 0x3d6   : > { %5512 = vpow2.f32 %v5071_v40  ;;  %v8981_v40 = vld [vmem:[#allocation166_spill] sm:$0xff] }
 0x3dd   : > { %v5507_v63 = vpop.eup %5506 }
 0x3de   : > { %v5509_v0 = vpop.eup %5508  ;;  %v2573_v18 = vadd.f32 1.0, %v5507_v63 }
 0x3df   : > { %v5511_v27 = vpop.eup %5510  ;;  %v2575_v31 = vadd.f32 1.0, %v5509_v0 }
 0x3e0   : > { %v5513_v51 = vpop.eup %5512  ;;  %v2574_v29 = vadd.f32 1.0, %v5511_v27  ;;  %5514 = vrcp.f32 %v2573_v18 }
 0x3e1   : > { %v2576_v55 = vadd.f32 1.0, %v5513_v51  ;;  %5516 = vrcp.f32 %v2575_v31 }
 0x3e2   : > { %5518 = vrcp.f32 %v2574_v29 }
 0x3e3   : > { %5520 = vrcp.f32 %v2576_v55 }
 0x3ea   : > { %v5515_v31 = vpop.eup %5514 }
 0x3eb   : > { %v5517_v29 = vpop.eup %5516 }
 0x40e   : > { %v2499_v49 = vpop.f32.mrb[52].mxu0  ;;  %v2540_v36 = vpop.f32.mrb[52].mxu1 }
 0x40f   : > { %v2551_v56 = vadd.f32 %v2499_v49, %v8979_v22  ;;  %v2553_v21 = vadd.f32 %v2540_v36, %v8980_v13  ;;  %v2501_v1 = vpop.f32.mrb[53].mxu0  ;;  %v2542_v25 = vpop.f32.mrb[53].mxu1  ;;  %v2593_v13 = vmul.f32 %v5517_v29, %v7123_v24  ;;  %v8983_v29 = vld [vmem:[#allocation99_spill] sm:$0xff] }
 0x410   : > { %v2552_v20 = vadd.f32 %v2501_v1, %v8981_v40  ;;  %v2554_v12 = vadd.f32 %v2542_v25, %v8982_v23  ;;  %v2503_v16 = vpop.f32.mrb[54].mxu0  ;;  %v2544_v63 = vpop.f32.mrb[54].mxu1 }
 0x411   : > { %v5072_v0 = vmul.f32 -1.442695, %v2551_v56  ;;  %5522 = vtanh.f32 %v2553_v21  ;;  %v2504_v18 = vpop.f32.mrb[55].mxu0  ;;  %v2545_v27 = vpop.f32.mrb[55].mxu1 }
 0x412   : > { %v5073_v51 = vmul.f32 -1.442695, %v2552_v20  ;;  %5524 = vtanh.f32 %v2554_v12  ;;  %v5519_v49 = vpop.eup %5518 }
 0x413   : > { %5526 = vpow2.f32 %v5072_v0  ;;  %v5521_v36 = vpop.eup %5520 }
 0x414   : > { %5528 = vpow2.f32 %v5073_v51  ;;  %v2594_v40 = vmul.f32 %v5521_v36, %v7125_v15  ;;  %v8985_v36 = vld [vmem:[#allocation113_spill] sm:$0xff] }
 0x41b   : > { %v5523_v22 = vpop.eup %5522 }
 0x41c   : > { %v5525_v55 = vpop.eup %5524  ;;  %v2595_v1 = vmul.f32 %v5523_v22, %v5515_v31  ;;  %v8986_v22 = vld [vmem:[#allocation114_spill] sm:$0xff] }
 0x41d   : > { %v5527_v25 = vpop.eup %5526  ;;  %v2596_v56 = vmul.f32 %v5525_v55, %v5519_v49  ;;  %v8984_v49 = vld [vmem:[#allocation112_spill] sm:$0xff]  ;;  %v8987_v55 = vld [vmem:[#allocation115_spill] sm:$0xff] }
 0x41e   : > { %v5529_v21 = vpop.eup %5528  ;;  %v2577_v23 = vadd.f32 1.0, %v5527_v25  ;;  %v7273_v16 = vadd.f32 %v2595_v1, %v2593_v13  ;;  %v8988_v13 = vld [vmem:[#allocation116_spill] sm:$0xff]  ;;  %v8989_v1 = vld [vmem:[#allocation117_spill] sm:$0xff]  ;;  %v8990_v25 = vld [vmem:[#allocation118_spill] sm:$0xff] }
 0x41f   : > { %v2578_v20 = vadd.f32 1.0, %v5529_v21  ;;  %v7275_v12 = vadd.f32 %v2596_v56, %v2594_v40  ;;  %v8991_v40 = vld [vmem:[#allocation119_spill] sm:$0xff]  ;;  %v8992_v56 = vld [vmem:[#allocation120_spill] sm:$0xff]  ;;  %v8993_v21 = vld [vmem:[#allocation121_spill] sm:$0xff] }
 0x420   : > { %5530 = vrcp.f32 %v2577_v23  ;;  %v8994_v23 = vld [vmem:[#allocation122_spill] sm:$0xff] }
 0x421   : > { %5532 = vtanh.f32 %v7273_v16 }
 0x422   : > { %5534 = vrcp.f32 %v2578_v20  ;;  %v8995_v20 = vld [vmem:[#allocation123_spill] sm:$0xff] }
 0x423   : > { %5536 = vtanh.f32 %v7275_v12 }
 0x42a   : > { %v5531_v63 = vpop.eup %5530 }
 0x42b   : > { %v5533_v24 = vpop.eup %5532 }
 0x42c   : > { %v5535_v0 = vpop.eup %5534  ;;  %v2601_v27 = vmul.f32 %v5533_v24, %v5531_v63  ;;  %v8996_v63 = vld [vmem:[#allocation124_spill] sm:$0xff]  ;;  %v8997_v24 = vld [vmem:[#allocation125_spill] sm:$0xff] }
 0x42d   : > { %v5537_v18 = vpop.eup %5536 }
 0x42e   : > { %v2602_v15 = vmul.f32 %v5537_v18, %v5535_v0  ;;  %v7279_v31 = vpack.c.bf16 %v2601_v27, %v2601_v27  ;;  %v8998_v0 = vld [vmem:[#allocation126_spill] sm:$0xff]  ;;  %v8999_v18 = vld [vmem:[#allocation127_spill] sm:$0xff]  ;;  %v9000_v27 = vld [vmem:[#allocation128_spill] sm:$0xff] }
 0x430   : > { %v2625_v51 = vpack.c.bf16 %v2602_v15, %v2602_v15  ;;  %v9001_v15 = vld [vmem:[#allocation129_spill] sm:$0xff] }
 0x432   : > { %2658 = vmatprep.mubr.bf16.mxu0 %v2625_v51  ;;  %2699 = vmatprep.mubr.bf16.mxu1 %v2625_v51 }
 0x433   : > { %2659 = vmatmul.mubr.bf16.vlgmr.msra.gmra.mrb[56].mxu0 %v7279_v31  ;;  %2700 = vmatmul.mubr.bf16.vlgmr.msra.gmra.mrb[56].mxu1 %v7279_v31 }
 0x434   : > { %2709 = vmatpush1.bf16.msra.mxu0 %v8782_v4  ;;  %2750 = vmatpush1.bf16.msra.mxu1 %v8783_v32 }
 0x435   : > { %2740 = vmatprep.mubr.bf16.mxu0 %v2625_v51  ;;  %2781 = vmatprep.mubr.bf16.mxu1 %v2625_v51  ;;  %v9002_v51 = vld [vmem:[#allocation130_spill] sm:$0xff] }
 0x436   : > { %2710 = vmatprep.subr.bf16.mxu0 %v8784_v48  ;;  %2751 = vmatprep.subr.bf16.mxu1 %v8785_v8 }
 0x438   : > { %2711 = vmatpush1.bf16.msra.mxu0 %v8786_v5  ;;  %2752 = vmatpush1.bf16.msra.mxu1 %v8787_v57 }
 0x439   : > { %2712 = vmatprep.subr.bf16.mxu0 %v8788_v28  ;;  %2753 = vmatprep.subr.bf16.mxu1 %v8789_v14 }
 0x43c   : > { %2713 = vmatpush1.bf16.msra.mxu0 %v8790_v33  ;;  %2754 = vmatpush1.bf16.msra.mxu1 %v8791_v26 }
 0x43d   : > { %2714 = vmatprep.subr.bf16.mxu0 %v8792_v2  ;;  %2755 = vmatprep.subr.bf16.mxu1 %v8793_v58 }
 0x440   : > { %2715 = vmatpush1.bf16.msra.mxu0 %v8794_v30  ;;  %2756 = vmatpush1.bf16.msra.mxu1 %v8795_v41 }
 0x441   : > { %2716 = vmatprep.subr.bf16.mxu0 %v8796_v19  ;;  %2757 = vmatprep.subr.bf16.mxu1 %v8797_v17 }
 0x444   : > { %2717 = vmatpush1.bf16.msra.mxu0 %v8798_v50  ;;  %2758 = vmatpush1.bf16.msra.mxu1 %v8799_v37 }
 0x445   : > { %2718 = vmatprep.subr.bf16.mxu0 %v8800_v39  ;;  %2759 = vmatprep.subr.bf16.mxu1 %v8801_v38 }
 0x448   : > { %2719 = vmatpush1.bf16.msra.mxu0 %v8888_v52  ;;  %2760 = vmatpush1.bf16.msra.mxu1 %v8889_v44 }
 0x449   : > { %2720 = vmatprep.subr.bf16.mxu0 %v8890_v45  ;;  %2761 = vmatprep.subr.bf16.mxu1 %v8891_v62 }
 0x44c   : > { %2721 = vmatpush1.bf16.msra.mxu0 %v8892_v46  ;;  %2762 = vmatpush1.bf16.msra.mxu1 %v8893_v6 }
 0x44d   : > { %2722 = vmatprep.subr.bf16.mxu0 %v8894_v7  ;;  %2763 = vmatprep.subr.bf16.mxu1 %v8895_v35 }
 0x450   : > { %2723 = vmatpush1.bf16.msra.mxu0 %v8896_v59  ;;  %2764 = vmatpush1.bf16.msra.mxu1 %v8983_v29 }
 0x451   : > { %2724 = vmatprep.subr.bf16.mxu0 %v8898_v43  ;;  %2765 = vmatprep.subr.bf16.mxu1 %v8899_v11 }
 0x454   : > { %2725 = vmatpush1.bf16.msra.mxu0 %v8900_v10  ;;  %2766 = vmatpush1.bf16.msra.mxu1 %v8901_v54 }
 0x455   : > { %2726 = vmatprep.subr.bf16.mxu0 %v8902_v42  ;;  %2767 = vmatprep.subr.bf16.mxu1 %v8903_v53 }
 0x458   : > { %2727 = vmatpush1.bf16.msra.mxu0 %v8904_v34  ;;  %2768 = vmatpush1.bf16.msra.mxu1 %v8905_v60 }
 0x459   : > { %2728 = vmatprep.subr.bf16.mxu0 %v8906_v47  ;;  %2769 = vmatprep.subr.bf16.mxu1 %v8907_v61 }
 0x45c   : > { %2729 = vmatpush1.bf16.msra.mxu0 %v8908_v3  ;;  %2770 = vmatpush1.bf16.msra.mxu1 %v8823_v9 }
 0x45d   : > { %2730 = vmatprep.subr.bf16.mxu0 %v8984_v49  ;;  %2771 = vmatprep.subr.bf16.mxu1 %v8985_v36 }
 0x460   : > { %2731 = vmatpush1.bf16.msra.mxu0 %v8986_v22  ;;  %2772 = vmatpush1.bf16.msra.mxu1 %v8987_v55 }
 0x461   : > { %2732 = vmatprep.subr.bf16.mxu0 %v8988_v13  ;;  %2773 = vmatprep.subr.bf16.mxu1 %v8989_v1  ;;  %v9072_v1 = vld [vmem:[#allocation142_spill] sm:$0xff]  ;;  %v9073_v13 = vld [vmem:[#allocation144_spill] sm:$0xff] }
 0x464   : > { %2733 = vmatpush1.bf16.msra.mxu0 %v8990_v25  ;;  %2774 = vmatpush1.bf16.msra.mxu1 %v8991_v40  ;;  %v9071_v40 = vld [vmem:[#allocation143_spill] sm:$0xff] }
 0x465   : > { %2734 = vmatprep.subr.bf16.mxu0 %v8992_v56  ;;  %2775 = vmatprep.subr.bf16.mxu1 %v8993_v21  ;;  %v9003_v56 = vld [vmem:[#allocation131_spill] sm:$0xff]  ;;  %v9004_v21 = vld [vmem:[#allocation4_spill] sm:$0xff] }
 0x468   : > { %2735 = vmatpush1.bf16.msra.mxu0 %v8994_v23  ;;  %2776 = vmatpush1.bf16.msra.mxu1 %v8995_v20  ;;  %v9005_v23 = vld [vmem:[#allocation5_spill] sm:$0xff] }
 0x469   : > { %2736 = vmatprep.subr.bf16.mxu0 %v8996_v63  ;;  %2777 = vmatprep.subr.bf16.mxu1 %v8997_v24  ;;  %v9006_v24 = vld [vmem:[#allocation6_spill] sm:$0xff]  ;;  %v9015_v63 = vld [vmem:[#allocation15_spill] sm:$0xff]  ;;  %v9070_v20 = vld [vmem:[#allocation141_spill] sm:$0xff] }
 0x46c   : > { %2737 = vmatpush1.bf16.msra.mxu0 %v8998_v0  ;;  %2778 = vmatpush1.bf16.msra.mxu1 %v8999_v18  ;;  %v9007_v0 = vld [vmem:[#allocation7_spill] sm:$0xff]  ;;  %v9008_v18 = vld [vmem:[#allocation8_spill] sm:$0xff] }
 0x46d   : > { %2738 = vmatprep.subr.bf16.mxu0 %v9000_v27  ;;  %2779 = vmatprep.subr.bf16.mxu1 %v9001_v15  ;;  %v9009_v27 = vld [vmem:[#allocation9_spill] sm:$0xff]  ;;  %v9010_v15 = vld [vmem:[#allocation10_spill] sm:$0xff] }
 0x470   : > { %2739 = vmatpush1.bf16.msra.mxu0 %v9002_v51  ;;  %2780 = vmatpush1.bf16.msra.mxu1 %v9003_v56  ;;  %v9011_v51 = vld [vmem:[#allocation11_spill] sm:$0xff]  ;;  %v9012_v56 = vld [vmem:[#allocation12_spill] sm:$0xff] }
 0x471   : > { %2869 = vmatprep.subr.bf16.mxu0 %v9004_v21  ;;  %2910 = vmatprep.subr.bf16.mxu1 %v9005_v23  ;;  %v9013_v21 = vld [vmem:[#allocation13_spill] sm:$0xff]  ;;  %v9014_v23 = vld [vmem:[#allocation14_spill] sm:$0xff] }
 0x473   : > { %2741 = vmatmul.mubr.bf16.vlgmr.msra.gmra.mrb[60].mxu0 %v7279_v31  ;;  %2782 = vmatmul.mubr.bf16.vlgmr.msra.gmra.mrb[60].mxu1 %v7279_v31  ;;  %v9016_v31 = vld [vmem:[#allocation16_spill] sm:$0xff] }
 0x474   : > { %2870 = vmatpush1.bf16.msra.mxu0 %v9006_v24  ;;  %2911 = vmatpush1.bf16.msra.mxu1 %v9007_v0  ;;  %v9017_v24 = vld [vmem:[#allocation17_spill] sm:$0xff]  ;;  %v9018_v0 = vld [vmem:[#allocation18_spill] sm:$0xff] }
 0x475   : > { %2871 = vmatprep.subr.bf16.mxu0 %v9008_v18  ;;  %2912 = vmatprep.subr.bf16.mxu1 %v9009_v27  ;;  %v9019_v18 = vld [vmem:[#allocation19_spill] sm:$0xff]  ;;  %v9020_v27 = vld [vmem:[#allocation20_spill] sm:$0xff] }
 0x478   : > { %2872 = vmatpush1.bf16.msra.mxu0 %v9010_v15  ;;  %2913 = vmatpush1.bf16.msra.mxu1 %v9011_v51  ;;  %v9021_v15 = vld [vmem:[#allocation21_spill] sm:$0xff]  ;;  %v9022_v51 = vld [vmem:[#allocation22_spill] sm:$0xff] }
 0x479   : > { %2873 = vmatprep.subr.bf16.mxu0 %v9012_v56  ;;  %2914 = vmatprep.subr.bf16.mxu1 %v9013_v21  ;;  %v9023_v56 = vld [vmem:[#allocation23_spill] sm:$0xff]  ;;  %v9024_v21 = vld [vmem:[#allocation24_spill] sm:$0xff] }
 0x47c   : > { %2874 = vmatpush1.bf16.msra.mxu0 %v9014_v23  ;;  %2915 = vmatpush1.bf16.msra.mxu1 %v9015_v63  ;;  %v9025_v23 = vld [vmem:[#allocation25_spill] sm:$0xff]  ;;  %v9026_v63 = vld [vmem:[#allocation26_spill] sm:$0xff] }
 0x47d   : > { %2875 = vmatprep.subr.bf16.mxu0 %v9016_v31  ;;  %2916 = vmatprep.subr.bf16.mxu1 %v9017_v24  ;;  %v9027_v31 = vld [vmem:[#allocation27_spill] sm:$0xff]  ;;  %v9028_v24 = vld [vmem:[#allocation28_spill] sm:$0xff] }
 0x480   : > { %2876 = vmatpush1.bf16.msra.mxu0 %v9018_v0  ;;  %2917 = vmatpush1.bf16.msra.mxu1 %v9019_v18  ;;  %v9029_v0 = vld [vmem:[#allocation29_spill] sm:$0xff]  ;;  %v9030_v18 = vld [vmem:[#allocation30_spill] sm:$0xff] }
 0x481   : > { %2877 = vmatprep.subr.bf16.mxu0 %v9020_v27  ;;  %2918 = vmatprep.subr.bf16.mxu1 %v9021_v15  ;;  %v9031_v27 = vld [vmem:[#allocation31_spill] sm:$0xff]  ;;  %v9032_v15 = vld [vmem:[#allocation32_spill] sm:$0xff] }
 0x484   : > { %2878 = vmatpush1.bf16.msra.mxu0 %v9022_v51  ;;  %2919 = vmatpush1.bf16.msra.mxu1 %v9023_v56  ;;  %v9033_v51 = vld [vmem:[#allocation33_spill] sm:$0xff]  ;;  %v9034_v56 = vld [vmem:[#allocation34_spill] sm:$0xff] }
 0x485   : > { %2879 = vmatprep.subr.bf16.mxu0 %v9024_v21  ;;  %2920 = vmatprep.subr.bf16.mxu1 %v9025_v23  ;;  %v9035_v21 = vld [vmem:[#allocation35_spill] sm:$0xff]  ;;  %v9036_v23 = vld [vmem:[#allocation36_spill] sm:$0xff] }
 0x488   : > { %2880 = vmatpush1.bf16.msra.mxu0 %v9026_v63  ;;  %2921 = vmatpush1.bf16.msra.mxu1 %v9027_v31  ;;  %v9037_v63 = vld [vmem:[#allocation37_spill] sm:$0xff]  ;;  %v9038_v31 = vld [vmem:[#allocation38_spill] sm:$0xff] }
 0x489   : > { %2881 = vmatprep.subr.bf16.mxu0 %v9028_v24  ;;  %2922 = vmatprep.subr.bf16.mxu1 %v9029_v0  ;;  %v9039_v24 = vld [vmem:[#allocation39_spill] sm:$0xff]  ;;  %v9040_v0 = vld [vmem:[#allocation40_spill] sm:$0xff] }
 0x48c   : > { %2882 = vmatpush1.bf16.msra.mxu0 %v9030_v18  ;;  %2923 = vmatpush1.bf16.msra.mxu1 %v9031_v27  ;;  %v9041_v18 = vld [vmem:[#allocation41_spill] sm:$0xff]  ;;  %v9042_v27 = vld [vmem:[#allocation42_spill] sm:$0xff] }
 0x48d   : > { %2883 = vmatprep.subr.bf16.mxu0 %v9032_v15  ;;  %2924 = vmatprep.subr.bf16.mxu1 %v9033_v51  ;;  %v9043_v15 = vld [vmem:[#allocation43_spill] sm:$0xff]  ;;  %v9044_v51 = vld [vmem:[#allocation44_spill] sm:$0xff] }
 0x490   : > { %2884 = vmatpush1.bf16.msra.mxu0 %v9034_v56  ;;  %2925 = vmatpush1.bf16.msra.mxu1 %v9035_v21  ;;  %v9045_v56 = vld [vmem:[#allocation45_spill] sm:$0xff]  ;;  %v9046_v21 = vld [vmem:[#allocation46_spill] sm:$0xff] }
 0x491   : > { %2885 = vmatprep.subr.bf16.mxu0 %v9036_v23  ;;  %2926 = vmatprep.subr.bf16.mxu1 %v9037_v63  ;;  %v9047_v23 = vld [vmem:[#allocation47_spill] sm:$0xff]  ;;  %v9048_v63 = vld [vmem:[#allocation48_spill] sm:$0xff] }
 0x494   : > { %2886 = vmatpush1.bf16.msra.mxu0 %v9038_v31  ;;  %2927 = vmatpush1.bf16.msra.mxu1 %v9039_v24  ;;  %v9049_v31 = vld [vmem:[#allocation49_spill] sm:$0xff]  ;;  %v9050_v24 = vld [vmem:[#allocation50_spill] sm:$0xff] }
 0x495   : > { %2887 = vmatprep.subr.bf16.mxu0 %v9040_v0  ;;  %2928 = vmatprep.subr.bf16.mxu1 %v9041_v18  ;;  %v9051_v0 = vld [vmem:[#allocation51_spill] sm:$0xff]  ;;  %v9052_v18 = vld [vmem:[#allocation52_spill] sm:$0xff] }
 0x498   : > { %2888 = vmatpush1.bf16.msra.mxu0 %v9042_v27  ;;  %2929 = vmatpush1.bf16.msra.mxu1 %v9043_v15  ;;  %v9053_v27 = vld [vmem:[#allocation53_spill] sm:$0xff]  ;;  %v9054_v15 = vld [vmem:[#allocation54_spill] sm:$0xff] }
 0x499   : > { %2889 = vmatprep.subr.bf16.mxu0 %v9044_v51  ;;  %2930 = vmatprep.subr.bf16.mxu1 %v9045_v56  ;;  %v9055_v51 = vld [vmem:[#allocation55_spill] sm:$0xff]  ;;  %v9056_v56 = vld [vmem:[#allocation56_spill] sm:$0xff] }
 0x49c   : > { %2890 = vmatpush1.bf16.msra.mxu0 %v9046_v21  ;;  %2931 = vmatpush1.bf16.msra.mxu1 %v9047_v23  ;;  %v9057_v21 = vld [vmem:[#allocation57_spill] sm:$0xff]  ;;  %v9058_v23 = vld [vmem:[#allocation58_spill] sm:$0xff] }
 0x49d   : > { %2891 = vmatprep.subr.bf16.mxu0 %v9048_v63  ;;  %2932 = vmatprep.subr.bf16.mxu1 %v9049_v31  ;;  %v9059_v63 = vld [vmem:[#allocation59_spill] sm:$0xff]  ;;  %v9060_v31 = vld [vmem:[#allocation60_spill] sm:$0xff] }
 0x4a0   : > { %2892 = vmatpush1.bf16.msra.mxu0 %v9050_v24  ;;  %2933 = vmatpush1.bf16.msra.mxu1 %v9051_v0  ;;  %v9061_v24 = vld [vmem:[#allocation61_spill] sm:$0xff]  ;;  %v9062_v0 = vld [vmem:[#allocation62_spill] sm:$0xff] }
 0x4a1   : > { %2893 = vmatprep.subr.bf16.mxu0 %v9052_v18  ;;  %2934 = vmatprep.subr.bf16.mxu1 %v9053_v27  ;;  %v9063_v18 = vld [vmem:[#allocation63_spill] sm:$0xff]  ;;  %v9064_v27 = vld [vmem:[#allocation64_spill] sm:$0xff] }
 0x4a4   : > { %2894 = vmatpush1.bf16.msra.mxu0 %v9054_v15  ;;  %2935 = vmatpush1.bf16.msra.mxu1 %v9055_v51  ;;  %v9065_v15 = vld [vmem:[#allocation65_spill] sm:$0xff]  ;;  %v9066_v51 = vld [vmem:[#allocation66_spill] sm:$0xff] }
 0x4a5   : > { %2895 = vmatprep.subr.bf16.mxu0 %v9056_v56  ;;  %2936 = vmatprep.subr.bf16.mxu1 %v9057_v21  ;;  %v9067_v56 = vld [vmem:[#allocation67_spill] sm:$0xff]  ;;  %v9068_v21 = vld [vmem:[#allocation68_spill] sm:$0xff] }
 0x4a8   : > { %2896 = vmatpush1.bf16.msra.mxu0 %v9058_v23  ;;  %2937 = vmatpush1.bf16.msra.mxu1 %v9059_v63  ;;  %v9069_v23 = vld [vmem:[#allocation69_spill] sm:$0xff] }
 0x4a9   : > { %2897 = vmatprep.subr.bf16.mxu0 %v9060_v31  ;;  %2938 = vmatprep.subr.bf16.mxu1 %v9061_v24 }
 0x4ac   : > { %2898 = vmatpush1.bf16.msra.mxu0 %v9062_v0  ;;  %2939 = vmatpush1.bf16.msra.mxu1 %v9063_v18 }
 0x4ad   : > { %2899 = vmatprep.subr.bf16.mxu0 %v9064_v27  ;;  %2940 = vmatprep.subr.bf16.mxu1 %v9065_v15 }
 0x4b0   : > { %2900 = vmatpush1.bf16.msra.mxu0 %v9066_v51  ;;  %2941 = vmatpush1.bf16.msra.mxu1 %v9067_v56 }
 0x4b1   : > { %2951 = vmatprep.subr.bf16.mxu0 %v9068_v21  ;;  %2992 = vmatprep.subr.bf16.mxu1 %v9069_v23 }
 0x506   : > { %v2660_v63 = vpop.f32.mrb[56].mxu0  ;;  %v2701_v31 = vpop.f32.mrb[56].mxu1 }
 0x507   : > { %v2790_v24 = vadd.f32 %v2660_v63, %v9070_v20  ;;  %v2792_v0 = vadd.f32 %v2701_v31, %v9071_v40  ;;  %v2662_v25 = vpop.f32.mrb[57].mxu0  ;;  %v2703_v18 = vpop.f32.mrb[57].mxu1 }
 0x508   : > { %v2791_v27 = vadd.f32 %v2662_v25, %v9072_v1  ;;  %v2793_v15 = vadd.f32 %v2703_v18, %v9073_v13  ;;  %v2664_v55 = vpop.f32.mrb[58].mxu0  ;;  %v2705_v51 = vpop.f32.mrb[58].mxu1 }
 0x509   : > { %v2665_v22 = vpop.f32.mrb[59].mxu0  ;;  %v2706_v56 = vpop.f32.mrb[59].mxu1  ;;  %v5074_v36 = vmul.f32 -1.442695, %v2790_v24  ;;  %v5076_v21 = vmul.f32 -1.442695, %v2792_v0 }
 0x50a   : > { %v5075_v49 = vmul.f32 -1.442695, %v2791_v27  ;;  %v5077_v23 = vmul.f32 -1.442695, %v2793_v15  ;;  %v9074_v56 = vld [vmem:[#allocation169_spill] sm:$0xff]  ;;  %v9075_v0 = vld [vmem:[#allocation171_spill] sm:$0xff] }
 0x50b   : > { %5538 = vpow2.f32 %v5074_v36  ;;  %v9077_v27 = vld [vmem:[#allocation172_spill] sm:$0xff] }
 0x50c   : > { %5540 = vpow2.f32 %v5076_v21 }
 0x50d   : > { %5542 = vpow2.f32 %v5075_v49 }
 0x50e   : > { %5544 = vpow2.f32 %v5077_v23  ;;  %v9076_v23 = vld [vmem:[#allocation170_spill] sm:$0xff] }
 0x515   : > { %v5539_v20 = vpop.eup %5538 }
 0x516   : > { %v5541_v40 = vpop.eup %5540  ;;  %v2816_v9 = vadd.f32 1.0, %v5539_v20 }
 0x517   : > { %v5543_v63 = vpop.eup %5542  ;;  %v2818_v1 = vadd.f32 1.0, %v5541_v40 }
 0x518   : > { %v5545_v31 = vpop.eup %5544  ;;  %v2817_v25 = vadd.f32 1.0, %v5543_v63  ;;  %5546 = vrcp.f32 %v2816_v9 }
 0x519   : > { %v2819_v13 = vadd.f32 1.0, %v5545_v31  ;;  %5548 = vrcp.f32 %v2818_v1 }
 0x51a   : > { %5550 = vrcp.f32 %v2817_v25 }
 0x51b   : > { %5552 = vrcp.f32 %v2819_v13 }
 0x522   : > { %v5547_v1 = vpop.eup %5546 }
 0x523   : > { %v5549_v25 = vpop.eup %5548 }
 0x546   : > { %v2742_v22 = vpop.f32.mrb[60].mxu0  ;;  %v2783_v55 = vpop.f32.mrb[60].mxu1 }
 0x547   : > { %v2794_v24 = vadd.f32 %v2742_v22, %v9074_v56  ;;  %v2796_v36 = vadd.f32 %v2783_v55, %v9075_v0  ;;  %v2744_v21 = vpop.f32.mrb[61].mxu0  ;;  %v2785_v49 = vpop.f32.mrb[61].mxu1  ;;  %v2836_v0 = vmul.f32 %v5549_v25, %v7273_v16  ;;  %v9078_v25 = vld [vmem:[#allocation111_spill] sm:$0xff] }
 0x548   : > { %v2795_v18 = vadd.f32 %v2744_v21, %v9076_v23  ;;  %v2797_v15 = vadd.f32 %v2785_v49, %v9077_v27  ;;  %v2746_v51 = vpop.f32.mrb[62].mxu0  ;;  %v2787_v20 = vpop.f32.mrb[62].mxu1 }
 0x549   : > { %v5078_v40 = vmul.f32 -1.442695, %v2794_v24  ;;  %5554 = vtanh.f32 %v2796_v36  ;;  %v2747_v9 = vpop.f32.mrb[63].mxu0  ;;  %v2788_v63 = vpop.f32.mrb[63].mxu1 }
 0x54a   : > { %v5079_v31 = vmul.f32 -1.442695, %v2795_v18  ;;  %5556 = vtanh.f32 %v2797_v15  ;;  %v5551_v22 = vpop.eup %5550 }
 0x54b   : > { %5558 = vpow2.f32 %v5078_v40  ;;  %v5553_v55 = vpop.eup %5552 }
 0x54c   : > { %5560 = vpow2.f32 %v5079_v31  ;;  %v2837_v23 = vmul.f32 %v5553_v55, %v7275_v12  ;;  %v9080_v55 = vld [vmem:[#allocation113_spill] sm:$0xff] }
 0x553   : > { %v5555_v56 = vpop.eup %5554 }
 0x554   : > { %v5557_v13 = vpop.eup %5556  ;;  %v2838_v21 = vmul.f32 %v5555_v56, %v5547_v1  ;;  %v9081_v56 = vld [vmem:[#allocation114_spill] sm:$0xff] }
 0x555   : > { %v5559_v49 = vpop.eup %5558  ;;  %v2839_v24 = vmul.f32 %v5557_v13, %v5551_v22  ;;  %v9079_v22 = vld [vmem:[#allocation112_spill] sm:$0xff]  ;;  %v9082_v13 = vld [vmem:[#allocation115_spill] sm:$0xff] }
 0x556   : > { %v5561_v36 = vpop.eup %5560  ;;  %v2820_v27 = vadd.f32 1.0, %v5559_v49  ;;  %v7423_v51 = vadd.f32 %v2838_v21, %v2836_v0  ;;  %v9083_v0 = vld [vmem:[#allocation116_spill] sm:$0xff]  ;;  %v9084_v21 = vld [vmem:[#allocation117_spill] sm:$0xff]  ;;  %v9085_v49 = vld [vmem:[#allocation118_spill] sm:$0xff] }
 0x557   : > { %v2821_v18 = vadd.f32 1.0, %v5561_v36  ;;  %v7425_v15 = vadd.f32 %v2839_v24, %v2837_v23  ;;  %v9086_v23 = vld [vmem:[#allocation119_spill] sm:$0xff]  ;;  %v9087_v24 = vld [vmem:[#allocation120_spill] sm:$0xff]  ;;  %v9088_v36 = vld [vmem:[#allocation121_spill] sm:$0xff] }
 0x558   : > { %5562 = vrcp.f32 %v2820_v27  ;;  %v9089_v27 = vld [vmem:[#allocation122_spill] sm:$0xff] }
 0x559   : > { %5564 = vtanh.f32 %v7423_v51 }
 0x55a   : > { %5566 = vrcp.f32 %v2821_v18  ;;  %v9090_v18 = vld [vmem:[#allocation123_spill] sm:$0xff] }
 0x55b   : > { %5568 = vtanh.f32 %v7425_v15 }
 0x562   : > { %v5563_v20 = vpop.eup %5562 }
 0x563   : > { %v5565_v16 = vpop.eup %5564 }
 0x564   : > { %v5567_v40 = vpop.eup %5566  ;;  %v2844_v63 = vmul.f32 %v5565_v16, %v5563_v20  ;;  %v9091_v20 = vld [vmem:[#allocation124_spill] sm:$0xff]  ;;  %v9092_v16 = vld [vmem:[#allocation125_spill] sm:$0xff] }
 0x565   : > { %v5569_v9 = vpop.eup %5568 }
 0x566   : > { %v2845_v12 = vmul.f32 %v5569_v9, %v5567_v40  ;;  %v7429_v1 = vpack.c.bf16 %v2844_v63, %v2844_v63  ;;  %v9093_v40 = vld [vmem:[#allocation126_spill] sm:$0xff]  ;;  %v9094_v9 = vld [vmem:[#allocation127_spill] sm:$0xff]  ;;  %v9095_v63 = vld [vmem:[#allocation128_spill] sm:$0xff] }
 0x568   : > { %v2868_v31 = vpack.c.bf16 %v2845_v12, %v2845_v12  ;;  %v9096_v12 = vld [vmem:[#allocation129_spill] sm:$0xff] }
 0x56a   : > { %2901 = vmatprep.mubr.bf16.mxu0 %v2868_v31  ;;  %2942 = vmatprep.mubr.bf16.mxu1 %v2868_v31 }
 0x56b   : > { %2902 = vmatmul.mubr.bf16.vlgmr.msra.gmra.mrb[64].mxu0 %v7429_v1  ;;  %2943 = vmatmul.mubr.bf16.vlgmr.msra.gmra.mrb[64].mxu1 %v7429_v1 }
 0x56c   : > { %2952 = vmatpush1.bf16.msra.mxu0 %v8782_v4  ;;  %2993 = vmatpush1.bf16.msra.mxu1 %v8783_v32 }
 0x56d   : > { %2983 = vmatprep.mubr.bf16.mxu0 %v2868_v31  ;;  %3024 = vmatprep.mubr.bf16.mxu1 %v2868_v31  ;;  %v9097_v31 = vld [vmem:[#allocation130_spill] sm:$0xff] }
 0x56e   : > { %2953 = vmatprep.subr.bf16.mxu0 %v8784_v48  ;;  %2994 = vmatprep.subr.bf16.mxu1 %v8785_v8 }
 0x570   : > { %2954 = vmatpush1.bf16.msra.mxu0 %v8786_v5  ;;  %2995 = vmatpush1.bf16.msra.mxu1 %v8787_v57 }
 0x571   : > { %2955 = vmatprep.subr.bf16.mxu0 %v8788_v28  ;;  %2996 = vmatprep.subr.bf16.mxu1 %v8789_v14 }
 0x574   : > { %2956 = vmatpush1.bf16.msra.mxu0 %v8790_v33  ;;  %2997 = vmatpush1.bf16.msra.mxu1 %v8791_v26 }
 0x575   : > { %2957 = vmatprep.subr.bf16.mxu0 %v8792_v2  ;;  %2998 = vmatprep.subr.bf16.mxu1 %v8793_v58 }
 0x578   : > { %2958 = vmatpush1.bf16.msra.mxu0 %v8794_v30  ;;  %2999 = vmatpush1.bf16.msra.mxu1 %v8795_v41 }
 0x579   : > { %2959 = vmatprep.subr.bf16.mxu0 %v8796_v19  ;;  %3000 = vmatprep.subr.bf16.mxu1 %v8797_v17 }
 0x57c   : > { %2960 = vmatpush1.bf16.msra.mxu0 %v8798_v50  ;;  %3001 = vmatpush1.bf16.msra.mxu1 %v8799_v37 }
 0x57d   : > { %2961 = vmatprep.subr.bf16.mxu0 %v8800_v39  ;;  %3002 = vmatprep.subr.bf16.mxu1 %v8801_v38 }
 0x580   : > { %2962 = vmatpush1.bf16.msra.mxu0 %v8888_v52  ;;  %3003 = vmatpush1.bf16.msra.mxu1 %v8889_v44 }
 0x581   : > { %2963 = vmatprep.subr.bf16.mxu0 %v8890_v45  ;;  %3004 = vmatprep.subr.bf16.mxu1 %v8891_v62 }
 0x584   : > { %2964 = vmatpush1.bf16.msra.mxu0 %v8892_v46  ;;  %3005 = vmatpush1.bf16.msra.mxu1 %v8893_v6 }
 0x585   : > { %2965 = vmatprep.subr.bf16.mxu0 %v8894_v7  ;;  %3006 = vmatprep.subr.bf16.mxu1 %v8895_v35 }
 0x588   : > { %2966 = vmatpush1.bf16.msra.mxu0 %v8896_v59  ;;  %3007 = vmatpush1.bf16.msra.mxu1 %v8983_v29 }
 0x589   : > { %2967 = vmatprep.subr.bf16.mxu0 %v8898_v43  ;;  %3008 = vmatprep.subr.bf16.mxu1 %v8899_v11 }
 0x58c   : > { %2968 = vmatpush1.bf16.msra.mxu0 %v8900_v10  ;;  %3009 = vmatpush1.bf16.msra.mxu1 %v8901_v54 }
 0x58d   : > { %2969 = vmatprep.subr.bf16.mxu0 %v8902_v42  ;;  %3010 = vmatprep.subr.bf16.mxu1 %v8903_v53 }
 0x590   : > { %2970 = vmatpush1.bf16.msra.mxu0 %v8904_v34  ;;  %3011 = vmatpush1.bf16.msra.mxu1 %v8905_v60 }
 0x591   : > { %2971 = vmatprep.subr.bf16.mxu0 %v8906_v47  ;;  %3012 = vmatprep.subr.bf16.mxu1 %v8907_v61 }
 0x594   : > { %2972 = vmatpush1.bf16.msra.mxu0 %v8908_v3  ;;  %3013 = vmatpush1.bf16.msra.mxu1 %v9078_v25 }
 0x595   : > { %2973 = vmatprep.subr.bf16.mxu0 %v9079_v22  ;;  %3014 = vmatprep.subr.bf16.mxu1 %v9080_v55 }
 0x598   : > { %2974 = vmatpush1.bf16.msra.mxu0 %v9081_v56  ;;  %3015 = vmatpush1.bf16.msra.mxu1 %v9082_v13 }
 0x599   : > { %2975 = vmatprep.subr.bf16.mxu0 %v9083_v0  ;;  %3016 = vmatprep.subr.bf16.mxu1 %v9084_v21  ;;  %v9167_v21 = vld [vmem:[#allocation146_spill] sm:$0xff]  ;;  %v9168_v0 = vld [vmem:[#allocation148_spill] sm:$0xff] }
 0x59c   : > { %2976 = vmatpush1.bf16.msra.mxu0 %v9085_v49  ;;  %3017 = vmatpush1.bf16.msra.mxu1 %v9086_v23  ;;  %v9166_v23 = vld [vmem:[#allocation147_spill] sm:$0xff] }
 0x59d   : > { %2977 = vmatprep.subr.bf16.mxu0 %v9087_v24  ;;  %3018 = vmatprep.subr.bf16.mxu1 %v9088_v36  ;;  %v9098_v24 = vld [vmem:[#allocation131_spill] sm:$0xff]  ;;  %v9099_v36 = vld [vmem:[#allocation4_spill] sm:$0xff] }
 0x5a0   : > { %2978 = vmatpush1.bf16.msra.mxu0 %v9089_v27  ;;  %3019 = vmatpush1.bf16.msra.mxu1 %v9090_v18  ;;  %v9100_v27 = vld [vmem:[#allocation5_spill] sm:$0xff] }
 0x5a1   : > { %2979 = vmatprep.subr.bf16.mxu0 %v9091_v20  ;;  %3020 = vmatprep.subr.bf16.mxu1 %v9092_v16  ;;  %v9101_v16 = vld [vmem:[#allocation6_spill] sm:$0xff]  ;;  %v9110_v20 = vld [vmem:[#allocation15_spill] sm:$0xff]  ;;  %v9165_v18 = vld [vmem:[#allocation145_spill] sm:$0xff] }
 0x5a4   : > { %2980 = vmatpush1.bf16.msra.mxu0 %v9093_v40  ;;  %3021 = vmatpush1.bf16.msra.mxu1 %v9094_v9  ;;  %v9102_v40 = vld [vmem:[#allocation7_spill] sm:$0xff]  ;;  %v9103_v9 = vld [vmem:[#allocation8_spill] sm:$0xff] }
 0x5a5   : > { %2981 = vmatprep.subr.bf16.mxu0 %v9095_v63  ;;  %3022 = vmatprep.subr.bf16.mxu1 %v9096_v12  ;;  %v9104_v63 = vld [vmem:[#allocation9_spill] sm:$0xff]  ;;  %v9105_v12 = vld [vmem:[#allocation10_spill] sm:$0xff] }
 0x5a8   : > { %2982 = vmatpush1.bf16.msra.mxu0 %v9097_v31  ;;  %3023 = vmatpush1.bf16.msra.mxu1 %v9098_v24  ;;  %v9106_v31 = vld [vmem:[#allocation11_spill] sm:$0xff]  ;;  %v9107_v24 = vld [vmem:[#allocation12_spill] sm:$0xff] }
 0x5a9   : > { %3112 = vmatprep.subr.bf16.mxu0 %v9099_v36  ;;  %3153 = vmatprep.subr.bf16.mxu1 %v9100_v27  ;;  %v9108_v36 = vld [vmem:[#allocation13_spill] sm:$0xff]  ;;  %v9109_v27 = vld [vmem:[#allocation14_spill] sm:$0xff] }
 0x5ab   : > { %2984 = vmatmul.mubr.bf16.vlgmr.msra.gmra.mrb[68].mxu0 %v7429_v1  ;;  %3025 = vmatmul.mubr.bf16.vlgmr.msra.gmra.mrb[68].mxu1 %v7429_v1  ;;  %v9111_v1 = vld [vmem:[#allocation16_spill] sm:$0xff] }
 0x5ac   : > { %3113 = vmatpush1.bf16.msra.mxu0 %v9101_v16  ;;  %3154 = vmatpush1.bf16.msra.mxu1 %v9102_v40  ;;  %v9112_v16 = vld [vmem:[#allocation17_spill] sm:$0xff]  ;;  %v9113_v40 = vld [vmem:[#allocation18_spill] sm:$0xff] }
 0x5ad   : > { %3114 = vmatprep.subr.bf16.mxu0 %v9103_v9  ;;  %3155 = vmatprep.subr.bf16.mxu1 %v9104_v63  ;;  %v9114_v9 = vld [vmem:[#allocation19_spill] sm:$0xff]  ;;  %v9115_v63 = vld [vmem:[#allocation20_spill] sm:$0xff] }
 0x5b0   : > { %3115 = vmatpush1.bf16.msra.mxu0 %v9105_v12  ;;  %3156 = vmatpush1.bf16.msra.mxu1 %v9106_v31  ;;  %v9116_v12 = vld [vmem:[#allocation21_spill] sm:$0xff]  ;;  %v9117_v31 = vld [vmem:[#allocation22_spill] sm:$0xff] }
 0x5b1   : > { %3116 = vmatprep.subr.bf16.mxu0 %v9107_v24  ;;  %3157 = vmatprep.subr.bf16.mxu1 %v9108_v36  ;;  %v9118_v24 = vld [vmem:[#allocation23_spill] sm:$0xff]  ;;  %v9119_v36 = vld [vmem:[#allocation24_spill] sm:$0xff] }
 0x5b4   : > { %3117 = vmatpush1.bf16.msra.mxu0 %v9109_v27  ;;  %3158 = vmatpush1.bf16.msra.mxu1 %v9110_v20  ;;  %v9120_v27 = vld [vmem:[#allocation25_spill] sm:$0xff]  ;;  %v9121_v20 = vld [vmem:[#allocation26_spill] sm:$0xff] }
 0x5b5   : > { %3118 = vmatprep.subr.bf16.mxu0 %v9111_v1  ;;  %3159 = vmatprep.subr.bf16.mxu1 %v9112_v16  ;;  %v9122_v1 = vld [vmem:[#allocation27_spill] sm:$0xff]  ;;  %v9123_v16 = vld [vmem:[#allocation28_spill] sm:$0xff] }
 0x5b8   : > { %3119 = vmatpush1.bf16.msra.mxu0 %v9113_v40  ;;  %3160 = vmatpush1.bf16.msra.mxu1 %v9114_v9  ;;  %v9124_v40 = vld [vmem:[#allocation29_spill] sm:$0xff]  ;;  %v9125_v9 = vld [vmem:[#allocation30_spill] sm:$0xff] }
 0x5b9   : > { %3120 = vmatprep.subr.bf16.mxu0 %v9115_v63  ;;  %3161 = vmatprep.subr.bf16.mxu1 %v9116_v12  ;;  %v9126_v63 = vld [vmem:[#allocation31_spill] sm:$0xff]  ;;  %v9127_v12 = vld [vmem:[#allocation32_spill] sm:$0xff] }
 0x5bc   : > { %3121 = vmatpush1.bf16.msra.mxu0 %v9117_v31  ;;  %3162 = vmatpush1.bf16.msra.mxu1 %v9118_v24  ;;  %v9128_v31 = vld [vmem:[#allocation33_spill] sm:$0xff]  ;;  %v9129_v24 = vld [vmem:[#allocation34_spill] sm:$0xff] }
 0x5bd   : > { %3122 = vmatprep.subr.bf16.mxu0 %v9119_v36  ;;  %3163 = vmatprep.subr.bf16.mxu1 %v9120_v27  ;;  %v9130_v36 = vld [vmem:[#allocation35_spill] sm:$0xff]  ;;  %v9131_v27 = vld [vmem:[#allocation36_spill] sm:$0xff] }
 0x5c0   : > { %3123 = vmatpush1.bf16.msra.mxu0 %v9121_v20  ;;  %3164 = vmatpush1.bf16.msra.mxu1 %v9122_v1  ;;  %v9132_v20 = vld [vmem:[#allocation37_spill] sm:$0xff]  ;;  %v9133_v1 = vld [vmem:[#allocation38_spill] sm:$0xff] }
 0x5c1   : > { %3124 = vmatprep.subr.bf16.mxu0 %v9123_v16  ;;  %3165 = vmatprep.subr.bf16.mxu1 %v9124_v40  ;;  %v9134_v16 = vld [vmem:[#allocation39_spill] sm:$0xff]  ;;  %v9135_v40 = vld [vmem:[#allocation40_spill] sm:$0xff] }
 0x5c4   : > { %3125 = vmatpush1.bf16.msra.mxu0 %v9125_v9  ;;  %3166 = vmatpush1.bf16.msra.mxu1 %v9126_v63  ;;  %v9136_v9 = vld [vmem:[#allocation41_spill] sm:$0xff]  ;;  %v9137_v63 = vld [vmem:[#allocation42_spill] sm:$0xff] }
 0x5c5   : > { %3126 = vmatprep.subr.bf16.mxu0 %v9127_v12  ;;  %3167 = vmatprep.subr.bf16.mxu1 %v9128_v31  ;;  %v9138_v12 = vld [vmem:[#allocation43_spill] sm:$0xff]  ;;  %v9139_v31 = vld [vmem:[#allocation44_spill] sm:$0xff] }
 0x5c8   : > { %3127 = vmatpush1.bf16.msra.mxu0 %v9129_v24  ;;  %3168 = vmatpush1.bf16.msra.mxu1 %v9130_v36  ;;  %v9140_v24 = vld [vmem:[#allocation45_spill] sm:$0xff]  ;;  %v9141_v36 = vld [vmem:[#allocation46_spill] sm:$0xff] }
 0x5c9   : > { %3128 = vmatprep.subr.bf16.mxu0 %v9131_v27  ;;  %3169 = vmatprep.subr.bf16.mxu1 %v9132_v20  ;;  %v9142_v27 = vld [vmem:[#allocation47_spill] sm:$0xff]  ;;  %v9143_v20 = vld [vmem:[#allocation48_spill] sm:$0xff] }
 0x5cc   : > { %3129 = vmatpush1.bf16.msra.mxu0 %v9133_v1  ;;  %3170 = vmatpush1.bf16.msra.mxu1 %v9134_v16  ;;  %v9144_v1 = vld [vmem:[#allocation49_spill] sm:$0xff]  ;;  %v9145_v16 = vld [vmem:[#allocation50_spill] sm:$0xff] }
 0x5cd   : > { %3130 = vmatprep.subr.bf16.mxu0 %v9135_v40  ;;  %3171 = vmatprep.subr.bf16.mxu1 %v9136_v9  ;;  %v9146_v40 = vld [vmem:[#allocation51_spill] sm:$0xff]  ;;  %v9147_v9 = vld [vmem:[#allocation52_spill] sm:$0xff] }
 0x5d0   : > { %3131 = vmatpush1.bf16.msra.mxu0 %v9137_v63  ;;  %3172 = vmatpush1.bf16.msra.mxu1 %v9138_v12  ;;  %v9148_v63 = vld [vmem:[#allocation53_spill] sm:$0xff]  ;;  %v9149_v12 = vld [vmem:[#allocation54_spill] sm:$0xff] }
 0x5d1   : > { %3132 = vmatprep.subr.bf16.mxu0 %v9139_v31  ;;  %3173 = vmatprep.subr.bf16.mxu1 %v9140_v24  ;;  %v9150_v31 = vld [vmem:[#allocation55_spill] sm:$0xff]  ;;  %v9151_v24 = vld [vmem:[#allocation56_spill] sm:$0xff] }
 0x5d4   : > { %3133 = vmatpush1.bf16.msra.mxu0 %v9141_v36  ;;  %3174 = vmatpush1.bf16.msra.mxu1 %v9142_v27  ;;  %v9152_v36 = vld [vmem:[#allocation57_spill] sm:$0xff]  ;;  %v9153_v27 = vld [vmem:[#allocation58_spill] sm:$0xff] }
 0x5d5   : > { %3134 = vmatprep.subr.bf16.mxu0 %v9143_v20  ;;  %3175 = vmatprep.subr.bf16.mxu1 %v9144_v1  ;;  %v9154_v20 = vld [vmem:[#allocation59_spill] sm:$0xff]  ;;  %v9155_v1 = vld [vmem:[#allocation60_spill] sm:$0xff] }
 0x5d8   : > { %3135 = vmatpush1.bf16.msra.mxu0 %v9145_v16  ;;  %3176 = vmatpush1.bf16.msra.mxu1 %v9146_v40  ;;  %v9156_v16 = vld [vmem:[#allocation61_spill] sm:$0xff]  ;;  %v9157_v40 = vld [vmem:[#allocation62_spill] sm:$0xff] }
 0x5d9   : > { %3136 = vmatprep.subr.bf16.mxu0 %v9147_v9  ;;  %3177 = vmatprep.subr.bf16.mxu1 %v9148_v63  ;;  %v9158_v9 = vld [vmem:[#allocation63_spill] sm:$0xff]  ;;  %v9159_v63 = vld [vmem:[#allocation64_spill] sm:$0xff] }
 0x5dc   : > { %3137 = vmatpush1.bf16.msra.mxu0 %v9149_v12  ;;  %3178 = vmatpush1.bf16.msra.mxu1 %v9150_v31  ;;  %v9160_v12 = vld [vmem:[#allocation65_spill] sm:$0xff]  ;;  %v9161_v31 = vld [vmem:[#allocation66_spill] sm:$0xff] }
 0x5dd   : > { %3138 = vmatprep.subr.bf16.mxu0 %v9151_v24  ;;  %3179 = vmatprep.subr.bf16.mxu1 %v9152_v36  ;;  %v9162_v24 = vld [vmem:[#allocation67_spill] sm:$0xff]  ;;  %v9163_v36 = vld [vmem:[#allocation68_spill] sm:$0xff] }
 0x5e0   : > { %3139 = vmatpush1.bf16.msra.mxu0 %v9153_v27  ;;  %3180 = vmatpush1.bf16.msra.mxu1 %v9154_v20  ;;  %v9164_v27 = vld [vmem:[#allocation69_spill] sm:$0xff] }
 0x5e1   : > { %3140 = vmatprep.subr.bf16.mxu0 %v9155_v1  ;;  %3181 = vmatprep.subr.bf16.mxu1 %v9156_v16 }
 0x5e4   : > { %3141 = vmatpush1.bf16.msra.mxu0 %v9157_v40  ;;  %3182 = vmatpush1.bf16.msra.mxu1 %v9158_v9 }
 0x5e5   : > { %3142 = vmatprep.subr.bf16.mxu0 %v9159_v63  ;;  %3183 = vmatprep.subr.bf16.mxu1 %v9160_v12 }
 0x5e8   : > { %3143 = vmatpush1.bf16.msra.mxu0 %v9161_v31  ;;  %3184 = vmatpush1.bf16.msra.mxu1 %v9162_v24 }
 0x5e9   : > { %3194 = vmatprep.subr.bf16.mxu0 %v9163_v36  ;;  %3235 = vmatprep.subr.bf16.mxu1 %v9164_v27 }
 0x63e   : > { %v2903_v20 = vpop.f32.mrb[64].mxu0  ;;  %v2944_v1 = vpop.f32.mrb[64].mxu1 }
 0x63f   : > { %v3033_v16 = vadd.f32 %v2903_v20, %v9165_v18  ;;  %v3035_v40 = vadd.f32 %v2944_v1, %v9166_v23  ;;  %v2905_v49 = vpop.f32.mrb[65].mxu0  ;;  %v2946_v9 = vpop.f32.mrb[65].mxu1 }
 0x640   : > { %v3034_v63 = vadd.f32 %v2905_v49, %v9167_v21  ;;  %v3036_v12 = vadd.f32 %v2946_v9, %v9168_v0  ;;  %v2907_v13 = vpop.f32.mrb[66].mxu0  ;;  %v2948_v31 = vpop.f32.mrb[66].mxu1 }
 0x641   : > { %v2908_v56 = vpop.f32.mrb[67].mxu0  ;;  %v2949_v24 = vpop.f32.mrb[67].mxu1  ;;  %v5080_v55 = vmul.f32 -1.442695, %v3033_v16  ;;  %v5082_v36 = vmul.f32 -1.442695, %v3035_v40 }
 0x642   : > { %v5081_v22 = vmul.f32 -1.442695, %v3034_v63  ;;  %v5083_v27 = vmul.f32 -1.442695, %v3036_v12  ;;  %v9169_v24 = vld [vmem:[#allocation173_spill] sm:$0xff]  ;;  %v9170_v40 = vld [vmem:[#allocation175_spill] sm:$0xff] }
 0x643   : > { %5570 = vpow2.f32 %v5080_v55  ;;  %v9172_v63 = vld [vmem:[#allocation176_spill] sm:$0xff] }
 0x644   : > { %5572 = vpow2.f32 %v5082_v36 }
 0x645   : > { %5574 = vpow2.f32 %v5081_v22 }
 0x646   : > { %5576 = vpow2.f32 %v5083_v27  ;;  %v9171_v27 = vld [vmem:[#allocation174_spill] sm:$0xff] }
 0x64d   : > { %v5571_v18 = vpop.eup %5570 }
 0x64e   : > { %v5573_v23 = vpop.eup %5572  ;;  %v3059_v25 = vadd.f32 1.0, %v5571_v18 }
 0x64f   : > { %v5575_v20 = vpop.eup %5574  ;;  %v3061_v21 = vadd.f32 1.0, %v5573_v23 }
 0x650   : > { %v5577_v1 = vpop.eup %5576  ;;  %v3060_v49 = vadd.f32 1.0, %v5575_v20  ;;  %5578 = vrcp.f32 %v3059_v25 }
 0x651   : > { %v3062_v0 = vadd.f32 1.0, %v5577_v1  ;;  %5580 = vrcp.f32 %v3061_v21 }
 0x652   : > { %5582 = vrcp.f32 %v3060_v49 }
 0x653   : > { %5584 = vrcp.f32 %v3062_v0 }
 0x65a   : > { %v5579_v21 = vpop.eup %5578 }
 0x65b   : > { %v5581_v49 = vpop.eup %5580 }
 0x67e   : > { %v2985_v56 = vpop.f32.mrb[68].mxu0  ;;  %v3026_v13 = vpop.f32.mrb[68].mxu1 }
 0x67f   : > { %v3037_v16 = vadd.f32 %v2985_v56, %v9169_v24  ;;  %v3039_v55 = vadd.f32 %v3026_v13, %v9170_v40  ;;  %v2987_v36 = vpop.f32.mrb[69].mxu0  ;;  %v3028_v22 = vpop.f32.mrb[69].mxu1  ;;  %v3079_v40 = vmul.f32 %v5581_v49, %v7423_v51  ;;  %v9173_v49 = vld [vmem:[#allocation111_spill] sm:$0xff] }
 0x680   : > { %v3038_v9 = vadd.f32 %v2987_v36, %v9171_v27  ;;  %v3040_v12 = vadd.f32 %v3028_v22, %v9172_v63  ;;  %v2989_v31 = vpop.f32.mrb[70].mxu0  ;;  %v3030_v18 = vpop.f32.mrb[70].mxu1 }
 0x681   : > { %v5084_v23 = vmul.f32 -1.442695, %v3037_v16  ;;  %5586 = vtanh.f32 %v3039_v55  ;;  %v2990_v25 = vpop.f32.mrb[71].mxu0  ;;  %v3031_v20 = vpop.f32.mrb[71].mxu1 }
 0x682   : > { %v5085_v1 = vmul.f32 -1.442695, %v3038_v9  ;;  %5588 = vtanh.f32 %v3040_v12  ;;  %v5583_v56 = vpop.eup %5582 }
 0x683   : > { %5590 = vpow2.f32 %v5084_v23  ;;  %v5585_v13 = vpop.eup %5584 }
 0x684   : > { %5592 = vpow2.f32 %v5085_v1  ;;  %v3080_v27 = vmul.f32 %v5585_v13, %v7425_v15  ;;  %v9175_v13 = vld [vmem:[#allocation113_spill] sm:$0xff] }
 0x68b   : > { %v5587_v24 = vpop.eup %5586 }
 0x68c   : > { %v5589_v0 = vpop.eup %5588  ;;  %v3081_v36 = vmul.f32 %v5587_v24, %v5579_v21  ;;  %v9176_v24 = vld [vmem:[#allocation114_spill] sm:$0xff] }
 0x68d   : > { %v5591_v22 = vpop.eup %5590  ;;  %v3082_v16 = vmul.f32 %v5589_v0, %v5583_v56  ;;  %v9174_v56 = vld [vmem:[#allocation112_spill] sm:$0xff]  ;;  %v9177_v0 = vld [vmem:[#allocation115_spill] sm:$0xff] }
 0x68e   : > { %v5593_v55 = vpop.eup %5592  ;;  %v3063_v63 = vadd.f32 1.0, %v5591_v22  ;;  %v7573_v31 = vadd.f32 %v3081_v36, %v3079_v40  ;;  %v9178_v40 = vld [vmem:[#allocation116_spill] sm:$0xff]  ;;  %v9179_v36 = vld [vmem:[#allocation117_spill] sm:$0xff]  ;;  %v9180_v22 = vld [vmem:[#allocation118_spill] sm:$0xff] }
 0x68f   : > { %v3064_v9 = vadd.f32 1.0, %v5593_v55  ;;  %v7575_v12 = vadd.f32 %v3082_v16, %v3080_v27  ;;  %v9181_v27 = vld [vmem:[#allocation119_spill] sm:$0xff]  ;;  %v9182_v16 = vld [vmem:[#allocation120_spill] sm:$0xff]  ;;  %v9183_v55 = vld [vmem:[#allocation121_spill] sm:$0xff] }
 0x690   : > { %5594 = vrcp.f32 %v3063_v63  ;;  %v9184_v63 = vld [vmem:[#allocation122_spill] sm:$0xff] }
 0x691   : > { %5596 = vtanh.f32 %v7573_v31 }
 0x692   : > { %5598 = vrcp.f32 %v3064_v9  ;;  %v9185_v9 = vld [vmem:[#allocation123_spill] sm:$0xff] }
 0x693   : > { %5600 = vtanh.f32 %v7575_v12 }
 0x69a   : > { %v5595_v18 = vpop.eup %5594 }
 0x69b   : > { %v5597_v51 = vpop.eup %5596 }
 0x69c   : > { %v5599_v23 = vpop.eup %5598  ;;  %v3087_v20 = vmul.f32 %v5597_v51, %v5595_v18  ;;  %v9186_v18 = vld [vmem:[#allocation124_spill] sm:$0xff]  ;;  %v9187_v51 = vld [vmem:[#allocation125_spill] sm:$0xff] }
 0x69d   : > { %v5601_v25 = vpop.eup %5600 }
 0x69e   : > { %v3088_v15 = vmul.f32 %v5601_v25, %v5599_v23  ;;  %v7579_v21 = vpack.c.bf16 %v3087_v20, %v3087_v20  ;;  %v9188_v23 = vld [vmem:[#allocation126_spill] sm:$0xff]  ;;  %v9189_v25 = vld [vmem:[#allocation127_spill] sm:$0xff]  ;;  %v9190_v20 = vld [vmem:[#allocation128_spill] sm:$0xff] }
 0x6a0   : > { %v3111_v1 = vpack.c.bf16 %v3088_v15, %v3088_v15  ;;  %v9191_v15 = vld [vmem:[#allocation129_spill] sm:$0xff] }
 0x6a2   : > { %3144 = vmatprep.mubr.bf16.mxu0 %v3111_v1  ;;  %3185 = vmatprep.mubr.bf16.mxu1 %v3111_v1 }
 0x6a3   : > { %3145 = vmatmul.mubr.bf16.vlgmr.msra.gmra.mrb[72].mxu0 %v7579_v21  ;;  %3186 = vmatmul.mubr.bf16.vlgmr.msra.gmra.mrb[72].mxu1 %v7579_v21 }
 0x6a4   : > { %3195 = vmatpush1.bf16.msra.mxu0 %v8782_v4  ;;  %3236 = vmatpush1.bf16.msra.mxu1 %v8783_v32 }
 0x6a5   : > { %3226 = vmatprep.mubr.bf16.mxu0 %v3111_v1  ;;  %3267 = vmatprep.mubr.bf16.mxu1 %v3111_v1  ;;  %v9192_v1 = vld [vmem:[#allocation130_spill] sm:$0xff] }
 0x6a6   : > { %3196 = vmatprep.subr.bf16.mxu0 %v8784_v48  ;;  %3237 = vmatprep.subr.bf16.mxu1 %v8785_v8 }
 0x6a8   : > { %3197 = vmatpush1.bf16.msra.mxu0 %v8786_v5  ;;  %3238 = vmatpush1.bf16.msra.mxu1 %v8787_v57 }
 0x6a9   : > { %3198 = vmatprep.subr.bf16.mxu0 %v8788_v28  ;;  %3239 = vmatprep.subr.bf16.mxu1 %v8789_v14 }
 0x6ac   : > { %3199 = vmatpush1.bf16.msra.mxu0 %v8790_v33  ;;  %3240 = vmatpush1.bf16.msra.mxu1 %v8791_v26 }
 0x6ad   : > { %3200 = vmatprep.subr.bf16.mxu0 %v8792_v2  ;;  %3241 = vmatprep.subr.bf16.mxu1 %v8793_v58 }
 0x6b0   : > { %3201 = vmatpush1.bf16.msra.mxu0 %v8794_v30  ;;  %3242 = vmatpush1.bf16.msra.mxu1 %v8795_v41 }
 0x6b1   : > { %3202 = vmatprep.subr.bf16.mxu0 %v8796_v19  ;;  %3243 = vmatprep.subr.bf16.mxu1 %v8797_v17 }
 0x6b4   : > { %3203 = vmatpush1.bf16.msra.mxu0 %v8798_v50  ;;  %3244 = vmatpush1.bf16.msra.mxu1 %v8799_v37 }
 0x6b5   : > { %3204 = vmatprep.subr.bf16.mxu0 %v8800_v39  ;;  %3245 = vmatprep.subr.bf16.mxu1 %v8801_v38 }
 0x6b8   : > { %3205 = vmatpush1.bf16.msra.mxu0 %v8888_v52  ;;  %3246 = vmatpush1.bf16.msra.mxu1 %v8889_v44 }
 0x6b9   : > { %3206 = vmatprep.subr.bf16.mxu0 %v8890_v45  ;;  %3247 = vmatprep.subr.bf16.mxu1 %v8891_v62 }
 0x6bc   : > { %3207 = vmatpush1.bf16.msra.mxu0 %v8892_v46  ;;  %3248 = vmatpush1.bf16.msra.mxu1 %v8893_v6 }
 0x6bd   : > { %3208 = vmatprep.subr.bf16.mxu0 %v8894_v7  ;;  %3249 = vmatprep.subr.bf16.mxu1 %v8895_v35 }
 0x6c0   : > { %3209 = vmatpush1.bf16.msra.mxu0 %v8896_v59  ;;  %3250 = vmatpush1.bf16.msra.mxu1 %v8983_v29 }
 0x6c1   : > { %3210 = vmatprep.subr.bf16.mxu0 %v8898_v43  ;;  %3251 = vmatprep.subr.bf16.mxu1 %v8899_v11 }
 0x6c4   : > { %3211 = vmatpush1.bf16.msra.mxu0 %v8900_v10  ;;  %3252 = vmatpush1.bf16.msra.mxu1 %v8901_v54 }
 0x6c5   : > { %3212 = vmatprep.subr.bf16.mxu0 %v8902_v42  ;;  %3253 = vmatprep.subr.bf16.mxu1 %v8903_v53 }
 0x6c8   : > { %3213 = vmatpush1.bf16.msra.mxu0 %v8904_v34  ;;  %3254 = vmatpush1.bf16.msra.mxu1 %v8905_v60 }
 0x6c9   : > { %3214 = vmatprep.subr.bf16.mxu0 %v8906_v47  ;;  %3255 = vmatprep.subr.bf16.mxu1 %v8907_v61 }
 0x6cc   : > { %3215 = vmatpush1.bf16.msra.mxu0 %v8908_v3  ;;  %3256 = vmatpush1.bf16.msra.mxu1 %v9173_v49 }
 0x6cd   : > { %3216 = vmatprep.subr.bf16.mxu0 %v9174_v56  ;;  %3257 = vmatprep.subr.bf16.mxu1 %v9175_v13 }
 0x6d0   : > { %3217 = vmatpush1.bf16.msra.mxu0 %v9176_v24  ;;  %3258 = vmatpush1.bf16.msra.mxu1 %v9177_v0 }
 0x6d1   : > { %3218 = vmatprep.subr.bf16.mxu0 %v9178_v40  ;;  %3259 = vmatprep.subr.bf16.mxu1 %v9179_v36  ;;  %v9262_v36 = vld [vmem:[#allocation150_spill] sm:$0xff]  ;;  %v9263_v40 = vld [vmem:[#allocation152_spill] sm:$0xff] }
 0x6d4   : > { %3219 = vmatpush1.bf16.msra.mxu0 %v9180_v22  ;;  %3260 = vmatpush1.bf16.msra.mxu1 %v9181_v27  ;;  %v9261_v27 = vld [vmem:[#allocation151_spill] sm:$0xff] }
 0x6d5   : > { %3220 = vmatprep.subr.bf16.mxu0 %v9182_v16  ;;  %3261 = vmatprep.subr.bf16.mxu1 %v9183_v55  ;;  %v9193_v16 = vld [vmem:[#allocation131_spill] sm:$0xff]  ;;  %v9194_v55 = vld [vmem:[#allocation4_spill] sm:$0xff] }
 0x6d8   : > { %3221 = vmatpush1.bf16.msra.mxu0 %v9184_v63  ;;  %3262 = vmatpush1.bf16.msra.mxu1 %v9185_v9  ;;  %v9195_v63 = vld [vmem:[#allocation5_spill] sm:$0xff] }
 0x6d9   : > { %3222 = vmatprep.subr.bf16.mxu0 %v9186_v18  ;;  %3263 = vmatprep.subr.bf16.mxu1 %v9187_v51  ;;  %v9196_v51 = vld [vmem:[#allocation6_spill] sm:$0xff]  ;;  %v9205_v18 = vld [vmem:[#allocation15_spill] sm:$0xff]  ;;  %v9260_v9 = vld [vmem:[#allocation149_spill] sm:$0xff] }
 0x6dc   : > { %3223 = vmatpush1.bf16.msra.mxu0 %v9188_v23  ;;  %3264 = vmatpush1.bf16.msra.mxu1 %v9189_v25  ;;  %v9197_v23 = vld [vmem:[#allocation7_spill] sm:$0xff]  ;;  %v9198_v25 = vld [vmem:[#allocation8_spill] sm:$0xff] }
 0x6dd   : > { %3224 = vmatprep.subr.bf16.mxu0 %v9190_v20  ;;  %3265 = vmatprep.subr.bf16.mxu1 %v9191_v15  ;;  %v9199_v20 = vld [vmem:[#allocation9_spill] sm:$0xff]  ;;  %v9200_v15 = vld [vmem:[#allocation10_spill] sm:$0xff] }
 0x6e0   : > { %3225 = vmatpush1.bf16.msra.mxu0 %v9192_v1  ;;  %3266 = vmatpush1.bf16.msra.mxu1 %v9193_v16  ;;  %v9201_v1 = vld [vmem:[#allocation11_spill] sm:$0xff]  ;;  %v9202_v16 = vld [vmem:[#allocation12_spill] sm:$0xff] }
 0x6e1   : > { %3355 = vmatprep.subr.bf16.mxu0 %v9194_v55  ;;  %3396 = vmatprep.subr.bf16.mxu1 %v9195_v63  ;;  %v9203_v55 = vld [vmem:[#allocation13_spill] sm:$0xff]  ;;  %v9204_v63 = vld [vmem:[#allocation14_spill] sm:$0xff] }
 0x6e3   : > { %3227 = vmatmul.mubr.bf16.vlgmr.msra.gmra.mrb[76].mxu0 %v7579_v21  ;;  %3268 = vmatmul.mubr.bf16.vlgmr.msra.gmra.mrb[76].mxu1 %v7579_v21  ;;  %v9206_v21 = vld [vmem:[#allocation16_spill] sm:$0xff] }
 0x6e4   : > { %3356 = vmatpush1.bf16.msra.mxu0 %v9196_v51  ;;  %3397 = vmatpush1.bf16.msra.mxu1 %v9197_v23  ;;  %v9207_v51 = vld [vmem:[#allocation17_spill] sm:$0xff]  ;;  %v9208_v23 = vld [vmem:[#allocation18_spill] sm:$0xff] }
 0x6e5   : > { %3357 = vmatprep.subr.bf16.mxu0 %v9198_v25  ;;  %3398 = vmatprep.subr.bf16.mxu1 %v9199_v20  ;;  %v9209_v25 = vld [vmem:[#allocation19_spill] sm:$0xff]  ;;  %v9210_v20 = vld [vmem:[#allocation20_spill] sm:$0xff] }
 0x6e8   : > { %3358 = vmatpush1.bf16.msra.mxu0 %v9200_v15  ;;  %3399 = vmatpush1.bf16.msra.mxu1 %v9201_v1  ;;  %v9211_v15 = vld [vmem:[#allocation21_spill] sm:$0xff]  ;;  %v9212_v1 = vld [vmem:[#allocation22_spill] sm:$0xff] }
 0x6e9   : > { %3359 = vmatprep.subr.bf16.mxu0 %v9202_v16  ;;  %3400 = vmatprep.subr.bf16.mxu1 %v9203_v55  ;;  %v9213_v16 = vld [vmem:[#allocation23_spill] sm:$0xff]  ;;  %v9214_v55 = vld [vmem:[#allocation24_spill] sm:$0xff] }
 0x6ec   : > { %3360 = vmatpush1.bf16.msra.mxu0 %v9204_v63  ;;  %3401 = vmatpush1.bf16.msra.mxu1 %v9205_v18  ;;  %v9215_v63 = vld [vmem:[#allocation25_spill] sm:$0xff]  ;;  %v9216_v18 = vld [vmem:[#allocation26_spill] sm:$0xff] }
 0x6ed   : > { %3361 = vmatprep.subr.bf16.mxu0 %v9206_v21  ;;  %3402 = vmatprep.subr.bf16.mxu1 %v9207_v51  ;;  %v9217_v21 = vld [vmem:[#allocation27_spill] sm:$0xff]  ;;  %v9218_v51 = vld [vmem:[#allocation28_spill] sm:$0xff] }
 0x6f0   : > { %3362 = vmatpush1.bf16.msra.mxu0 %v9208_v23  ;;  %3403 = vmatpush1.bf16.msra.mxu1 %v9209_v25  ;;  %v9219_v23 = vld [vmem:[#allocation29_spill] sm:$0xff]  ;;  %v9220_v25 = vld [vmem:[#allocation30_spill] sm:$0xff] }
 0x6f1   : > { %3363 = vmatprep.subr.bf16.mxu0 %v9210_v20  ;;  %3404 = vmatprep.subr.bf16.mxu1 %v9211_v15  ;;  %v9221_v20 = vld [vmem:[#allocation31_spill] sm:$0xff]  ;;  %v9222_v15 = vld [vmem:[#allocation32_spill] sm:$0xff] }
 0x6f4   : > { %3364 = vmatpush1.bf16.msra.mxu0 %v9212_v1  ;;  %3405 = vmatpush1.bf16.msra.mxu1 %v9213_v16  ;;  %v9223_v1 = vld [vmem:[#allocation33_spill] sm:$0xff]  ;;  %v9224_v16 = vld [vmem:[#allocation34_spill] sm:$0xff] }
 0x6f5   : > { %3365 = vmatprep.subr.bf16.mxu0 %v9214_v55  ;;  %3406 = vmatprep.subr.bf16.mxu1 %v9215_v63  ;;  %v9225_v55 = vld [vmem:[#allocation35_spill] sm:$0xff]  ;;  %v9226_v63 = vld [vmem:[#allocation36_spill] sm:$0xff] }
 0x6f8   : > { %3366 = vmatpush1.bf16.msra.mxu0 %v9216_v18  ;;  %3407 = vmatpush1.bf16.msra.mxu1 %v9217_v21  ;;  %v9227_v18 = vld [vmem:[#allocation37_spill] sm:$0xff]  ;;  %v9228_v21 = vld [vmem:[#allocation38_spill] sm:$0xff] }
 0x6f9   : > { %3367 = vmatprep.subr.bf16.mxu0 %v9218_v51  ;;  %3408 = vmatprep.subr.bf16.mxu1 %v9219_v23  ;;  %v9229_v51 = vld [vmem:[#allocation39_spill] sm:$0xff]  ;;  %v9230_v23 = vld [vmem:[#allocation40_spill] sm:$0xff] }
 0x6fc   : > { %3368 = vmatpush1.bf16.msra.mxu0 %v9220_v25  ;;  %3409 = vmatpush1.bf16.msra.mxu1 %v9221_v20  ;;  %v9231_v25 = vld [vmem:[#allocation41_spill] sm:$0xff]  ;;  %v9232_v20 = vld [vmem:[#allocation42_spill] sm:$0xff] }
 0x6fd   : > { %3369 = vmatprep.subr.bf16.mxu0 %v9222_v15  ;;  %3410 = vmatprep.subr.bf16.mxu1 %v9223_v1  ;;  %v9233_v15 = vld [vmem:[#allocation43_spill] sm:$0xff]  ;;  %v9234_v1 = vld [vmem:[#allocation44_spill] sm:$0xff] }
 0x700   : > { %3370 = vmatpush1.bf16.msra.mxu0 %v9224_v16  ;;  %3411 = vmatpush1.bf16.msra.mxu1 %v9225_v55  ;;  %v9235_v16 = vld [vmem:[#allocation45_spill] sm:$0xff]  ;;  %v9236_v55 = vld [vmem:[#allocation46_spill] sm:$0xff] }
 0x701   : > { %3371 = vmatprep.subr.bf16.mxu0 %v9226_v63  ;;  %3412 = vmatprep.subr.bf16.mxu1 %v9227_v18  ;;  %v9237_v63 = vld [vmem:[#allocation47_spill] sm:$0xff]  ;;  %v9238_v18 = vld [vmem:[#allocation48_spill] sm:$0xff] }
 0x704   : > { %3372 = vmatpush1.bf16.msra.mxu0 %v9228_v21  ;;  %3413 = vmatpush1.bf16.msra.mxu1 %v9229_v51  ;;  %v9239_v21 = vld [vmem:[#allocation49_spill] sm:$0xff]  ;;  %v9240_v51 = vld [vmem:[#allocation50_spill] sm:$0xff] }
 0x705   : > { %3373 = vmatprep.subr.bf16.mxu0 %v9230_v23  ;;  %3414 = vmatprep.subr.bf16.mxu1 %v9231_v25  ;;  %v9241_v23 = vld [vmem:[#allocation51_spill] sm:$0xff]  ;;  %v9242_v25 = vld [vmem:[#allocation52_spill] sm:$0xff] }
 0x708   : > { %3374 = vmatpush1.bf16.msra.mxu0 %v9232_v20  ;;  %3415 = vmatpush1.bf16.msra.mxu1 %v9233_v15  ;;  %v9243_v20 = vld [vmem:[#allocation53_spill] sm:$0xff]  ;;  %v9244_v15 = vld [vmem:[#allocation54_spill] sm:$0xff] }
 0x709   : > { %3375 = vmatprep.subr.bf16.mxu0 %v9234_v1  ;;  %3416 = vmatprep.subr.bf16.mxu1 %v9235_v16  ;;  %v9245_v1 = vld [vmem:[#allocation55_spill] sm:$0xff]  ;;  %v9246_v16 = vld [vmem:[#allocation56_spill] sm:$0xff] }
 0x70c   : > { %3376 = vmatpush1.bf16.msra.mxu0 %v9236_v55  ;;  %3417 = vmatpush1.bf16.msra.mxu1 %v9237_v63  ;;  %v9247_v55 = vld [vmem:[#allocation57_spill] sm:$0xff]  ;;  %v9248_v63 = vld [vmem:[#allocation58_spill] sm:$0xff] }
 0x70d   : > { %3377 = vmatprep.subr.bf16.mxu0 %v9238_v18  ;;  %3418 = vmatprep.subr.bf16.mxu1 %v9239_v21  ;;  %v9249_v18 = vld [vmem:[#allocation59_spill] sm:$0xff]  ;;  %v9250_v21 = vld [vmem:[#allocation60_spill] sm:$0xff] }
 0x710   : > { %3378 = vmatpush1.bf16.msra.mxu0 %v9240_v51  ;;  %3419 = vmatpush1.bf16.msra.mxu1 %v9241_v23  ;;  %v9251_v51 = vld [vmem:[#allocation61_spill] sm:$0xff]  ;;  %v9252_v23 = vld [vmem:[#allocation62_spill] sm:$0xff] }
 0x711   : > { %3379 = vmatprep.subr.bf16.mxu0 %v9242_v25  ;;  %3420 = vmatprep.subr.bf16.mxu1 %v9243_v20  ;;  %v9253_v25 = vld [vmem:[#allocation63_spill] sm:$0xff]  ;;  %v9254_v20 = vld [vmem:[#allocation64_spill] sm:$0xff] }
 0x714   : > { %3380 = vmatpush1.bf16.msra.mxu0 %v9244_v15  ;;  %3421 = vmatpush1.bf16.msra.mxu1 %v9245_v1  ;;  %v9255_v15 = vld [vmem:[#allocation65_spill] sm:$0xff]  ;;  %v9256_v1 = vld [vmem:[#allocation66_spill] sm:$0xff] }
 0x715   : > { %3381 = vmatprep.subr.bf16.mxu0 %v9246_v16  ;;  %3422 = vmatprep.subr.bf16.mxu1 %v9247_v55  ;;  %v9257_v16 = vld [vmem:[#allocation67_spill] sm:$0xff]  ;;  %v9258_v55 = vld [vmem:[#allocation68_spill] sm:$0xff] }
 0x718   : > { %3382 = vmatpush1.bf16.msra.mxu0 %v9248_v63  ;;  %3423 = vmatpush1.bf16.msra.mxu1 %v9249_v18  ;;  %v9259_v63 = vld [vmem:[#allocation69_spill] sm:$0xff] }
 0x719   : > { %3383 = vmatprep.subr.bf16.mxu0 %v9250_v21  ;;  %3424 = vmatprep.subr.bf16.mxu1 %v9251_v51 }
 0x71c   : > { %3384 = vmatpush1.bf16.msra.mxu0 %v9252_v23  ;;  %3425 = vmatpush1.bf16.msra.mxu1 %v9253_v25 }
 0x71d   : > { %3385 = vmatprep.subr.bf16.mxu0 %v9254_v20  ;;  %3426 = vmatprep.subr.bf16.mxu1 %v9255_v15 }
 0x720   : > { %3386 = vmatpush1.bf16.msra.mxu0 %v9256_v1  ;;  %3427 = vmatpush1.bf16.msra.mxu1 %v9257_v16 }
 0x721   : > { %3437 = vmatprep.subr.bf16.mxu0 %v9258_v55  ;;  %3478 = vmatprep.subr.bf16.mxu1 %v9259_v63 }
 0x776   : > { %v3146_v18 = vpop.f32.mrb[72].mxu0  ;;  %v3187_v21 = vpop.f32.mrb[72].mxu1 }
 0x777   : > { %v3276_v51 = vadd.f32 %v3146_v18, %v9260_v9  ;;  %v3278_v23 = vadd.f32 %v3187_v21, %v9261_v27  ;;  %v3148_v22 = vpop.f32.mrb[73].mxu0  ;;  %v3189_v25 = vpop.f32.mrb[73].mxu1 }
 0x778   : > { %v3277_v20 = vadd.f32 %v3148_v22, %v9262_v36  ;;  %v3279_v15 = vadd.f32 %v3189_v25, %v9263_v40  ;;  %v3150_v0 = vpop.f32.mrb[74].mxu0  ;;  %v3191_v1 = vpop.f32.mrb[74].mxu1 }
 0x779   : > { %v3151_v24 = vpop.f32.mrb[75].mxu0  ;;  %v3192_v16 = vpop.f32.mrb[75].mxu1  ;;  %v5086_v13 = vmul.f32 -1.442695, %v3276_v51  ;;  %v5088_v55 = vmul.f32 -1.442695, %v3278_v23 }
 0x77a   : > { %v5087_v56 = vmul.f32 -1.442695, %v3277_v20  ;;  %v5089_v63 = vmul.f32 -1.442695, %v3279_v15  ;;  %v9264_v16 = vld [vmem:[#allocation177_spill] sm:$0xff]  ;;  %v9265_v23 = vld [vmem:[#allocation179_spill] sm:$0xff] }
 0x77b   : > { %5602 = vpow2.f32 %v5086_v13  ;;  %v9267_v20 = vld [vmem:[#allocation180_spill] sm:$0xff] }
 0x77c   : > { %5604 = vpow2.f32 %v5088_v55 }
 0x77d   : > { %5606 = vpow2.f32 %v5087_v56 }
 0x77e   : > { %5608 = vpow2.f32 %v5089_v63  ;;  %v9266_v63 = vld [vmem:[#allocation178_spill] sm:$0xff] }
 0x785   : > { %v5603_v9 = vpop.eup %5602 }
 0x786   : > { %v5605_v27 = vpop.eup %5604  ;;  %v3302_v49 = vadd.f32 1.0, %v5603_v9 }
 0x787   : > { %v5607_v18 = vpop.eup %5606  ;;  %v3304_v36 = vadd.f32 1.0, %v5605_v27 }
 0x788   : > { %v5609_v21 = vpop.eup %5608  ;;  %v3303_v22 = vadd.f32 1.0, %v5607_v18  ;;  %5610 = vrcp.f32 %v3302_v49 }
 0x789   : > { %v3305_v40 = vadd.f32 1.0, %v5609_v21  ;;  %5612 = vrcp.f32 %v3304_v36 }
 0x78a   : > { %5614 = vrcp.f32 %v3303_v22 }
 0x78b   : > { %5616 = vrcp.f32 %v3305_v40 }
 0x792   : > { %v5611_v36 = vpop.eup %5610 }
 0x793   : > { %v5613_v22 = vpop.eup %5612 }
 0x7b6   : > { %v3228_v24 = vpop.f32.mrb[76].mxu0  ;;  %v3269_v0 = vpop.f32.mrb[76].mxu1 }
 0x7b7   : > { %v3280_v51 = vadd.f32 %v3228_v24, %v9264_v16  ;;  %v3282_v13 = vadd.f32 %v3269_v0, %v9265_v23  ;;  %v3230_v55 = vpop.f32.mrb[77].mxu0  ;;  %v3271_v56 = vpop.f32.mrb[77].mxu1  ;;  %v3322_v23 = vmul.f32 %v5613_v22, %v7573_v31  ;;  %v9268_v22 = vld [vmem:[#allocation111_spill] sm:$0xff] }
 0x7b8   : > { %v3281_v25 = vadd.f32 %v3230_v55, %v9266_v63  ;;  %v3283_v15 = vadd.f32 %v3271_v56, %v9267_v20  ;;  %v3232_v1 = vpop.f32.mrb[78].mxu0  ;;  %v3273_v9 = vpop.f32.mrb[78].mxu1 }
 0x7b9   : > { %v5090_v27 = vmul.f32 -1.442695, %v3280_v51  ;;  %5618 = vtanh.f32 %v3282_v13  ;;  %v3233_v49 = vpop.f32.mrb[79].mxu0  ;;  %v3274_v18 = vpop.f32.mrb[79].mxu1 }
 0x7ba   : > { %v5091_v21 = vmul.f32 -1.442695, %v3281_v25  ;;  %5620 = vtanh.f32 %v3283_v15  ;;  %v5615_v24 = vpop.eup %5614 }
 0x7bb   : > { %5622 = vpow2.f32 %v5090_v27  ;;  %v5617_v0 = vpop.eup %5616 }
 0x7bc   : > { %5624 = vpow2.f32 %v5091_v21  ;;  %v3323_v63 = vmul.f32 %v5617_v0, %v7575_v12  ;;  %v9270_v0 = vld [vmem:[#allocation113_spill] sm:$0xff] }
 0x7c3   : > { %v5619_v16 = vpop.eup %5618 }
 0x7c4   : > { %v5621_v40 = vpop.eup %5620  ;;  %v3324_v55 = vmul.f32 %v5619_v16, %v5611_v36  ;;  %v9271_v16 = vld [vmem:[#allocation114_spill] sm:$0xff] }
 0x7c5   : > { %v5623_v56 = vpop.eup %5622  ;;  %v3325_v51 = vmul.f32 %v5621_v40, %v5615_v24  ;;  %v9269_v24 = vld [vmem:[#allocation112_spill] sm:$0xff]  ;;  %v9272_v40 = vld [vmem:[#allocation115_spill] sm:$0xff] }
 0x7c6   : > { %v5625_v13 = vpop.eup %5624  ;;  %v3306_v20 = vadd.f32 1.0, %v5623_v56  ;;  %v7723_v1 = vadd.f32 %v3324_v55, %v3322_v23  ;;  %v9273_v23 = vld [vmem:[#allocation116_spill] sm:$0xff]  ;;  %v9274_v55 = vld [vmem:[#allocation117_spill] sm:$0xff]  ;;  %v9275_v56 = vld [vmem:[#allocation118_spill] sm:$0xff] }
 0x7c7   : > { %v3307_v25 = vadd.f32 1.0, %v5625_v13  ;;  %v7725_v15 = vadd.f32 %v3325_v51, %v3323_v63  ;;  %v9276_v63 = vld [vmem:[#allocation119_spill] sm:$0xff]  ;;  %v9277_v51 = vld [vmem:[#allocation120_spill] sm:$0xff]  ;;  %v9278_v13 = vld [vmem:[#allocation121_spill] sm:$0xff] }
 0x7c8   : > { %5626 = vrcp.f32 %v3306_v20  ;;  %v9279_v20 = vld [vmem:[#allocation122_spill] sm:$0xff] }
 0x7c9   : > { %5628 = vtanh.f32 %v7723_v1 }
 0x7ca   : > { %5630 = vrcp.f32 %v3307_v25  ;;  %v9280_v25 = vld [vmem:[#allocation123_spill] sm:$0xff] }
 0x7cb   : > { %5632 = vtanh.f32 %v7725_v15 }
 0x7d2   : > { %v5627_v9 = vpop.eup %5626 }
 0x7d3   : > { %v5629_v31 = vpop.eup %5628 }
 0x7d4   : > { %v5631_v27 = vpop.eup %5630  ;;  %v3330_v18 = vmul.f32 %v5629_v31, %v5627_v9  ;;  %v9281_v9 = vld [vmem:[#allocation124_spill] sm:$0xff]  ;;  %v9282_v31 = vld [vmem:[#allocation125_spill] sm:$0xff] }
 0x7d5   : > { %v5633_v49 = vpop.eup %5632 }
 0x7d6   : > { %v3331_v12 = vmul.f32 %v5633_v49, %v5631_v27  ;;  %v7729_v36 = vpack.c.bf16 %v3330_v18, %v3330_v18  ;;  %v9283_v27 = vld [vmem:[#allocation126_spill] sm:$0xff]  ;;  %v9284_v49 = vld [vmem:[#allocation127_spill] sm:$0xff]  ;;  %v9285_v18 = vld [vmem:[#allocation128_spill] sm:$0xff] }
 0x7d8   : > { %v3354_v21 = vpack.c.bf16 %v3331_v12, %v3331_v12  ;;  %v9286_v12 = vld [vmem:[#allocation129_spill] sm:$0xff] }
 0x7da   : > { %3387 = vmatprep.mubr.bf16.mxu0 %v3354_v21  ;;  %3428 = vmatprep.mubr.bf16.mxu1 %v3354_v21 }
 0x7db   : > { %3388 = vmatmul.mubr.bf16.vlgmr.msra.gmra.mrb[80].mxu0 %v7729_v36  ;;  %3429 = vmatmul.mubr.bf16.vlgmr.msra.gmra.mrb[80].mxu1 %v7729_v36 }
 0x7dc   : > { %3438 = vmatpush1.bf16.msra.mxu0 %v8782_v4  ;;  %3479 = vmatpush1.bf16.msra.mxu1 %v8783_v32 }
 0x7dd   : > { %3469 = vmatprep.mubr.bf16.mxu0 %v3354_v21  ;;  %3510 = vmatprep.mubr.bf16.mxu1 %v3354_v21  ;;  %v9287_v21 = vld [vmem:[#allocation130_spill] sm:$0xff] }
 0x7de   : > { %3439 = vmatprep.subr.bf16.mxu0 %v8784_v48  ;;  %3480 = vmatprep.subr.bf16.mxu1 %v8785_v8 }
 0x7e0   : > { %3440 = vmatpush1.bf16.msra.mxu0 %v8786_v5  ;;  %3481 = vmatpush1.bf16.msra.mxu1 %v8787_v57 }
 0x7e1   : > { %3441 = vmatprep.subr.bf16.mxu0 %v8788_v28  ;;  %3482 = vmatprep.subr.bf16.mxu1 %v8789_v14 }
 0x7e4   : > { %3442 = vmatpush1.bf16.msra.mxu0 %v8790_v33  ;;  %3483 = vmatpush1.bf16.msra.mxu1 %v8791_v26 }
 0x7e5   : > { %3443 = vmatprep.subr.bf16.mxu0 %v8792_v2  ;;  %3484 = vmatprep.subr.bf16.mxu1 %v8793_v58 }
 0x7e8   : > { %3444 = vmatpush1.bf16.msra.mxu0 %v8794_v30  ;;  %3485 = vmatpush1.bf16.msra.mxu1 %v8795_v41 }
 0x7e9   : > { %3445 = vmatprep.subr.bf16.mxu0 %v8796_v19  ;;  %3486 = vmatprep.subr.bf16.mxu1 %v8797_v17 }
 0x7ec   : > { %3446 = vmatpush1.bf16.msra.mxu0 %v8798_v50  ;;  %3487 = vmatpush1.bf16.msra.mxu1 %v8799_v37 }
 0x7ed   : > { %3447 = vmatprep.subr.bf16.mxu0 %v8800_v39  ;;  %3488 = vmatprep.subr.bf16.mxu1 %v8801_v38 }
 0x7f0   : > { %3448 = vmatpush1.bf16.msra.mxu0 %v8888_v52  ;;  %3489 = vmatpush1.bf16.msra.mxu1 %v8889_v44 }
 0x7f1   : > { %3449 = vmatprep.subr.bf16.mxu0 %v8890_v45  ;;  %3490 = vmatprep.subr.bf16.mxu1 %v8891_v62 }
 0x7f4   : > { %3450 = vmatpush1.bf16.msra.mxu0 %v8892_v46  ;;  %3491 = vmatpush1.bf16.msra.mxu1 %v8893_v6 }
 0x7f5   : > { %3451 = vmatprep.subr.bf16.mxu0 %v8894_v7  ;;  %3492 = vmatprep.subr.bf16.mxu1 %v8895_v35 }
 0x7f8   : > { %3452 = vmatpush1.bf16.msra.mxu0 %v8896_v59  ;;  %3493 = vmatpush1.bf16.msra.mxu1 %v8983_v29 }
 0x7f9   : > { %3453 = vmatprep.subr.bf16.mxu0 %v8898_v43  ;;  %3494 = vmatprep.subr.bf16.mxu1 %v8899_v11 }
 0x7fc   : > { %3454 = vmatpush1.bf16.msra.mxu0 %v8900_v10  ;;  %3495 = vmatpush1.bf16.msra.mxu1 %v8901_v54 }
 0x7fd   : > { %3455 = vmatprep.subr.bf16.mxu0 %v8902_v42  ;;  %3496 = vmatprep.subr.bf16.mxu1 %v8903_v53 }
 0x800   : > { %3456 = vmatpush1.bf16.msra.mxu0 %v8904_v34  ;;  %3497 = vmatpush1.bf16.msra.mxu1 %v8905_v60 }
 0x801   : > { %3457 = vmatprep.subr.bf16.mxu0 %v8906_v47  ;;  %3498 = vmatprep.subr.bf16.mxu1 %v8907_v61 }
 0x804   : > { %3458 = vmatpush1.bf16.msra.mxu0 %v8908_v3  ;;  %3499 = vmatpush1.bf16.msra.mxu1 %v9268_v22 }
 0x805   : > { %3459 = vmatprep.subr.bf16.mxu0 %v9269_v24  ;;  %3500 = vmatprep.subr.bf16.mxu1 %v9270_v0 }
 0x808   : > { %3460 = vmatpush1.bf16.msra.mxu0 %v9271_v16  ;;  %3501 = vmatpush1.bf16.msra.mxu1 %v9272_v40 }
 0x809   : > { %3461 = vmatprep.subr.bf16.mxu0 %v9273_v23  ;;  %3502 = vmatprep.subr.bf16.mxu1 %v9274_v55  ;;  %v9357_v55 = vld [vmem:[#allocation154_spill] sm:$0xff]  ;;  %v9358_v23 = vld [vmem:[#allocation156_spill] sm:$0xff] }
 0x80c   : > { %3462 = vmatpush1.bf16.msra.mxu0 %v9275_v56  ;;  %3503 = vmatpush1.bf16.msra.mxu1 %v9276_v63  ;;  %v9356_v63 = vld [vmem:[#allocation155_spill] sm:$0xff] }
 0x80d   : > { %3463 = vmatprep.subr.bf16.mxu0 %v9277_v51  ;;  %3504 = vmatprep.subr.bf16.mxu1 %v9278_v13  ;;  %v9288_v51 = vld [vmem:[#allocation131_spill] sm:$0xff]  ;;  %v9289_v13 = vld [vmem:[#allocation4_spill] sm:$0xff] }
 0x810   : > { %3464 = vmatpush1.bf16.msra.mxu0 %v9279_v20  ;;  %3505 = vmatpush1.bf16.msra.mxu1 %v9280_v25  ;;  %v9290_v20 = vld [vmem:[#allocation5_spill] sm:$0xff] }
 0x811   : > { %3465 = vmatprep.subr.bf16.mxu0 %v9281_v9  ;;  %3506 = vmatprep.subr.bf16.mxu1 %v9282_v31  ;;  %v9291_v31 = vld [vmem:[#allocation6_spill] sm:$0xff]  ;;  %v9300_v9 = vld [vmem:[#allocation15_spill] sm:$0xff]  ;;  %v9355_v25 = vld [vmem:[#allocation153_spill] sm:$0xff] }
 0x814   : > { %3466 = vmatpush1.bf16.msra.mxu0 %v9283_v27  ;;  %3507 = vmatpush1.bf16.msra.mxu1 %v9284_v49  ;;  %v9292_v27 = vld [vmem:[#allocation7_spill] sm:$0xff]  ;;  %v9293_v49 = vld [vmem:[#allocation8_spill] sm:$0xff] }
 0x815   : > { %3467 = vmatprep.subr.bf16.mxu0 %v9285_v18  ;;  %3508 = vmatprep.subr.bf16.mxu1 %v9286_v12  ;;  %v9294_v18 = vld [vmem:[#allocation9_spill] sm:$0xff]  ;;  %v9295_v12 = vld [vmem:[#allocation10_spill] sm:$0xff] }
 0x818   : > { %3468 = vmatpush1.bf16.msra.mxu0 %v9287_v21  ;;  %3509 = vmatpush1.bf16.msra.mxu1 %v9288_v51  ;;  %v9296_v21 = vld [vmem:[#allocation11_spill] sm:$0xff]  ;;  %v9297_v51 = vld [vmem:[#allocation12_spill] sm:$0xff] }
 0x819   : > { %3598 = vmatprep.subr.bf16.mxu0 %v9289_v13  ;;  %3639 = vmatprep.subr.bf16.mxu1 %v9290_v20  ;;  %v9298_v13 = vld [vmem:[#allocation13_spill] sm:$0xff]  ;;  %v9299_v20 = vld [vmem:[#allocation14_spill] sm:$0xff] }
 0x81b   : > { %3470 = vmatmul.mubr.bf16.vlgmr.msra.gmra.mrb[84].mxu0 %v7729_v36  ;;  %3511 = vmatmul.mubr.bf16.vlgmr.msra.gmra.mrb[84].mxu1 %v7729_v36  ;;  %v9301_v36 = vld [vmem:[#allocation16_spill] sm:$0xff] }
 0x81c   : > { %3599 = vmatpush1.bf16.msra.mxu0 %v9291_v31  ;;  %3640 = vmatpush1.bf16.msra.mxu1 %v9292_v27  ;;  %v9302_v31 = vld [vmem:[#allocation17_spill] sm:$0xff]  ;;  %v9303_v27 = vld [vmem:[#allocation18_spill] sm:$0xff] }
 0x81d   : > { %3600 = vmatprep.subr.bf16.mxu0 %v9293_v49  ;;  %3641 = vmatprep.subr.bf16.mxu1 %v9294_v18  ;;  %v9304_v49 = vld [vmem:[#allocation19_spill] sm:$0xff]  ;;  %v9305_v18 = vld [vmem:[#allocation20_spill] sm:$0xff] }
 0x820   : > { %3601 = vmatpush1.bf16.msra.mxu0 %v9295_v12  ;;  %3642 = vmatpush1.bf16.msra.mxu1 %v9296_v21  ;;  %v9306_v12 = vld [vmem:[#allocation21_spill] sm:$0xff]  ;;  %v9307_v21 = vld [vmem:[#allocation22_spill] sm:$0xff] }
 0x821   : > { %3602 = vmatprep.subr.bf16.mxu0 %v9297_v51  ;;  %3643 = vmatprep.subr.bf16.mxu1 %v9298_v13  ;;  %v9308_v51 = vld [vmem:[#allocation23_spill] sm:$0xff]  ;;  %v9309_v13 = vld [vmem:[#allocation24_spill] sm:$0xff] }
 0x824   : > { %3603 = vmatpush1.bf16.msra.mxu0 %v9299_v20  ;;  %3644 = vmatpush1.bf16.msra.mxu1 %v9300_v9  ;;  %v9310_v20 = vld [vmem:[#allocation25_spill] sm:$0xff]  ;;  %v9311_v9 = vld [vmem:[#allocation26_spill] sm:$0xff] }
 0x825   : > { %3604 = vmatprep.subr.bf16.mxu0 %v9301_v36  ;;  %3645 = vmatprep.subr.bf16.mxu1 %v9302_v31  ;;  %v9312_v36 = vld [vmem:[#allocation27_spill] sm:$0xff]  ;;  %v9313_v31 = vld [vmem:[#allocation28_spill] sm:$0xff] }
 0x828   : > { %3605 = vmatpush1.bf16.msra.mxu0 %v9303_v27  ;;  %3646 = vmatpush1.bf16.msra.mxu1 %v9304_v49  ;;  %v9314_v27 = vld [vmem:[#allocation29_spill] sm:$0xff]  ;;  %v9315_v49 = vld [vmem:[#allocation30_spill] sm:$0xff] }
 0x829   : > { %3606 = vmatprep.subr.bf16.mxu0 %v9305_v18  ;;  %3647 = vmatprep.subr.bf16.mxu1 %v9306_v12  ;;  %v9316_v18 = vld [vmem:[#allocation31_spill] sm:$0xff]  ;;  %v9317_v12 = vld [vmem:[#allocation32_spill] sm:$0xff] }
 0x82c   : > { %3607 = vmatpush1.bf16.msra.mxu0 %v9307_v21  ;;  %3648 = vmatpush1.bf16.msra.mxu1 %v9308_v51  ;;  %v9318_v21 = vld [vmem:[#allocation33_spill] sm:$0xff]  ;;  %v9319_v51 = vld [vmem:[#allocation34_spill] sm:$0xff] }
 0x82d   : > { %3608 = vmatprep.subr.bf16.mxu0 %v9309_v13  ;;  %3649 = vmatprep.subr.bf16.mxu1 %v9310_v20  ;;  %v9320_v13 = vld [vmem:[#allocation35_spill] sm:$0xff]  ;;  %v9321_v20 = vld [vmem:[#allocation36_spill] sm:$0xff] }
 0x830   : > { %3609 = vmatpush1.bf16.msra.mxu0 %v9311_v9  ;;  %3650 = vmatpush1.bf16.msra.mxu1 %v9312_v36  ;;  %v9322_v9 = vld [vmem:[#allocation37_spill] sm:$0xff]  ;;  %v9323_v36 = vld [vmem:[#allocation38_spill] sm:$0xff] }
 0x831   : > { %3610 = vmatprep.subr.bf16.mxu0 %v9313_v31  ;;  %3651 = vmatprep.subr.bf16.mxu1 %v9314_v27  ;;  %v9324_v31 = vld [vmem:[#allocation39_spill] sm:$0xff]  ;;  %v9325_v27 = vld [vmem:[#allocation40_spill] sm:$0xff] }
 0x834   : > { %3611 = vmatpush1.bf16.msra.mxu0 %v9315_v49  ;;  %3652 = vmatpush1.bf16.msra.mxu1 %v9316_v18  ;;  %v9326_v49 = vld [vmem:[#allocation41_spill] sm:$0xff]  ;;  %v9327_v18 = vld [vmem:[#allocation42_spill] sm:$0xff] }
 0x835   : > { %3612 = vmatprep.subr.bf16.mxu0 %v9317_v12  ;;  %3653 = vmatprep.subr.bf16.mxu1 %v9318_v21  ;;  %v9328_v12 = vld [vmem:[#allocation43_spill] sm:$0xff]  ;;  %v9329_v21 = vld [vmem:[#allocation44_spill] sm:$0xff] }
 0x838   : > { %3613 = vmatpush1.bf16.msra.mxu0 %v9319_v51  ;;  %3654 = vmatpush1.bf16.msra.mxu1 %v9320_v13  ;;  %v9330_v51 = vld [vmem:[#allocation45_spill] sm:$0xff]  ;;  %v9331_v13 = vld [vmem:[#allocation46_spill] sm:$0xff] }
 0x839   : > { %3614 = vmatprep.subr.bf16.mxu0 %v9321_v20  ;;  %3655 = vmatprep.subr.bf16.mxu1 %v9322_v9  ;;  %v9332_v20 = vld [vmem:[#allocation47_spill] sm:$0xff]  ;;  %v9333_v9 = vld [vmem:[#allocation48_spill] sm:$0xff] }
 0x83c   : > { %3615 = vmatpush1.bf16.msra.mxu0 %v9323_v36  ;;  %3656 = vmatpush1.bf16.msra.mxu1 %v9324_v31  ;;  %v9334_v36 = vld [vmem:[#allocation49_spill] sm:$0xff]  ;;  %v9335_v31 = vld [vmem:[#allocation50_spill] sm:$0xff] }
 0x83d   : > { %3616 = vmatprep.subr.bf16.mxu0 %v9325_v27  ;;  %3657 = vmatprep.subr.bf16.mxu1 %v9326_v49  ;;  %v9336_v27 = vld [vmem:[#allocation51_spill] sm:$0xff]  ;;  %v9337_v49 = vld [vmem:[#allocation52_spill] sm:$0xff] }
 0x840   : > { %3617 = vmatpush1.bf16.msra.mxu0 %v9327_v18  ;;  %3658 = vmatpush1.bf16.msra.mxu1 %v9328_v12  ;;  %v9338_v18 = vld [vmem:[#allocation53_spill] sm:$0xff]  ;;  %v9339_v12 = vld [vmem:[#allocation54_spill] sm:$0xff] }
 0x841   : > { %3618 = vmatprep.subr.bf16.mxu0 %v9329_v21  ;;  %3659 = vmatprep.subr.bf16.mxu1 %v9330_v51  ;;  %v9340_v21 = vld [vmem:[#allocation55_spill] sm:$0xff]  ;;  %v9341_v51 = vld [vmem:[#allocation56_spill] sm:$0xff] }
 0x844   : > { %3619 = vmatpush1.bf16.msra.mxu0 %v9331_v13  ;;  %3660 = vmatpush1.bf16.msra.mxu1 %v9332_v20  ;;  %v9342_v13 = vld [vmem:[#allocation57_spill] sm:$0xff]  ;;  %v9343_v20 = vld [vmem:[#allocation58_spill] sm:$0xff] }
 0x845   : > { %3620 = vmatprep.subr.bf16.mxu0 %v9333_v9  ;;  %3661 = vmatprep.subr.bf16.mxu1 %v9334_v36  ;;  %v9344_v9 = vld [vmem:[#allocation59_spill] sm:$0xff]  ;;  %v9345_v36 = vld [vmem:[#allocation60_spill] sm:$0xff] }
 0x848   : > { %3621 = vmatpush1.bf16.msra.mxu0 %v9335_v31  ;;  %3662 = vmatpush1.bf16.msra.mxu1 %v9336_v27  ;;  %v9346_v31 = vld [vmem:[#allocation61_spill] sm:$0xff]  ;;  %v9347_v27 = vld [vmem:[#allocation62_spill] sm:$0xff] }
 0x849   : > { %3622 = vmatprep.subr.bf16.mxu0 %v9337_v49  ;;  %3663 = vmatprep.subr.bf16.mxu1 %v9338_v18  ;;  %v9348_v49 = vld [vmem:[#allocation63_spill] sm:$0xff]  ;;  %v9349_v18 = vld [vmem:[#allocation64_spill] sm:$0xff] }
 0x84c   : > { %3623 = vmatpush1.bf16.msra.mxu0 %v9339_v12  ;;  %3664 = vmatpush1.bf16.msra.mxu1 %v9340_v21  ;;  %v9350_v12 = vld [vmem:[#allocation65_spill] sm:$0xff]  ;;  %v9351_v21 = vld [vmem:[#allocation66_spill] sm:$0xff] }
 0x84d   : > { %3624 = vmatprep.subr.bf16.mxu0 %v9341_v51  ;;  %3665 = vmatprep.subr.bf16.mxu1 %v9342_v13  ;;  %v9352_v51 = vld [vmem:[#allocation67_spill] sm:$0xff]  ;;  %v9353_v13 = vld [vmem:[#allocation68_spill] sm:$0xff] }
 0x850   : > { %3625 = vmatpush1.bf16.msra.mxu0 %v9343_v20  ;;  %3666 = vmatpush1.bf16.msra.mxu1 %v9344_v9  ;;  %v9354_v20 = vld [vmem:[#allocation69_spill] sm:$0xff] }
 0x851   : > { %3626 = vmatprep.subr.bf16.mxu0 %v9345_v36  ;;  %3667 = vmatprep.subr.bf16.mxu1 %v9346_v31 }
 0x854   : > { %3627 = vmatpush1.bf16.msra.mxu0 %v9347_v27  ;;  %3668 = vmatpush1.bf16.msra.mxu1 %v9348_v49 }
 0x855   : > { %3628 = vmatprep.subr.bf16.mxu0 %v9349_v18  ;;  %3669 = vmatprep.subr.bf16.mxu1 %v9350_v12 }
 0x858   : > { %3629 = vmatpush1.bf16.msra.mxu0 %v9351_v21  ;;  %3670 = vmatpush1.bf16.msra.mxu1 %v9352_v51 }
 0x859   : > { %3680 = vmatprep.subr.bf16.mxu0 %v9353_v13  ;;  %3721 = vmatprep.subr.bf16.mxu1 %v9354_v20 }
 0x8ae   : > { %v3389_v9 = vpop.f32.mrb[80].mxu0  ;;  %v3430_v36 = vpop.f32.mrb[80].mxu1 }
 0x8af   : > { %v3519_v31 = vadd.f32 %v3389_v9, %v9355_v25  ;;  %v3521_v27 = vadd.f32 %v3430_v36, %v9356_v63  ;;  %v3391_v56 = vpop.f32.mrb[81].mxu0  ;;  %v3432_v49 = vpop.f32.mrb[81].mxu1 }
 0x8b0   : > { %v3520_v18 = vadd.f32 %v3391_v56, %v9357_v55  ;;  %v3522_v12 = vadd.f32 %v3432_v49, %v9358_v23  ;;  %v3393_v40 = vpop.f32.mrb[82].mxu0  ;;  %v3434_v21 = vpop.f32.mrb[82].mxu1  ;;  %v9360_v49 = vld [vmem:[#allocation183_spill] sm:$0xff] }
 0x8b1   : > { %v3394_v16 = vpop.f32.mrb[83].mxu0  ;;  %v3435_v51 = vpop.f32.mrb[83].mxu1  ;;  %v5092_v0 = vmul.f32 -1.442695, %v3519_v31  ;;  %v5094_v13 = vmul.f32 -1.442695, %v3521_v27 }
 0x8b2   : > { %v5093_v24 = vmul.f32 -1.442695, %v3520_v18  ;;  %v5095_v20 = vmul.f32 -1.442695, %v3522_v12  ;;  %v9359_v31 = vld [vmem:[#allocation181_spill] sm:$0xff]  ;;  %v9361_v12 = vld [vmem:[#allocation182_spill] sm:$0xff] }
 0x8b3   : > { %5634 = vpow2.f32 %v5092_v0  ;;  %v9362_v51 = vld [vmem:[#allocation184_spill] sm:$0xff] }
 0x8b4   : > { %5636 = vpow2.f32 %v5094_v13 }
 0x8b5   : > { %5638 = vpow2.f32 %v5093_v24 }
 0x8b6   : > { %5640 = vpow2.f32 %v5095_v20 }
 0x8bd   : > { %v5635_v25 = vpop.eup %5634 }
 0x8be   : > { %v5637_v63 = vpop.eup %5636  ;;  %v3545_v22 = vadd.f32 1.0, %v5635_v25 }
 0x8bf   : > { %v5639_v9 = vpop.eup %5638  ;;  %v3547_v55 = vadd.f32 1.0, %v5637_v63 }
 0x8c0   : > { %v5641_v36 = vpop.eup %5640  ;;  %v3546_v56 = vadd.f32 1.0, %v5639_v9  ;;  %5642 = vrcp.f32 %v3545_v22 }
 0x8c1   : > { %v3548_v23 = vadd.f32 1.0, %v5641_v36  ;;  %5644 = vrcp.f32 %v3547_v55 }
 0x8c2   : > { %5646 = vrcp.f32 %v3546_v56 }
 0x8c3   : > { %5648 = vrcp.f32 %v3548_v23 }
 0x8ca   : > { %v5643_v55 = vpop.eup %5642 }
 0x8cb   : > { %v5645_v56 = vpop.eup %5644 }
 0x8ee   : > { %v3471_v16 = vpop.f32.mrb[84].mxu0  ;;  %v3512_v40 = vpop.f32.mrb[84].mxu1 }
 0x8ef   : > { %v3523_v27 = vadd.f32 %v3471_v16, %v9359_v31  ;;  %v3525_v0 = vadd.f32 %v3512_v40, %v9360_v49  ;;  %v3473_v18 = vpop.f32.mrb[85].mxu0  ;;  %v3514_v24 = vpop.f32.mrb[85].mxu1  ;;  %v3565_v49 = vmul.f32 %v5645_v56, %v7723_v1  ;;  %v5320_v56 = vld [vmem:[%s8294_s5 + $0x20] ss:$16 sps:$4 sm:$0xff]  }
 0x8f0   : > { %v3524_v21 = vadd.f32 %v3473_v18, %v9361_v12  ;;  %v3526_v13 = vadd.f32 %v3514_v24, %v9362_v51  ;;  %v3475_v20 = vpop.f32.mrb[86].mxu0  ;;  %v3516_v25 = vpop.f32.mrb[86].mxu1 }
 0x8f1   : > { %v5096_v63 = vmul.f32 -1.442695, %v3523_v27  ;;  %5650 = vtanh.f32 %v3525_v0  ;;  %v3476_v22 = vpop.f32.mrb[87].mxu0  ;;  %v3517_v9 = vpop.f32.mrb[87].mxu1 }
 0x8f2   : > { %v5097_v36 = vmul.f32 -1.442695, %v3524_v21  ;;  %5652 = vtanh.f32 %v3526_v13  ;;  %v5647_v16 = vpop.eup %5646 }
 0x8f3   : > { %5654 = vpow2.f32 %v5096_v63  ;;  %v5649_v40 = vpop.eup %5648 }
 0x8f4   : > { %5656 = vpow2.f32 %v5097_v36  ;;  %v3566_v12 = vmul.f32 %v5649_v40, %v7725_v15  ;;  %v5328_v40 = vld [vmem:[%s8294_s5 + $0x44] ss:$16 sps:$4 sm:$0xff]  }
 0x8fb   : > { %v5651_v31 = vpop.eup %5650 }
 0x8fc   : > { %v5653_v23 = vpop.eup %5652  ;;  %v3567_v18 = vmul.f32 %v5651_v31, %v5643_v55  ;;  %v5323_v31 = vld [vmem:[%s8294_s5 + $0x28] ss:$16 sps:$4 sm:$0xff]  }
 0x8fd   : > { %v5655_v24 = vpop.eup %5654  ;;  %v3568_v27 = vmul.f32 %v5653_v23, %v5647_v16  ;;  %v5325_v16 = vld [vmem:[%s8294_s5 + $0x2c] ss:$16 sps:$4 sm:$0xff]  }
 0x8fe   : > { %v5657_v0 = vpop.eup %5656  ;;  %v3549_v51 = vadd.f32 1.0, %v5655_v24  ;;  %v7873_v20 = vadd.f32 %v3567_v18, %v3565_v49  ;;  %v5331_v23 = vld [vmem:[%s8294_s5 + $0x4c] ss:$16 sps:$4 sm:$0xff]   ;;  %v5326_v49 = vld [vmem:[%s8294_s5 + $0x40] ss:$16 sps:$4 sm:$0xff]  }
 0x8ff   : > { %v3550_v21 = vadd.f32 1.0, %v5657_v0  ;;  %v7875_v13 = vadd.f32 %v3568_v27, %v3566_v12  ;;  %v5334_v18 = vld [vmem:[%s8294_s5 + $0x64] ss:$16 sps:$4 sm:$0xff]   ;;  %v5329_v24 = vld [vmem:[%s8294_s5 + $0x48] ss:$16 sps:$4 sm:$0xff]  }
 0x900   : > { %5658 = vrcp.f32 %v3549_v51  ;;  %v5337_v12 = vld [vmem:[%s8294_s5 + $0x6c] ss:$16 sps:$4 sm:$0xff]   ;;  %v5332_v27 = vld [vmem:[%s8294_s5 + $0x60] ss:$16 sps:$4 sm:$0xff]   ;;  %v5340_v0 = vld [vmem:[%s8294_s5 + $0x84] ss:$16 sps:$4 sm:$0xff]  }
 0x901   : > { %5660 = vtanh.f32 %v7873_v20  ;;  %v5335_v51 = vld [vmem:[%s8294_s5 + $0x68] ss:$16 sps:$4 sm:$0xff]  }
 0x902   : > { %5662 = vrcp.f32 %v3550_v21  ;;  %v5343_v21 = vld [vmem:[%s8294_s5 + $0x8c] ss:$16 sps:$4 sm:$0xff]  }
 0x903   : > { %5664 = vtanh.f32 %v7875_v13 }
 0x90a   : > { %v5659_v25 = vpop.eup %5658 }
 0x90b   : > { %v5661_v1 = vpop.eup %5660 }
 0x90c   : > { %v5663_v63 = vpop.eup %5662  ;;  %v3573_v9 = vmul.f32 %v5661_v1, %v5659_v25  ;;  %v5338_v25 = vld [vmem:[%s8294_s5 + $0x80] ss:$16 sps:$4 sm:$0xff]   ;;  %v5346_v1 = vld [vmem:[%s8294_s5 + $0xa4] ss:$16 sps:$4 sm:$0xff]  }
 0x90d   : > { %v5665_v22 = vpop.eup %5664 }
 0x90e   : > { %v3574_v15 = vmul.f32 %v5665_v22, %v5663_v63  ;;  %v7879_v55 = vpack.c.bf16 %v3573_v9, %v3573_v9  ;;  %v5341_v63 = vld [vmem:[%s8294_s5 + $0x88] ss:$16 sps:$4 sm:$0xff]   ;;  %v5349_v22 = vld [vmem:[%s8294_s5 + $0xac] ss:$16 sps:$4 sm:$0xff]   ;;  %v5344_v9 = vld [vmem:[%s8294_s5 + $0xa0] ss:$16 sps:$4 sm:$0xff]  }
 0x910   : > { %v3597_v36 = vpack.c.bf16 %v3574_v15, %v3574_v15  ;;  %v5352_v15 = vld [vmem:[%s8294_s5 + $0xc4] ss:$16 sps:$4 sm:$0xff]  }
 0x912   : > { %3630 = vmatprep.mubr.bf16.mxu0 %v3597_v36  ;;  %3671 = vmatprep.mubr.bf16.mxu1 %v3597_v36 }
 0x913   : > { %3631 = vmatmul.mubr.bf16.vlgmr.msra.gmra.mrb[88].mxu0 %v7879_v55  ;;  %3672 = vmatmul.mubr.bf16.vlgmr.msra.gmra.mrb[88].mxu1 %v7879_v55 }
 0x914   : > { %3681 = vmatpush1.bf16.msra.mxu0 %v8782_v4  ;;  %3722 = vmatpush1.bf16.msra.mxu1 %v8783_v32  ;;  %v9363_v4 = vld [vmem:[#allocation111_spill] sm:$0xff]  ;;  %v9364_v32 = vld [vmem:[#allocation112_spill] sm:$0xff] }
 0x915   : > { %3712 = vmatprep.mubr.bf16.mxu0 %v3597_v36  ;;  %3753 = vmatprep.mubr.bf16.mxu1 %v3597_v36  ;;  %v5347_v36 = vld [vmem:[%s8294_s5 + $0xa8] ss:$16 sps:$4 sm:$0xff]  }
 0x916   : > { %3682 = vmatprep.subr.bf16.mxu0 %v8784_v48  ;;  %3723 = vmatprep.subr.bf16.mxu1 %v8785_v8  ;;  %v9365_v48 = vld [vmem:[#allocation113_spill] sm:$0xff]  ;;  %v9366_v8 = vld [vmem:[#allocation114_spill] sm:$0xff] }
 0x918   : > { %3683 = vmatpush1.bf16.msra.mxu0 %v8786_v5  ;;  %3724 = vmatpush1.bf16.msra.mxu1 %v8787_v57  ;;  %v9367_v5 = vld [vmem:[#allocation115_spill] sm:$0xff]  ;;  %v9368_v57 = vld [vmem:[#allocation116_spill] sm:$0xff] }
 0x919   : > { %3684 = vmatprep.subr.bf16.mxu0 %v8788_v28  ;;  %3725 = vmatprep.subr.bf16.mxu1 %v8789_v14  ;;  %v9369_v28 = vld [vmem:[#allocation117_spill] sm:$0xff]  ;;  %v9370_v14 = vld [vmem:[#allocation118_spill] sm:$0xff] }
 0x91c   : > { %3685 = vmatpush1.bf16.msra.mxu0 %v8790_v33  ;;  %3726 = vmatpush1.bf16.msra.mxu1 %v8791_v26  ;;  %v9371_v33 = vld [vmem:[#allocation119_spill] sm:$0xff]  ;;  %v9372_v26 = vld [vmem:[#allocation120_spill] sm:$0xff] }
 0x91d   : > { %3686 = vmatprep.subr.bf16.mxu0 %v8792_v2  ;;  %3727 = vmatprep.subr.bf16.mxu1 %v8793_v58  ;;  %v9373_v2 = vld [vmem:[#allocation121_spill] sm:$0xff]  ;;  %v9374_v58 = vld [vmem:[#allocation122_spill] sm:$0xff] }
 0x920   : > { %3687 = vmatpush1.bf16.msra.mxu0 %v8794_v30  ;;  %3728 = vmatpush1.bf16.msra.mxu1 %v8795_v41  ;;  %v9375_v30 = vld [vmem:[#allocation123_spill] sm:$0xff]  ;;  %v9376_v41 = vld [vmem:[#allocation124_spill] sm:$0xff] }
 0x921   : > { %3688 = vmatprep.subr.bf16.mxu0 %v8796_v19  ;;  %3729 = vmatprep.subr.bf16.mxu1 %v8797_v17  ;;  %v9377_v19 = vld [vmem:[#allocation125_spill] sm:$0xff]  ;;  %v9378_v17 = vld [vmem:[#allocation126_spill] sm:$0xff] }
 0x924   : > { %3689 = vmatpush1.bf16.msra.mxu0 %v8798_v50  ;;  %3730 = vmatpush1.bf16.msra.mxu1 %v8799_v37  ;;  %v9379_v50 = vld [vmem:[#allocation127_spill] sm:$0xff]  ;;  %v9380_v37 = vld [vmem:[#allocation128_spill] sm:$0xff] }
 0x925   : > { %3690 = vmatprep.subr.bf16.mxu0 %v8800_v39  ;;  %3731 = vmatprep.subr.bf16.mxu1 %v8801_v38  ;;  %v9381_v39 = vld [vmem:[#allocation129_spill] sm:$0xff]  ;;  %v9382_v38 = vld [vmem:[#allocation130_spill] sm:$0xff] }
 0x928   : > { %3691 = vmatpush1.bf16.msra.mxu0 %v8888_v52  ;;  %3732 = vmatpush1.bf16.msra.mxu1 %v8889_v44  ;;  %v9383_v52 = vld [vmem:[#allocation131_spill] sm:$0xff]  ;;  %v9384_v44 = vmov 0  }
 0x929   : > { %3692 = vmatprep.subr.bf16.mxu0 %v8890_v45  ;;  %3733 = vmatprep.subr.bf16.mxu1 %v8891_v62  ;;  %v5723_v45 = vmov 1983009808  }
 0x92a   : > { %v3889_v62 = vunpack.c.l.s4 %v5723_v45  ;;  %v5388_v45 = vld [vmem:[%s8294_s5 + $0x184] ss:$16 sps:$4 sm:$0xff]  }
 0x92c   : > { %3693 = vmatpush1.bf16.msra.mxu0 %v8892_v46  ;;  %3734 = vmatpush1.bf16.msra.mxu1 %v8893_v6  ;;  %v3890_v46 = vunpack.c.0.s8 %v3889_v62  ;;  %v9385_v6 = vld [vmem:[#allocation132_spill] sm:$0xff]  ;;  %v5391_v62 = vld [vmem:[%s8294_s5 + $0x18c] ss:$16 sps:$4 sm:$0xff]  }
 0x92d   : > { %3694 = vmatprep.subr.bf16.mxu0 %v8894_v7  ;;  %3735 = vmatprep.subr.bf16.mxu1 %v8895_v35  ;;  %v3885_v35 = vld [vmem:[%s8295_s6] sm:$0xff] }
 0x92e   : > { %v3893_v7 = vsub.s32 %v3890_v46, %v9385_v6  ;;  %v5386_v46 = vld [vmem:[%s8294_s5 + $0x180] ss:$16 sps:$4 sm:$0xff]  }
 0x930   : > { %3695 = vmatpush1.bf16.msra.mxu0 %v8896_v59  ;;  %3736 = vmatpush1.bf16.msra.mxu1 %v8983_v29  ;;  %v3894_v59 = vrot.slane %v3885_v35, %v3893_v7  ;;  %v5322_v29 = vld [vmem:[%s8294_s5 + $0x24] ss:$16 sps:$4 sm:$0xff]  }
 0x931   : > { %3696 = vmatprep.subr.bf16.mxu0 %v8898_v43  ;;  %3737 = vmatprep.subr.bf16.mxu1 %v8899_v11 }
 0x932   : > { %v3902_v43 = vcombine.high %v3894_v59, %v3894_v59 }
 0x934   : > { %3697 = vmatpush1.bf16.msra.mxu0 %v8900_v10  ;;  %3738 = vmatpush1.bf16.msra.mxu1 %v8901_v54  ;;  %v3910_v10 = vsel %vm3908_vm2, %v3894_v59, 0  ;;  %v5392_v59 = vld [vmem:[%s8294_s5 + $0x1a0] ss:$16 sps:$4 sm:$0xff]  }
 0x935   : > { %3698 = vmatprep.subr.bf16.mxu0 %v8902_v42  ;;  %3739 = vmatprep.subr.bf16.mxu1 %v8903_v53  ;;  %v5314_v53 = vld [vmem:[%s8294_s5] ss:$16 sps:$4 sm:$0xff]  }
 0x938   : > { %3699 = vmatpush1.bf16.msra.mxu0 %v8904_v34  ;;  %3740 = vmatpush1.bf16.msra.mxu1 %v8905_v60  ;;  %v5316_v34 = vld [vmem:[%s8294_s5 + $0x4] ss:$16 sps:$4 sm:$0xff]   ;;  %v3884_v60 = vld [vmem:[%s439_s26] sm:$0xf] }
 0x939   : > { %3700 = vmatprep.subr.bf16.mxu0 %v8906_v47  ;;  %3741 = vmatprep.subr.bf16.mxu1 %v8907_v61  ;;  %v5317_v47 = vld [vmem:[%s8294_s5 + $0x8] ss:$16 sps:$4 sm:$0xff]   ;;  %v5319_v61 = vld [vmem:[%s8294_s5 + $0xc] ss:$16 sps:$4 sm:$0xff]  }
 0x93c   : > { %3701 = vmatpush1.bf16.msra.mxu0 %v8908_v3  ;;  %3742 = vmatpush1.bf16.msra.mxu1 %v9363_v4  ;;  %v3887_v3 = vcombine.high %v3885_v35, %v3885_v35  ;;  %v5350_v4 = vld [vmem:[%s8294_s5 + $0xc0] ss:$16 sps:$4 sm:$0xff]   ;;  %v5394_v35 = vld [vmem:[%s8294_s5 + $0x1a4] ss:$16 sps:$4 sm:$0xff]  }
 0x93d   : > { %3702 = vmatprep.subr.bf16.mxu0 %v9364_v32  ;;  %3743 = vmatprep.subr.bf16.mxu1 %v9365_v48  ;;  %v5358_v32 = vld [vmem:[%s8294_s5 + $0xe4] ss:$16 sps:$4 sm:$0xff]   ;;  %v5353_v48 = vld [vmem:[%s8294_s5 + $0xc8] ss:$16 sps:$4 sm:$0xff]  }
 0x93e   : > { %v3901_v11 = vrot.slane %v3887_v3, %v3893_v7  ;;  %v5389_v7 = vld [vmem:[%s8294_s5 + $0x188] ss:$16 sps:$4 sm:$0xff]  }
 0x93f   : > { %v5395_v3 = vld [vmem:[%s8294_s5 + $0x1a8] ss:$16 sps:$4 sm:$0xff]  }
 0x940   : > { %3703 = vmatpush1.bf16.msra.mxu0 %v9366_v8  ;;  %3744 = vmatpush1.bf16.msra.mxu1 %v9367_v5  ;;  %v3903_v54 = vcombine.high %v3901_v11, %v3901_v11  ;;  %v3916_v42 = vsel %vm3908_vm2, %v3901_v11, 0  ;;  %v5361_v8 = vld [vmem:[%s8294_s5 + $0xec] ss:$16 sps:$4 sm:$0xff]   ;;  %v5356_v5 = vld [vmem:[%s8294_s5 + $0xe0] ss:$16 sps:$4 sm:$0xff]  }
 0x941   : > { %3704 = vmatprep.subr.bf16.mxu0 %v9368_v57  ;;  %3745 = vmatprep.subr.bf16.mxu1 %v9369_v28  ;;  %v5359_v57 = vld [vmem:[%s8294_s5 + $0xe8] ss:$16 sps:$4 sm:$0xff]   ;;  %v5364_v28 = vld [vmem:[%s8294_s5 + $0x104] ss:$16 sps:$4 sm:$0xff]  }
 0x942   : > { %v5400_v11 = vld [vmem:[%s8294_s5 + $0x1c4] ss:$16 sps:$4 sm:$0xff]  }
 0x944   : > { %3705 = vmatpush1.bf16.msra.mxu0 %v9370_v14  ;;  %3746 = vmatpush1.bf16.msra.mxu1 %v9371_v33  ;;  %v5367_v14 = vld [vmem:[%s8294_s5 + $0x10c] ss:$16 sps:$4 sm:$0xff]   ;;  %v5362_v33 = vld [vmem:[%s8294_s5 + $0x100] ss:$16 sps:$4 sm:$0xff]  }
 0x945   : > { %3706 = vmatprep.subr.bf16.mxu0 %v9372_v26  ;;  %3747 = vmatprep.subr.bf16.mxu1 %v9373_v2  ;;  %v5365_v26 = vld [vmem:[%s8294_s5 + $0x108] ss:$16 sps:$4 sm:$0xff]   ;;  %v5370_v2 = vld [vmem:[%s8294_s5 + $0x124] ss:$16 sps:$4 sm:$0xff]  }
 0x948   : > { %3707 = vmatpush1.bf16.msra.mxu0 %v9374_v58  ;;  %3748 = vmatpush1.bf16.msra.mxu1 %v9375_v30  ;;  %v5373_v58 = vld [vmem:[%s8294_s5 + $0x12c] ss:$16 sps:$4 sm:$0xff]   ;;  %v5368_v30 = vld [vmem:[%s8294_s5 + $0x120] ss:$16 sps:$4 sm:$0xff]  }
 0x949   : > { %3708 = vmatprep.subr.bf16.mxu0 %v9376_v41  ;;  %3749 = vmatprep.subr.bf16.mxu1 %v9377_v19  ;;  %v5371_v41 = vld [vmem:[%s8294_s5 + $0x128] ss:$16 sps:$4 sm:$0xff]   ;;  %v5376_v19 = vld [vmem:[%s8294_s5 + $0x144] ss:$16 sps:$4 sm:$0xff]  }
 0x94c   : > { %3709 = vmatpush1.bf16.msra.mxu0 %v9378_v17  ;;  %3750 = vmatpush1.bf16.msra.mxu1 %v9379_v50  ;;  %v5379_v17 = vld [vmem:[%s8294_s5 + $0x14c] ss:$16 sps:$4 sm:$0xff]   ;;  %v5374_v50 = vld [vmem:[%s8294_s5 + $0x140] ss:$16 sps:$4 sm:$0xff]  }
 0x94d   : > { %3710 = vmatprep.subr.bf16.mxu0 %v9380_v37  ;;  %3751 = vmatprep.subr.bf16.mxu1 %v9381_v39  ;;  %v5377_v37 = vld [vmem:[%s8294_s5 + $0x148] ss:$16 sps:$4 sm:$0xff]   ;;  %v5382_v39 = vld [vmem:[%s8294_s5 + $0x164] ss:$16 sps:$4 sm:$0xff]  }
 0x950   : > { %3711 = vmatpush1.bf16.msra.mxu0 %v9382_v38  ;;  %3752 = vmatpush1.bf16.msra.mxu1 %v9383_v52  ;;  %v5385_v38 = vld [vmem:[%s8294_s5 + $0x16c] ss:$16 sps:$4 sm:$0xff]   ;;  %v5380_v52 = vld [vmem:[%s8294_s5 + $0x160] ss:$16 sps:$4 sm:$0xff]  }
 0x951   : > { %5104 = vmatprep.subr.msk.bf16.mxu0 %vm3908_vm2, %v3902_v43  ;;  %5106 = vmatprep.subr.msk.bf16.mxu1 %vm3908_vm2, %v3903_v54  ;;  %v5397_v43 = vld [vmem:[%s8294_s5 + $0x1ac] ss:$16 sps:$4 sm:$0xff]   ;;  %v5398_v54 = vld [vmem:[%s8294_s5 + $0x1c0] ss:$16 sps:$4 sm:$0xff]  }
 0x953   : > { %3713 = vmatmul.mubr.bf16.vlgmr.msra.gmra.mrb[92].mxu0 %v7879_v55  ;;  %3754 = vmatmul.mubr.bf16.vlgmr.msra.gmra.mrb[92].mxu1 %v7879_v55  ;;  %v5355_v55 = vld [vmem:[%s8294_s5 + $0xcc] ss:$16 sps:$4 sm:$0xff]  }
 0x954   : > { %3953 = vmatprep.mubr.bf16.mxu0 %v9384_v44  ;;  %3994 = vmatprep.mubr.bf16.mxu1 %v9384_v44  ;;  %v5383_v44 = vld [vmem:[%s8294_s5 + $0x168] ss:$16 sps:$4 sm:$0xff]  }
 0x955   : > { %3922 = vmatpush1.bf16.msra.mxu0 %v3910_v10  ;;  %3963 = vmatpush1.bf16.msra.mxu1 %v3916_v42  ;;  %v5403_v10 = vld [vmem:[%s8294_s5 + $0x1cc] ss:$16 sps:$4 sm:$0xff]   ;;  %v5401_v42 = vld [vmem:[%s8294_s5 + $0x1c8] ss:$16 sps:$4 sm:$0xff]  }
 0x956   : > { %4323 = vmatprep.subr.bf16.mxu0 %v5316_v34  ;;  %4364 = vmatprep.subr.bf16.mxu1 %v5319_v61  ;;  %v5409_v34 = vld [vmem:[%s8294_s5 + $0x1ec] ss:$16 sps:$4 sm:$0xff]   ;;  %v5410_v61 = vld [vmem:[%s8297_s8 + $0x40] sm:$0xff]  }
 0x95b   : > { %5105 = vmatmul.mubr.msk.bf16.vlgmr.msra.gmra.mrb[96].mxu0 %vm3904_vm3, %v3884_v60  ;;  %5107 = vmatmul.mubr.msk.bf16.vlgmr.msra.gmra.mrb[96].mxu1 %vm3904_vm3, %v3884_v60  ;;  %v5404_v60 = vld [vmem:[%s8294_s5 + $0x1e0] ss:$16 sps:$4 sm:$0xff]  }
 0x95c   : > { %4324 = vmatpush1.bf16.msra.mxu0 %v5314_v53  ;;  %4365 = vmatpush1.bf16.msra.mxu1 %v5317_v47  ;;  %v5406_v53 = vld [vmem:[%s8294_s5 + $0x1e4] ss:$16 sps:$4 sm:$0xff]   ;;  %v5407_v47 = vld [vmem:[%s8294_s5 + $0x1e8] ss:$16 sps:$4 sm:$0xff]  }
 0x95d   : > { %4325 = vmatprep.subr.bf16.mxu0 %v5322_v29  ;;  %4366 = vmatprep.subr.bf16.mxu1 %v5325_v16  ;;  %v5411_v29 = vld [vmem:[%s8297_s8 + $0xc0] sm:$0xff]  }
 0x960   : > { %4326 = vmatpush1.bf16.msra.mxu0 %v5320_v56  ;;  %4367 = vmatpush1.bf16.msra.mxu1 %v5323_v31 }
 0x961   : > { %4327 = vmatprep.subr.bf16.mxu0 %v5328_v40  ;;  %4368 = vmatprep.subr.bf16.mxu1 %v5331_v23  ;;  %v9386_v40 = vld [vmem:[#allocation157_spill] sm:$0xff]  ;;  %v9387_v23 = vld [vmem:[#allocation159_spill] sm:$0xff] }
 0x964   : > { %4328 = vmatpush1.bf16.msra.mxu0 %v5326_v49  ;;  %4369 = vmatpush1.bf16.msra.mxu1 %v5329_v24 }
 0x965   : > { %4329 = vmatprep.subr.bf16.mxu0 %v5334_v18  ;;  %4370 = vmatprep.subr.bf16.mxu1 %v5337_v12  ;;  %v9388_v12 = vld [vmem:[#allocation158_spill] sm:$0xff] }
 0x968   : > { %4330 = vmatpush1.bf16.msra.mxu0 %v5332_v27  ;;  %4371 = vmatpush1.bf16.msra.mxu1 %v5335_v51 }
 0x969   : > { %4331 = vmatprep.subr.bf16.mxu0 %v5340_v0  ;;  %4372 = vmatprep.subr.bf16.mxu1 %v5343_v21  ;;  %v9389_v0 = vld [vmem:[#allocation160_spill] sm:$0xff] }
 0x96c   : > { %4332 = vmatpush1.bf16.msra.mxu0 %v5338_v25  ;;  %4373 = vmatpush1.bf16.msra.mxu1 %v5341_v63 }
 0x96d   : > { %4333 = vmatprep.subr.bf16.mxu0 %v5346_v1  ;;  %4374 = vmatprep.subr.bf16.mxu1 %v5349_v22 }
 0x970   : > { %4334 = vmatpush1.bf16.msra.mxu0 %v5344_v9  ;;  %4375 = vmatpush1.bf16.msra.mxu1 %v5347_v36 }
 0x971   : > { %4335 = vmatprep.subr.bf16.mxu0 %v5352_v15  ;;  %4376 = vmatprep.subr.bf16.mxu1 %v5355_v55 }
 0x974   : > { %4336 = vmatpush1.bf16.msra.mxu0 %v5350_v4  ;;  %4377 = vmatpush1.bf16.msra.mxu1 %v5353_v48 }
 0x975   : > { %4337 = vmatprep.subr.bf16.mxu0 %v5358_v32  ;;  %4378 = vmatprep.subr.bf16.mxu1 %v5361_v8 }
 0x978   : > { %4338 = vmatpush1.bf16.msra.mxu0 %v5356_v5  ;;  %4379 = vmatpush1.bf16.msra.mxu1 %v5359_v57 }
 0x979   : > { %4339 = vmatprep.subr.bf16.mxu0 %v5364_v28  ;;  %4380 = vmatprep.subr.bf16.mxu1 %v5367_v14 }
 0x97c   : > { %4340 = vmatpush1.bf16.msra.mxu0 %v5362_v33  ;;  %4381 = vmatpush1.bf16.msra.mxu1 %v5365_v26  ;;  %v9390_v26 = vld [vmem:[#allocation185_spill] sm:$0xff] }
 0x97d   : > { %4341 = vmatprep.subr.bf16.mxu0 %v5370_v2  ;;  %4382 = vmatprep.subr.bf16.mxu1 %v5373_v58  ;;  %v9391_v58 = vld [vmem:[#allocation187_spill] sm:$0xff] }
 0x980   : > { %4342 = vmatpush1.bf16.msra.mxu0 %v5368_v30  ;;  %4383 = vmatpush1.bf16.msra.mxu1 %v5371_v41 }
 0x981   : > { %4343 = vmatprep.subr.bf16.mxu0 %v5376_v19  ;;  %4384 = vmatprep.subr.bf16.mxu1 %v5379_v17  ;;  %v9392_v17 = vld [vmem:[#allocation186_spill] sm:$0xff] }
 0x984   : > { %4344 = vmatpush1.bf16.msra.mxu0 %v5374_v50  ;;  %4385 = vmatpush1.bf16.msra.mxu1 %v5377_v37  ;;  %v9393_v37 = vld [vmem:[#allocation188_spill] sm:$0xff] }
 0x985   : > { %4345 = vmatprep.subr.bf16.mxu0 %v5382_v39  ;;  %4386 = vmatprep.subr.bf16.mxu1 %v5385_v38 }
 0x988   : > { %4346 = vmatpush1.bf16.msra.mxu0 %v5380_v52  ;;  %4387 = vmatpush1.bf16.msra.mxu1 %v5383_v44 }
 0x989   : > { %4347 = vmatprep.subr.bf16.mxu0 %v5388_v45  ;;  %4388 = vmatprep.subr.bf16.mxu1 %v5391_v62 }
 0x98c   : > { %4348 = vmatpush1.bf16.msra.mxu0 %v5386_v46  ;;  %4389 = vmatpush1.bf16.msra.mxu1 %v5389_v7 }
 0x98d   : > { %4349 = vmatprep.subr.bf16.mxu0 %v5394_v35  ;;  %4390 = vmatprep.subr.bf16.mxu1 %v5397_v43 }
 0x990   : > { %4350 = vmatpush1.bf16.msra.mxu0 %v5392_v59  ;;  %4391 = vmatpush1.bf16.msra.mxu1 %v5395_v3 }
 0x991   : > { %4351 = vmatprep.subr.bf16.mxu0 %v5400_v11  ;;  %4392 = vmatprep.subr.bf16.mxu1 %v5403_v10 }
 0x994   : > { %4352 = vmatpush1.bf16.msra.mxu0 %v5398_v54  ;;  %4393 = vmatpush1.bf16.msra.mxu1 %v5401_v42 }
 0x995   : > { %4353 = vmatprep.subr.bf16.mxu0 %v5406_v53  ;;  %4394 = vmatprep.subr.bf16.mxu1 %v5409_v34 }
 0x998   : > { %4354 = vmatpush1.bf16.msra.mxu0 %v5404_v60  ;;  %4395 = vmatpush1.bf16.msra.mxu1 %v5407_v47 }
 0x999   : > { %5239 = vmatprep.subr.bf16.mxu0 %v5410_v61  ;;  %5261 = vmatprep.subr.bf16.mxu1 %v5411_v29 }
 0x9e6   : > { %v3632_v56 = vpop.f32.mrb[88].mxu0  ;;  %v3673_v16 = vpop.f32.mrb[88].mxu1 }
 0x9e7   : > { %v3762_v31 = vadd.f32 %v3632_v56, %v9386_v40  ;;  %v3764_v49 = vadd.f32 %v3673_v16, %v9387_v23  ;;  %v3634_v18 = vpop.f32.mrb[89].mxu0  ;;  %v3675_v24 = vpop.f32.mrb[89].mxu1 }
 0x9e8   : > { %v3763_v27 = vadd.f32 %v3634_v18, %v9388_v12  ;;  %v3765_v51 = vadd.f32 %v3675_v24, %v9389_v0  ;;  %v3636_v21 = vpop.f32.mrb[90].mxu0  ;;  %v3677_v25 = vpop.f32.mrb[90].mxu1  ;;  %v5413_v24 = vld [vmem:[%s8297_s8 + $0x80] sm:$0xff]   ;;  %v5415_v0 = vld [vmem:[%s8297_s8 + $0xc8] sm:$0xff]  }
 0x9e9   : > { %v3637_v1 = vpop.f32.mrb[91].mxu0  ;;  %v3678_v63 = vpop.f32.mrb[91].mxu1  ;;  %v5098_v22 = vmul.f32 -1.442695, %v3762_v31  ;;  %v5100_v9 = vmul.f32 -1.442695, %v3764_v49 }
 0x9ea   : > { %v5099_v15 = vmul.f32 -1.442695, %v3763_v27  ;;  %v5101_v36 = vmul.f32 -1.442695, %v3765_v51  ;;  %v5414_v27 = vld [vmem:[%s8297_s8 + $0x48] sm:$0xff]   ;;  %v5418_v25 = vld [vmem:[%s8297_s8 + $0x50] sm:$0xff]  }
 0x9eb   : > { %5666 = vpow2.f32 %v5098_v22  ;;  %v5416_v51 = vld [vmem:[%s8297_s8 + $0x8] sm:$0xff]   ;;  %v5419_v1 = vld [vmem:[%s8297_s8 + $0xd0] sm:$0xff]  }
 0x9ec   : > { %5668 = vpow2.f32 %v5100_v9  ;;  %v5417_v21 = vld [vmem:[%s8297_s8 + $0x88] sm:$0xff]   ;;  %v5420_v63 = vld [vmem:[%s8297_s8 + $0x10] sm:$0xff]   ;;  %v5422_v9 = vld [vmem:[%s8297_s8 + $0x58] sm:$0xff]  }
 0x9ed   : > { %5670 = vpow2.f32 %v5099_v15  ;;  %v5421_v22 = vld [vmem:[%s8297_s8 + $0x90] sm:$0xff]   ;;  %v5423_v15 = vld [vmem:[%s8297_s8 + $0xd8] sm:$0xff]  }
 0x9ee   : > { %5672 = vpow2.f32 %v5101_v36  ;;  %v5424_v36 = vld [vmem:[%s8297_s8 + $0x18] sm:$0xff]  }
 0x9f5   : > { %v5667_v55 = vpop.eup %5666 }
 0x9f6   : > { %v5669_v4 = vpop.eup %5668  ;;  %v3788_v8 = vadd.f32 1.0, %v5667_v55  ;;  %v5425_v55 = vld [vmem:[%s8297_s8 + $0x98] sm:$0xff]  }
 0x9f7   : > { %v5671_v32 = vpop.eup %5670  ;;  %v3790_v5 = vadd.f32 1.0, %v5669_v4  ;;  %v5426_v4 = vld [vmem:[%s8297_s8 + $0x60] sm:$0xff]  }
 0x9f8   : > { %v5673_v48 = vpop.eup %5672  ;;  %v3789_v57 = vadd.f32 1.0, %v5671_v32  ;;  %5674 = vrcp.f32 %v3788_v8  ;;  %v5427_v32 = vld [vmem:[%s8297_s8 + $0xe0] sm:$0xff]  }
 0x9f9   : > { %v3791_v28 = vadd.f32 1.0, %v5673_v48  ;;  %5676 = vrcp.f32 %v3790_v5  ;;  %v5428_v48 = vld [vmem:[%s8297_s8 + $0x20] sm:$0xff]   ;;  %v5430_v5 = vld [vmem:[%s8297_s8 + $0x68] sm:$0xff]  }
 0x9fa   : > { %5678 = vrcp.f32 %v3789_v57  ;;  %v5429_v8 = vld [vmem:[%s8297_s8 + $0xa0] sm:$0xff]   ;;  %v5431_v57 = vld [vmem:[%s8297_s8 + $0xe8] sm:$0xff]  }
 0x9fb   : > { %5680 = vrcp.f32 %v3791_v28 }
 0xa02   : > { %v5675_v7 = vpop.eup %5674 }
 0xa03   : > { %v5677_v35 = vpop.eup %5676 }
 0xa04   : > { %v5679_v59 = vpop.eup %5678  ;;  %v3808_v10 = vmul.f32 %v5677_v35, %v7873_v20 }
 0xa05   : > { %v5681_v3 = vpop.eup %5680 }
 0xa06   : > { %v3809_v53 = vmul.f32 %v5681_v3, %v7875_v13  ;;  %v5412_v13 = vld [vmem:[%s8297_s8] sm:$0xff]  }
 0xa26   : > { %v3714_v14 = vpop.f32.mrb[92].mxu0  ;;  %v3755_v33 = vpop.f32.mrb[92].mxu1 }
 0xa27   : > { %v3766_v2 = vadd.f32 %v3714_v14, %v9390_v26  ;;  %v3768_v30 = vadd.f32 %v3755_v33, %v9391_v58  ;;  %v3716_v41 = vpop.f32.mrb[93].mxu0  ;;  %v3757_v19 = vpop.f32.mrb[93].mxu1 }
 0xa28   : > { %v3767_v50 = vadd.f32 %v3716_v41, %v9392_v17  ;;  %v3769_v39 = vadd.f32 %v3757_v19, %v9393_v37  ;;  %v3718_v38 = vpop.f32.mrb[94].mxu0  ;;  %v3759_v52 = vpop.f32.mrb[94].mxu1  ;;  %v5432_v19 = vld [vmem:[%s8297_s8 + $0x28] sm:$0xff]   ;;  %v5435_v37 = vld [vmem:[%s8297_s8 + $0xf0] sm:$0xff]  }
 0xa29   : > { %v5102_v44 = vmul.f32 -1.442695, %v3766_v2  ;;  %5682 = vtanh.f32 %v3768_v30  ;;  %v3719_v45 = vpop.f32.mrb[95].mxu0  ;;  %v3760_v62 = vpop.f32.mrb[95].mxu1  ;;  %v5433_v17 = vld [vmem:[%s8297_s8 + $0xa8] sm:$0xff]   ;;  %v5437_v38 = vld [vmem:[%s8297_s8 + $0xb0] sm:$0xff]  }
 0xa2a   : > { %v5103_v46 = vmul.f32 -1.442695, %v3767_v50  ;;  %5684 = vtanh.f32 %v3769_v39  ;;  %v5434_v50 = vld [vmem:[%s8297_s8 + $0x70] sm:$0xff]   ;;  %v5438_v52 = vld [vmem:[%s8297_s8 + $0x78] sm:$0xff]  }
 0xa2b   : > { %5686 = vpow2.f32 %v5102_v44  ;;  %v5436_v39 = vld [vmem:[%s8297_s8 + $0x30] sm:$0xff]   ;;  %v5439_v44 = vld [vmem:[%s8297_s8 + $0xf8] sm:$0xff]  }
 0xa2c   : > { %5688 = vpow2.f32 %v5103_v46  ;;  %v5440_v45 = vld [vmem:[%s8297_s8 + $0x38] sm:$0xff]   ;;  %v4405_v46 = vld [vmem:[%s8296_s7] sm:$0xf] }
 0xa2d   : > { %v5441_v62 = vld [vmem:[%s8297_s8 + $0xb8] sm:$0xff]  }
 0xa2e   : > { %v3955_v28 = vpop.f32.mrb[96].mxu0  ;;  %v3996_v26 = vpop.f32.mrb[96].mxu1 }
 0xa2f   : > { %v3957_v14 = vpop.f32.mrb[97].mxu0  ;;  %v3998_v58 = vpop.f32.mrb[97].mxu1 }
 0xa30   : > { %v3959_v33 = vpop.f32.mrb[98].mxu0  ;;  %v4000_v30 = vpop.f32.mrb[98].mxu1 }
 0xa31   : > { %v3960_v2 = vpop.f32.mrb[99].mxu0  ;;  %v4001_v41 = vpop.f32.mrb[99].mxu1 }
 0xa33   : > { %v5683_v43 = vpop.eup %5682 }
 0xa34   : > { %v5685_v11 = vpop.eup %5684  ;;  %v3810_v54 = vmul.f32 %v5683_v43, %v5675_v7  ;;  %v9394_v7 = vsub.s32 0, %v9385_v6 }
 0xa35   : > { %v5687_v42 = vpop.eup %5686  ;;  %v3811_v34 = vmul.f32 %v5685_v11, %v5679_v59  ;;  %v9395_v59 = vsub.s32 2, %v9385_v6 }
 0xa36   : > { %v5689_v60 = vpop.eup %5688  ;;  %v3792_v47 = vadd.f32 1.0, %v5687_v42  ;;  %v3812_v61 = vadd.f32 %v3810_v54, %v3808_v10  ;;  %v4410_v35 = vrot.slane %v4405_v46, %v9394_v7  ;;  %v9396_v10 = vsub.s32 1, %v9385_v6 }
 0xa37   : > { %v3793_v29 = vadd.f32 1.0, %v5689_v60  ;;  %v3813_v56 = vadd.f32 %v3811_v34, %v3809_v53  ;;  %v4418_v3 = vrot.slane %v4405_v46, %v9395_v59  ;;  %v9397_v42 = vsub.s32 3, %v9385_v6 }
 0xa38   : > { %5690 = vrcp.f32 %v3792_v47  ;;  %v4414_v54 = vrot.slane %v4405_v46, %v9396_v10 }
 0xa39   : > { %5692 = vtanh.f32 %v3812_v61  ;;  %v4422_v53 = vrot.slane %v4405_v46, %v9397_v42 }
 0xa3a   : > { %5694 = vrcp.f32 %v3793_v29 }
 0xa3b   : > { %5696 = vtanh.f32 %v3813_v56 }
 0xa42   : > { %v5691_v16 = vpop.eup %5690 }
 0xa43   : > { %v5693_v40 = vpop.eup %5692 }
 0xa44   : > { %v5695_v31 = vpop.eup %5694  ;;  %v3816_v23 = vmul.f32 %v5693_v40, %v5691_v16 }
 0xa45   : > { %v5697_v49 = vpop.eup %5696 }
 0xa46   : > { %v3817_v20 = vmul.f32 %v5697_v49, %v5695_v31  ;;  %v3818_v12 = vpack.c.bf16 %v3816_v23, %v3816_v23 }
 0xa48   : > { %v3819_v18 = vpack.c.bf16 %v3817_v20, %v3817_v20 }
 0xa4a   : > { %4355 = vmatprep.mubr.bf16.mxu0 %v3819_v18  ;;  %4396 = vmatprep.mubr.bf16.mxu1 %v3819_v18 }
 0xa4b   : > { %4356 = vmatmul.mubr.bf16.vlgmr.msra.gmra.mrb[100].mxu0 %v3818_v12  ;;  %4397 = vmatmul.mubr.bf16.vlgmr.msra.gmra.mrb[100].mxu1 %v3818_v12 }
 0xa4c   : > { %5240 = vmatpush3.bf16.msra.mxu0 %v5412_v13  ;;  %5262 = vmatpush3.bf16.msra.mxu1 %v5413_v24 }
 0xa4d   : > { %5241 = vmatprep.subr.bf16.mxu0 %v5414_v27  ;;  %5263 = vmatprep.subr.bf16.mxu1 %v5415_v0 }
 0xa50   : > { %5242 = vmatpush3.bf16.msra.mxu0 %v5416_v51  ;;  %5264 = vmatpush3.bf16.msra.mxu1 %v5417_v21 }
 0xa51   : > { %5243 = vmatprep.subr.bf16.mxu0 %v5418_v25  ;;  %5265 = vmatprep.subr.bf16.mxu1 %v5419_v1 }
 0xa54   : > { %5244 = vmatpush3.bf16.msra.mxu0 %v5420_v63  ;;  %5266 = vmatpush3.bf16.msra.mxu1 %v5421_v22  ;;  %v5172_v22 = vld [vmem:[%s8298_s9] ss:$0 sm:$0xff] }
 0xa55   : > { %5245 = vmatprep.subr.bf16.mxu0 %v5422_v9  ;;  %5267 = vmatprep.subr.bf16.mxu1 %v5423_v15 }
 0xa58   : > { %5246 = vmatpush3.bf16.msra.mxu0 %v5424_v36  ;;  %5268 = vmatpush3.bf16.msra.mxu1 %v5425_v55 }
 0xa59   : > { %5247 = vmatprep.subr.bf16.mxu0 %v5426_v4  ;;  %5269 = vmatprep.subr.bf16.mxu1 %v5427_v32 }
 0xa5c   : > { %5248 = vmatpush3.bf16.msra.mxu0 %v5428_v48  ;;  %5270 = vmatpush3.bf16.msra.mxu1 %v5429_v8 }
 0xa5d   : > { %5249 = vmatprep.subr.bf16.mxu0 %v5430_v5  ;;  %5271 = vmatprep.subr.bf16.mxu1 %v5431_v57 }
 0xa60   : > { %5250 = vmatpush3.bf16.msra.mxu0 %v5432_v19  ;;  %5272 = vmatpush3.bf16.msra.mxu1 %v5433_v17 }
 0xa61   : > { %5251 = vmatprep.subr.bf16.mxu0 %v5434_v50  ;;  %5273 = vmatprep.subr.bf16.mxu1 %v5435_v37 }
 0xa64   : > { %5252 = vmatpush3.bf16.msra.mxu0 %v5436_v39  ;;  %5274 = vmatpush3.bf16.msra.mxu1 %v5437_v38 }
 0xa65   : > { %5253 = vmatprep.subr.bf16.mxu0 %v5438_v52  ;;  %5275 = vmatprep.subr.bf16.mxu1 %v5439_v44 }
 0xa68   : > { %5254 = vmatpush3.bf16.msra.mxu0 %v5440_v45  ;;  %5276 = vmatpush3.bf16.msra.mxu1 %v5441_v62 }
 0xb1e   : > { %v4357_v43 = vpop.f32.mrb[100].mxu0  ;;  %v4398_v11 = vpop.f32.mrb[100].mxu1 }
 0xb1f   : > { %v4358_v34 = vadd.f32 %v4357_v43, %v3955_v28  ;;  %v4399_v60 = vadd.f32 %v4398_v11, %v3996_v26  ;;  %v4359_v47 = vpop.f32.mrb[101].mxu0  ;;  %v4400_v61 = vpop.f32.mrb[101].mxu1 }
 0xb20   : > { %v4360_v29 = vadd.f32 %v4359_v47, %v3957_v14  ;;  %v4401_v56 = vadd.f32 %v4400_v61, %v3998_v58  ;;  %v4361_v16 = vpop.f32.mrb[102].mxu0  ;;  %v4402_v40 = vpop.f32.mrb[102].mxu1 }
 0xb21   : > { %v4427_v31 = vadd.f32 %v4410_v35, %v4358_v34  ;;  %v4429_v23 = vadd.f32 %v4418_v3, %v4399_v60  ;;  %v4362_v49 = vpop.f32.mrb[103].mxu0  ;;  %v4403_v20 = vpop.f32.mrb[103].mxu1 }
 0xb22   : > { %v4428_v18 = vadd.f32 %v4414_v54, %v4360_v29  ;;  %v4430_v13 = vadd.f32 %v4422_v53, %v4401_v56 }
 0xb23   : > { %v4431_v24 = vmax.f32 %v4427_v31, 0.0  ;;  %v4433_v12 = vmax.f32 %v4429_v23, 0.0 }
 0xb24   : > { %v4432_v27 = vmax.f32 %v4428_v18, 0.0  ;;  %v4434_v6 = vmax.f32 %v4430_v13, 0.0 }
 0xb25   : > { %v4435_v21 = vpack.c.bf16 %v4431_v24, %v4431_v24  ;;  %v4437_v25 = vpack.c.bf16 %v4433_v12, %v4433_v12 }
 0xb26   : > { %v4436_v0 = vpack.c.bf16 %v4432_v27, %v4432_v27  ;;  %v4438_v51 = vpack.c.bf16 %v4434_v6, %v4434_v6 }
 0xb28   : > { %4734 = vmatprep.mubr.bf16.mxu0 %v4436_v0  ;;  %4774 = vmatprep.mubr.bf16.mxu1 %v4438_v51 }
 0xb29   : > { %4735 = vmatmul.mubr.bf16.vlgmr.msra.gmra.mrb[104].mxu0 %v4435_v21  ;;  %4775 = vmatmul.mubr.bf16.vlgmr.msra.gmra.mrb[104].mxu1 %v4437_v25 }
 0xbfc   : > { %v5255_v1 = vpop.f32.mrb[104].mxu0  ;;  %v5277_v63 = vpop.f32.mrb[104].mxu1 }
 0xbfd   : > { %v5256_v9 = vpop.f32.mrb[105].mxu0  ;;  %v5278_v15 = vpop.f32.mrb[105].mxu1 }
 0xbfe   : > { %v5257_v36 = vadd.f32 %v5256_v9, %v5255_v1  ;;  %v5279_v55 = vadd.f32 %v5278_v15, %v5277_v63  ;;  %v5258_v4 = vpop.f32.mrb[106].mxu0  ;;  %v5280_v32 = vpop.f32.mrb[106].mxu1 }
 0xbff   : > { %v5259_v48 = vpop.f32.mrb[107].mxu0  ;;  %v5281_v8 = vpop.f32.mrb[107].mxu1 }
 0xc00   : > { %v4737_v5 = vadd.f32 %v5257_v36, %v5172_v22 }
 0xc02   : > { %v4777_v57 = vadd.f32 %v5279_v55, %v4737_v5 }
 0xc04   : > { %4782 = vst [vmem:[%s443_s12] sm:$0xff] %v4777_v57 }
 0xc05 PF: > { %p17_p9 = scmp.ge.s32.totalorder %s5796_s17, 4   ;;  %s9398_s13 = smov %s5716_s14 }
 0xc06   : > { %s9399_s14 = smov %s5805_s20  ;;  %s9400_s15 = smov %s5796_s17 }
 0xc07   :  { %19 = sbr.rel (!%p17_p9) target bundleno = 2 (0x2), region = 146 }

</bundles_post_ra>
